<compile_context>
chip_gen: v7x
topology: tpu7x:2x2x1
jax: 0.10.0
libtpu: 0.0.40
codegen_flags: <defaults>
</compile_context>

<pallas_src>
import numpy as np

import jax
import jax.numpy as jnp
from jax.experimental import pallas as pl
from jax.experimental.pallas import tpu as pltpu

BN_EPS = 1e-5

# Static network dims (28x28x1 input is what Linear(256, 64) implies: 16*4*4=256).
H0 = 28                              # input spatial size
K1, C1, H1, P1 = 3, 8, 26, 13        # conv1 kernel / channels / out / pooled
K2, C2, H2, P2 = 5, 16, 9, 4         # conv2 kernel / channels / out / pooled
NCP = 128                            # logits padded to 128 lanes (lane-dense store)


# ------------------------------ Pallas kernel ------------------------------ #

def _bn_relu(a, gamma, beta, n_ch, n_w, cnt):
    """Training-mode BatchNorm (biased batch stats) + ReLU on a (rows, n_w*n_ch) slab.

    Lane layout is w*n_ch + c; statistics are per channel c over rows and w.
    """
    rsum = jnp.sum(a, axis=0, keepdims=True)                    # (1, n_w*n_ch)
    csum = rsum[:, 0:n_ch]
    for w in range(1, n_w):                                     # fold w groups
        csum = csum + rsum[:, w * n_ch:(w + 1) * n_ch]
    mean = csum * (1.0 / cnt)                                   # (1, n_ch)
    mean_l = jnp.concatenate([mean] * n_w, axis=1)              # (1, n_w*n_ch)
    d = a - mean_l
    r2sum = jnp.sum(d * d, axis=0, keepdims=True)
    vsum = r2sum[:, 0:n_ch]
    for w in range(1, n_w):
        vsum = vsum + r2sum[:, w * n_ch:(w + 1) * n_ch]
    var = vsum * (1.0 / cnt)
    scale = gamma * jax.lax.rsqrt(var + BN_EPS)                 # gamma folded in
    scale_l = jnp.concatenate([scale] * n_w, axis=1)
    beta_l = jnp.concatenate([beta] * n_w, axis=1)
    return jnp.maximum(d * scale_l + beta_l, 0.0)


def _pool_pairmax(u, n_ch):
    """Pairwise 2x2 max: valid at even-w lane groups / even-h rows (rest is unused)."""
    uw = jnp.maximum(u, jnp.concatenate([u[:, n_ch:], u[:, :n_ch]], axis=1))
    return jnp.maximum(uw, jnp.concatenate([uw[1:, :], uw[:1, :]], axis=0))


def bestmodel_kernel(x_ref, t1_ref, g1_ref, be1_ref, t2_ref, g2_ref, be2_ref,
                     wm_ref, bc_ref, o_ref):
    n = x_ref.shape[0] // H0                                    # batch size

    # ---- conv1 (1->8, 3x3, VALID): 3 banded MXU matmuls; rows=(n,h), lanes=w*8+c
    a1 = None
    for kh in range(K1):
        rows = jnp.concatenate(
            [x_ref[s * H0 + kh: s * H0 + kh + H1, :] for s in range(n)], axis=0)
        part = jnp.dot(rows, t1_ref[kh], preferred_element_type=jnp.float32)
        a1 = part if a1 is None else a1 + part                  # (n*26, 208)

    u1 = _bn_relu(a1, g1_ref[...], be1_ref[...], C1, H1, float(n * H1 * H1))

    # ---- maxpool1 2x2: shift+max, then keep even-h rows.  Even-w lane compaction
    #      is folded into t2 (its odd-w rows are zero).
    m1 = _pool_pairmax(u1, C1)                                  # (n*26, 208)
    p1 = jnp.concatenate(
        [m1[s * H1 + 2 * i: s * H1 + 2 * i + 1, :]
         for s in range(n) for i in range(P1)], axis=0)         # (n*13, 208)

    # ---- conv2 (8->16, 5x5, VALID): 5 banded MXU matmuls; lanes=w*16+c
    a2 = None
    for kh in range(K2):
        rows = jnp.concatenate(
            [p1[s * P1 + kh: s * P1 + kh + H2, :] for s in range(n)], axis=0)
        part = jnp.dot(rows, t2_ref[kh], preferred_element_type=jnp.float32)
        a2 = part if a2 is None else a2 + part                  # (n*9, 144)

    u2 = _bn_relu(a2, g2_ref[...], be2_ref[...], C2, H2, float(n * H2 * H2))

    # ---- maxpool2 (floor mode drops h=8 / w=8) + NCHW flatten + collapsed MLP.
    #      The w compaction and the torch flatten permutation are folded into wm;
    #      logits are accumulated into a lane-dense (n, 128) slab.
    m2 = _pool_pairmax(u2, C2)                                  # (n*9, 144)
    acc = jnp.zeros((n, NCP), jnp.float32)
    for i in range(P2):
        rows = jnp.concatenate(
            [m2[s * H2 + 2 * i: s * H2 + 2 * i + 1, :] for s in range(n)], axis=0)
        acc = acc + jnp.dot(rows, wm_ref[i], preferred_element_type=jnp.float32)
    o_ref[...] = acc + bc_ref[...]


# --------------------- constant folding (float64 numpy) -------------------- #

def build_kernel_constants(params, n_classes):
    """Fold PyTorch-layout parameters into the constant matrices the kernel uses."""
    (w1, _b1, g1, be1, w2, _b2, g2, be2,
     wl1, bl1, wl2, bl2, wl3, bl3) = [np.asarray(p, np.float64) for p in params]
    # _b1/_b2 (conv biases) are intentionally dropped: exact no-ops before
    # training-mode BatchNorm.

    # conv1 banded matrices: T1[kh][wo+kw, wo*8+co] = w1[co, 0, kh, kw]
    t1 = np.zeros((K1, H0, H1 * C1))
    for kh in range(K1):
        for wo in range(H1):
            for kw in range(K1):
                t1[kh, wo + kw, wo * C1: wo * C1 + C1] = w1[:, 0, kh, kw]

    # conv2 banded matrices over the *uncompacted* pool1 lanes (208); zero rows at
    # odd-w lanes implement the pool width-compaction for free.
    t2 = np.zeros((K2, H1 * C1, H2 * C2))
    for kh in range(K2):
        for wo in range(H2):
            for kw in range(K2):
                wi = wo + kw                                    # pooled-w input idx
                for ci in range(C1):
                    t2[kh, (2 * wi) * C1 + ci, wo * C2: wo * C2 + C2] = w2[:, ci, kh, kw]

    # Collapse the three activation-free Linears into one affine map, fold in the
    # torch NCHW flatten order and the pool2 lane layout, pad classes to 128 lanes.
    wc = wl1.T @ wl2.T @ wl3.T                                  # (256, n_classes)
    bc = (bl1 @ wl2.T + bl2) @ wl3.T + bl3                      # (n_classes,)
    wm = np.zeros((P2, H2 * C2, NCP))
    for i in range(P2):
        for j in range(P2):
            for co in range(C2):
                wm[i, (2 * j) * C2 + co, :n_classes] = wc[co * (P2 * P2) + i * P2 + j, :]
    bcp = np.zeros((1, NCP))
    bcp[0, :n_classes] = bc

    f32 = lambda a: jnp.asarray(a, jnp.float32)
    return (f32(t1), f32(g1).reshape(1, C1), f32(be1).reshape(1, C1),
            f32(t2), f32(g2).reshape(1, C2), f32(be2).reshape(1, C2),
            f32(wm), f32(bcp))


def make_forward(consts, n_classes):
    t1, g1, be1, t2, g2, be2, wm, bcp = consts

    @jax.jit
    def forward(x_nchw):
        nb = x_nchw.shape[0]
        x2d = x_nchw.reshape(nb * H0, H0)                       # rows = n*28 + h
        out = pl.pallas_call(
            bestmodel_kernel,
            out_shape=jax.ShapeDtypeStruct((nb, NCP), jnp.float32),
            in_specs=[pl.BlockSpec(memory_space=pltpu.MemorySpace.VMEM)
                      for _ in range(9)],
            out_specs=pl.BlockSpec(memory_space=pltpu.MemorySpace.VMEM),
        )(x2d, t1, g1, be1, t2, g2, be2, wm, bcp)
        return out[:, :n_classes]

    return forward


# --------------------------- pure-JAX reference ---------------------------- #

@jax.jit
def reference_forward(x_nchw, params):
    (w1, b1, g1, be1, w2, b2, g2, be2, wl1, bl1, wl2, bl2, wl3, bl3) = params

    def conv(x, w, b):
        y = jax.lax.conv_general_dilated(
            x, w, (1, 1), "VALID", dimension_numbers=("NCHW", "OIHW", "NCHW"))
        return y + b.reshape(1, -1, 1, 1)

    def bn(x, g, be):                      # training-mode BatchNorm2d
        m = x.mean(axis=(0, 2, 3), keepdims=True)
        v = ((x - m) ** 2).mean(axis=(0, 2, 3), keepdims=True)
        return (x - m) * jax.lax.rsqrt(v + BN_EPS) * g.reshape(1, -1, 1, 1) \
            + be.reshape(1, -1, 1, 1)

    def pool(x):
        return jax.lax.reduce_window(x, -jnp.inf, jax.lax.max,
                                     (1, 1, 2, 2), (1, 1, 2, 2), "VALID")

    y = pool(jnp.maximum(bn(conv(x_nchw, w1, b1), g1, be1), 0.0))
    y = pool(jnp.maximum(bn(conv(y, w2, b2), g2, be2), 0.0))
    y = y.reshape(y.shape[0], -1)          # torch x.view(-1, C*H*W), NCHW order
    y = y @ wl1.T + bl1
    y = y @ wl2.T + bl2
    y = y @ wl3.T + bl3
    return y


# ----------------------------------- main ----------------------------------- #

if __name__ == "__main__":
    key = jax.random.PRNGKey(0)
    ks = jax.random.split(key, 16)
    n_classes = 10
    batch = 2

    x = jax.random.normal(ks[0], (batch, 1, H0, H0), dtype=jnp.float32)

    # Parameters in native PyTorch layouts (OIHW conv weights, (out,in) linears).
    w1 = 0.2 * jax.random.normal(ks[1], (C1, 1, K1, K1), jnp.float32)
    b1 = 0.1 * jax.random.normal(ks[2], (C1,), jnp.float32)
    g1 = 1.0 + 0.1 * jax.random.normal(ks[3], (C1,), jnp.float32)
    be1 = 0.1 * jax.random.normal(ks[4], (C1,), jnp.float32)
    w2 = 0.1 * jax.random.normal(ks[5], (C2, C1, K2, K2), jnp.float32)
    b2 = 0.1 * jax.random.normal(ks[6], (C2,), jnp.float32)
    g2 = 1.0 + 0.1 * jax.random.normal(ks[7], (C2,), jnp.float32)
    be2 = 0.1 * jax.random.normal(ks[8], (C2,), jnp.float32)
    wl1 = 0.06 * jax.random.normal(ks[9], (64, 256), jnp.float32)
    bl1 = 0.05 * jax.random.normal(ks[10], (64,), jnp.float32)
    wl2 = 0.10 * jax.random.normal(ks[11], (32, 64), jnp.float32)
    bl2 = 0.05 * jax.random.normal(ks[12], (32,), jnp.float32)
    wl3 = 0.15 * jax.random.normal(ks[13], (n_classes, 32), jnp.float32)
    bl3 = 0.05 * jax.random.normal(ks[14], (n_classes,), jnp.float32)

    params = (w1, b1, g1, be1, w2, b2, g2, be2, wl1, bl1, wl2, bl2, wl3, bl3)

    consts = build_kernel_constants(params, n_classes)
    forward = make_forward(consts, n_classes)

    out = jax.block_until_ready(forward(x))
    ref = jax.block_until_ready(reference_forward(x, params))

    assert out.shape == (batch, n_classes), out.shape
    max_err = float(jnp.max(jnp.abs(out - ref)))
    if not jnp.allclose(out, ref, rtol=2e-3, atol=2e-3):
        raise AssertionError(f"mismatch vs reference: max abs err {max_err}")
    print("KERNEL_OK")
</pallas_src>

<mosaic_0001>
module attributes {stable_mosaic.version = 11 : i64} {
  func.func @bestmodel_kernel(%arg0: memref<56x28xf32, #tpu.memory_space<vmem>>, %arg1: memref<3x28x208xf32, #tpu.memory_space<vmem>>, %arg2: memref<1x8xf32, #tpu.memory_space<vmem>>, %arg3: memref<1x8xf32, #tpu.memory_space<vmem>>, %arg4: memref<5x208x144xf32, #tpu.memory_space<vmem>>, %arg5: memref<1x16xf32, #tpu.memory_space<vmem>>, %arg6: memref<1x16xf32, #tpu.memory_space<vmem>>, %arg7: memref<4x144x128xf32, #tpu.memory_space<vmem>>, %arg8: memref<1x128xf32, #tpu.memory_space<vmem>>, %arg9: memref<2x128xf32, #tpu.memory_space<vmem>>) attributes {dimension_semantics = [], scalar_prefetch = 0 : i64, scratch_operands = 0 : i64, tpu.core_type = #tpu.core_type<tc>} {
    %c0 = arith.constant 0 : index
    %c0_0 = arith.constant 0 : index
    %0 = vector.load %arg0[%c0, %c0_0] : memref<56x28xf32, #tpu.memory_space<vmem>>, vector<26x28xf32>
    %c28 = arith.constant 28 : index
    %c0_1 = arith.constant 0 : index
    %1 = vector.load %arg0[%c28, %c0_1] : memref<56x28xf32, #tpu.memory_space<vmem>>, vector<26x28xf32>
    %2 = tpu.concatenate %0, %1 in 0 : vector<26x28xf32>, vector<26x28xf32> -> vector<52x28xf32>
    %c0_2 = arith.constant 0 : index
    %c0_3 = arith.constant 0 : index
    %c0_4 = arith.constant 0 : index
    %3 = vector.load %arg1[%c0_2, %c0_3, %c0_4] : memref<3x28x208xf32, #tpu.memory_space<vmem>>, vector<1x28x208xf32>
    %4 = vector.shape_cast %3 : vector<1x28x208xf32> to vector<28x208xf32>
    %cst = arith.constant dense<0.000000e+00> : vector<52x208xf32>
    %5 = tpu.matmul %2, %4, %cst {dimension_numbers = #tpu.dot_dimension_numbers<[1], [0], [0], [1], [0, 0, 1, 1], [], []>} : vector<52x28xf32>, vector<28x208xf32>, vector<52x208xf32> -> vector<52x208xf32>
    %c1 = arith.constant 1 : index
    %c0_5 = arith.constant 0 : index
    %6 = vector.load %arg0[%c1, %c0_5] : memref<56x28xf32, #tpu.memory_space<vmem>>, vector<26x28xf32>
    %c29 = arith.constant 29 : index
    %c0_6 = arith.constant 0 : index
    %7 = vector.load %arg0[%c29, %c0_6] : memref<56x28xf32, #tpu.memory_space<vmem>>, vector<26x28xf32>
    %8 = tpu.concatenate %6, %7 in 0 : vector<26x28xf32>, vector<26x28xf32> -> vector<52x28xf32>
    %c1_7 = arith.constant 1 : index
    %c0_8 = arith.constant 0 : index
    %c0_9 = arith.constant 0 : index
    %9 = vector.load %arg1[%c1_7, %c0_8, %c0_9] : memref<3x28x208xf32, #tpu.memory_space<vmem>>, vector<1x28x208xf32>
    %10 = vector.shape_cast %9 : vector<1x28x208xf32> to vector<28x208xf32>
    %cst_10 = arith.constant dense<0.000000e+00> : vector<52x208xf32>
    %11 = tpu.matmul %8, %10, %cst_10 {dimension_numbers = #tpu.dot_dimension_numbers<[1], [0], [0], [1], [0, 0, 1, 1], [], []>} : vector<52x28xf32>, vector<28x208xf32>, vector<52x208xf32> -> vector<52x208xf32>
    %12 = arith.addf %5, %11 : vector<52x208xf32>
    %c2 = arith.constant 2 : index
    %c0_11 = arith.constant 0 : index
    %13 = vector.load %arg0[%c2, %c0_11] : memref<56x28xf32, #tpu.memory_space<vmem>>, vector<26x28xf32>
    %c30 = arith.constant 30 : index
    %c0_12 = arith.constant 0 : index
    %14 = vector.load %arg0[%c30, %c0_12] : memref<56x28xf32, #tpu.memory_space<vmem>>, vector<26x28xf32>
    %15 = tpu.concatenate %13, %14 in 0 : vector<26x28xf32>, vector<26x28xf32> -> vector<52x28xf32>
    %c2_13 = arith.constant 2 : index
    %c0_14 = arith.constant 0 : index
    %c0_15 = arith.constant 0 : index
    %16 = vector.load %arg1[%c2_13, %c0_14, %c0_15] : memref<3x28x208xf32, #tpu.memory_space<vmem>>, vector<1x28x208xf32>
    %17 = vector.shape_cast %16 : vector<1x28x208xf32> to vector<28x208xf32>
    %cst_16 = arith.constant dense<0.000000e+00> : vector<52x208xf32>
    %18 = tpu.matmul %15, %17, %cst_16 {dimension_numbers = #tpu.dot_dimension_numbers<[1], [0], [0], [1], [0, 0, 1, 1], [], []>} : vector<52x28xf32>, vector<28x208xf32>, vector<52x208xf32> -> vector<52x208xf32>
    %19 = arith.addf %12, %18 : vector<52x208xf32>
    %c0_17 = arith.constant 0 : index
    %c0_18 = arith.constant 0 : index
    %20 = vector.load %arg2[%c0_17, %c0_18] : memref<1x8xf32, #tpu.memory_space<vmem>>, vector<1x8xf32>
    %c0_19 = arith.constant 0 : index
    %c0_20 = arith.constant 0 : index
    %21 = vector.load %arg3[%c0_19, %c0_20] : memref<1x8xf32, #tpu.memory_space<vmem>>, vector<1x8xf32>
    %cst_21 = arith.constant dense<0.000000e+00> : vector<208xf32>
    %22 = vector.multi_reduction <add>, %19, %cst_21 [0] : vector<52x208xf32> to vector<208xf32>
    %23 = vector.shape_cast %22 : vector<208xf32> to vector<1x208xf32>
    %24 = vector.extract_strided_slice %23 {offsets = [0, 0], sizes = [1, 8], strides = [1, 1]} : vector<1x208xf32> to vector<1x8xf32>
    %25 = vector.extract_strided_slice %23 {offsets = [0, 8], sizes = [1, 8], strides = [1, 1]} : vector<1x208xf32> to vector<1x8xf32>
    %26 = arith.addf %24, %25 : vector<1x8xf32>
    %27 = vector.extract_strided_slice %23 {offsets = [0, 16], sizes = [1, 8], strides = [1, 1]} : vector<1x208xf32> to vector<1x8xf32>
    %28 = arith.addf %26, %27 : vector<1x8xf32>
    %29 = vector.extract_strided_slice %23 {offsets = [0, 24], sizes = [1, 8], strides = [1, 1]} : vector<1x208xf32> to vector<1x8xf32>
    %30 = arith.addf %28, %29 : vector<1x8xf32>
    %31 = vector.extract_strided_slice %23 {offsets = [0, 32], sizes = [1, 8], strides = [1, 1]} : vector<1x208xf32> to vector<1x8xf32>
    %32 = arith.addf %30, %31 : vector<1x8xf32>
    %33 = vector.extract_strided_slice %23 {offsets = [0, 40], sizes = [1, 8], strides = [1, 1]} : vector<1x208xf32> to vector<1x8xf32>
    %34 = arith.addf %32, %33 : vector<1x8xf32>
    %35 = vector.extract_strided_slice %23 {offsets = [0, 48], sizes = [1, 8], strides = [1, 1]} : vector<1x208xf32> to vector<1x8xf32>
    %36 = arith.addf %34, %35 : vector<1x8xf32>
    %37 = vector.extract_strided_slice %23 {offsets = [0, 56], sizes = [1, 8], strides = [1, 1]} : vector<1x208xf32> to vector<1x8xf32>
    %38 = arith.addf %36, %37 : vector<1x8xf32>
    %39 = vector.extract_strided_slice %23 {offsets = [0, 64], sizes = [1, 8], strides = [1, 1]} : vector<1x208xf32> to vector<1x8xf32>
    %40 = arith.addf %38, %39 : vector<1x8xf32>
    %41 = vector.extract_strided_slice %23 {offsets = [0, 72], sizes = [1, 8], strides = [1, 1]} : vector<1x208xf32> to vector<1x8xf32>
    %42 = arith.addf %40, %41 : vector<1x8xf32>
    %43 = vector.extract_strided_slice %23 {offsets = [0, 80], sizes = [1, 8], strides = [1, 1]} : vector<1x208xf32> to vector<1x8xf32>
    %44 = arith.addf %42, %43 : vector<1x8xf32>
    %45 = vector.extract_strided_slice %23 {offsets = [0, 88], sizes = [1, 8], strides = [1, 1]} : vector<1x208xf32> to vector<1x8xf32>
    %46 = arith.addf %44, %45 : vector<1x8xf32>
    %47 = vector.extract_strided_slice %23 {offsets = [0, 96], sizes = [1, 8], strides = [1, 1]} : vector<1x208xf32> to vector<1x8xf32>
    %48 = arith.addf %46, %47 : vector<1x8xf32>
    %49 = vector.extract_strided_slice %23 {offsets = [0, 104], sizes = [1, 8], strides = [1, 1]} : vector<1x208xf32> to vector<1x8xf32>
    %50 = arith.addf %48, %49 : vector<1x8xf32>
    %51 = vector.extract_strided_slice %23 {offsets = [0, 112], sizes = [1, 8], strides = [1, 1]} : vector<1x208xf32> to vector<1x8xf32>
    %52 = arith.addf %50, %51 : vector<1x8xf32>
    %53 = vector.extract_strided_slice %23 {offsets = [0, 120], sizes = [1, 8], strides = [1, 1]} : vector<1x208xf32> to vector<1x8xf32>
    %54 = arith.addf %52, %53 : vector<1x8xf32>
    %55 = vector.extract_strided_slice %23 {offsets = [0, 128], sizes = [1, 8], strides = [1, 1]} : vector<1x208xf32> to vector<1x8xf32>
    %56 = arith.addf %54, %55 : vector<1x8xf32>
    %57 = vector.extract_strided_slice %23 {offsets = [0, 136], sizes = [1, 8], strides = [1, 1]} : vector<1x208xf32> to vector<1x8xf32>
    %58 = arith.addf %56, %57 : vector<1x8xf32>
    %59 = vector.extract_strided_slice %23 {offsets = [0, 144], sizes = [1, 8], strides = [1, 1]} : vector<1x208xf32> to vector<1x8xf32>
    %60 = arith.addf %58, %59 : vector<1x8xf32>
    %61 = vector.extract_strided_slice %23 {offsets = [0, 152], sizes = [1, 8], strides = [1, 1]} : vector<1x208xf32> to vector<1x8xf32>
    %62 = arith.addf %60, %61 : vector<1x8xf32>
    %63 = vector.extract_strided_slice %23 {offsets = [0, 160], sizes = [1, 8], strides = [1, 1]} : vector<1x208xf32> to vector<1x8xf32>
    %64 = arith.addf %62, %63 : vector<1x8xf32>
    %65 = vector.extract_strided_slice %23 {offsets = [0, 168], sizes = [1, 8], strides = [1, 1]} : vector<1x208xf32> to vector<1x8xf32>
    %66 = arith.addf %64, %65 : vector<1x8xf32>
    %67 = vector.extract_strided_slice %23 {offsets = [0, 176], sizes = [1, 8], strides = [1, 1]} : vector<1x208xf32> to vector<1x8xf32>
    %68 = arith.addf %66, %67 : vector<1x8xf32>
    %69 = vector.extract_strided_slice %23 {offsets = [0, 184], sizes = [1, 8], strides = [1, 1]} : vector<1x208xf32> to vector<1x8xf32>
    %70 = arith.addf %68, %69 : vector<1x8xf32>
    %71 = vector.extract_strided_slice %23 {offsets = [0, 192], sizes = [1, 8], strides = [1, 1]} : vector<1x208xf32> to vector<1x8xf32>
    %72 = arith.addf %70, %71 : vector<1x8xf32>
    %73 = vector.extract_strided_slice %23 {offsets = [0, 200], sizes = [1, 8], strides = [1, 1]} : vector<1x208xf32> to vector<1x8xf32>
    %74 = arith.addf %72, %73 : vector<1x8xf32>
    %cst_22 = arith.constant 7.396450e-04 : f32
    %75 = vector.broadcast %cst_22 : f32 to vector<1x8xf32>
    %76 = arith.mulf %74, %75 : vector<1x8xf32>
    %77 = tpu.concatenate %76, %76, %76, %76, %76, %76, %76, %76, %76, %76, %76, %76, %76, %76, %76, %76 in 1 : vector<1x8xf32>, vector<1x8xf32>, vector<1x8xf32>, vector<1x8xf32>, vector<1x8xf32>, vector<1x8xf32>, vector<1x8xf32>, vector<1x8xf32>, vector<1x8xf32>, vector<1x8xf32>, vector<1x8xf32>, vector<1x8xf32>, vector<1x8xf32>, vector<1x8xf32>, vector<1x8xf32>, vector<1x8xf32> -> vector<1x128xf32>
    %78 = tpu.concatenate %76, %76, %76, %76, %76, %76, %76, %76, %76, %76 in 1 : vector<1x8xf32>, vector<1x8xf32>, vector<1x8xf32>, vector<1x8xf32>, vector<1x8xf32>, vector<1x8xf32>, vector<1x8xf32>, vector<1x8xf32>, vector<1x8xf32>, vector<1x8xf32> -> vector<1x80xf32>
    %79 = tpu.concatenate %77, %78 in 1 : vector<1x128xf32>, vector<1x80xf32> -> vector<1x208xf32>
    %80 = vector.broadcast %79 : vector<1x208xf32> to vector<52x208xf32>
    %81 = arith.subf %19, %80 : vector<52x208xf32>
    %82 = arith.mulf %81, %81 : vector<52x208xf32>
    %cst_23 = arith.constant dense<0.000000e+00> : vector<208xf32>
    %83 = vector.multi_reduction <add>, %82, %cst_23 [0] : vector<52x208xf32> to vector<208xf32>
    %84 = vector.shape_cast %83 : vector<208xf32> to vector<1x208xf32>
    %85 = vector.extract_strided_slice %84 {offsets = [0, 0], sizes = [1, 8], strides = [1, 1]} : vector<1x208xf32> to vector<1x8xf32>
    %86 = vector.extract_strided_slice %84 {offsets = [0, 8], sizes = [1, 8], strides = [1, 1]} : vector<1x208xf32> to vector<1x8xf32>
    %87 = arith.addf %85, %86 : vector<1x8xf32>
    %88 = vector.extract_strided_slice %84 {offsets = [0, 16], sizes = [1, 8], strides = [1, 1]} : vector<1x208xf32> to vector<1x8xf32>
    %89 = arith.addf %87, %88 : vector<1x8xf32>
    %90 = vector.extract_strided_slice %84 {offsets = [0, 24], sizes = [1, 8], strides = [1, 1]} : vector<1x208xf32> to vector<1x8xf32>
    %91 = arith.addf %89, %90 : vector<1x8xf32>
    %92 = vector.extract_strided_slice %84 {offsets = [0, 32], sizes = [1, 8], strides = [1, 1]} : vector<1x208xf32> to vector<1x8xf32>
    %93 = arith.addf %91, %92 : vector<1x8xf32>
    %94 = vector.extract_strided_slice %84 {offsets = [0, 40], sizes = [1, 8], strides = [1, 1]} : vector<1x208xf32> to vector<1x8xf32>
    %95 = arith.addf %93, %94 : vector<1x8xf32>
    %96 = vector.extract_strided_slice %84 {offsets = [0, 48], sizes = [1, 8], strides = [1, 1]} : vector<1x208xf32> to vector<1x8xf32>
    %97 = arith.addf %95, %96 : vector<1x8xf32>
    %98 = vector.extract_strided_slice %84 {offsets = [0, 56], sizes = [1, 8], strides = [1, 1]} : vector<1x208xf32> to vector<1x8xf32>
    %99 = arith.addf %97, %98 : vector<1x8xf32>
    %100 = vector.extract_strided_slice %84 {offsets = [0, 64], sizes = [1, 8], strides = [1, 1]} : vector<1x208xf32> to vector<1x8xf32>
    %101 = arith.addf %99, %100 : vector<1x8xf32>
    %102 = vector.extract_strided_slice %84 {offsets = [0, 72], sizes = [1, 8], strides = [1, 1]} : vector<1x208xf32> to vector<1x8xf32>
    %103 = arith.addf %101, %102 : vector<1x8xf32>
    %104 = vector.extract_strided_slice %84 {offsets = [0, 80], sizes = [1, 8], strides = [1, 1]} : vector<1x208xf32> to vector<1x8xf32>
    %105 = arith.addf %103, %104 : vector<1x8xf32>
    %106 = vector.extract_strided_slice %84 {offsets = [0, 88], sizes = [1, 8], strides = [1, 1]} : vector<1x208xf32> to vector<1x8xf32>
    %107 = arith.addf %105, %106 : vector<1x8xf32>
    %108 = vector.extract_strided_slice %84 {offsets = [0, 96], sizes = [1, 8], strides = [1, 1]} : vector<1x208xf32> to vector<1x8xf32>
    %109 = arith.addf %107, %108 : vector<1x8xf32>
    %110 = vector.extract_strided_slice %84 {offsets = [0, 104], sizes = [1, 8], strides = [1, 1]} : vector<1x208xf32> to vector<1x8xf32>
    %111 = arith.addf %109, %110 : vector<1x8xf32>
    %112 = vector.extract_strided_slice %84 {offsets = [0, 112], sizes = [1, 8], strides = [1, 1]} : vector<1x208xf32> to vector<1x8xf32>
    %113 = arith.addf %111, %112 : vector<1x8xf32>
    %114 = vector.extract_strided_slice %84 {offsets = [0, 120], sizes = [1, 8], strides = [1, 1]} : vector<1x208xf32> to vector<1x8xf32>
    %115 = arith.addf %113, %114 : vector<1x8xf32>
    %116 = vector.extract_strided_slice %84 {offsets = [0, 128], sizes = [1, 8], strides = [1, 1]} : vector<1x208xf32> to vector<1x8xf32>
    %117 = arith.addf %115, %116 : vector<1x8xf32>
    %118 = vector.extract_strided_slice %84 {offsets = [0, 136], sizes = [1, 8], strides = [1, 1]} : vector<1x208xf32> to vector<1x8xf32>
    %119 = arith.addf %117, %118 : vector<1x8xf32>
    %120 = vector.extract_strided_slice %84 {offsets = [0, 144], sizes = [1, 8], strides = [1, 1]} : vector<1x208xf32> to vector<1x8xf32>
    %121 = arith.addf %119, %120 : vector<1x8xf32>
    %122 = vector.extract_strided_slice %84 {offsets = [0, 152], sizes = [1, 8], strides = [1, 1]} : vector<1x208xf32> to vector<1x8xf32>
    %123 = arith.addf %121, %122 : vector<1x8xf32>
    %124 = vector.extract_strided_slice %84 {offsets = [0, 160], sizes = [1, 8], strides = [1, 1]} : vector<1x208xf32> to vector<1x8xf32>
    %125 = arith.addf %123, %124 : vector<1x8xf32>
    %126 = vector.extract_strided_slice %84 {offsets = [0, 168], sizes = [1, 8], strides = [1, 1]} : vector<1x208xf32> to vector<1x8xf32>
    %127 = arith.addf %125, %126 : vector<1x8xf32>
    %128 = vector.extract_strided_slice %84 {offsets = [0, 176], sizes = [1, 8], strides = [1, 1]} : vector<1x208xf32> to vector<1x8xf32>
    %129 = arith.addf %127, %128 : vector<1x8xf32>
    %130 = vector.extract_strided_slice %84 {offsets = [0, 184], sizes = [1, 8], strides = [1, 1]} : vector<1x208xf32> to vector<1x8xf32>
    %131 = arith.addf %129, %130 : vector<1x8xf32>
    %132 = vector.extract_strided_slice %84 {offsets = [0, 192], sizes = [1, 8], strides = [1, 1]} : vector<1x208xf32> to vector<1x8xf32>
    %133 = arith.addf %131, %132 : vector<1x8xf32>
    %134 = vector.extract_strided_slice %84 {offsets = [0, 200], sizes = [1, 8], strides = [1, 1]} : vector<1x208xf32> to vector<1x8xf32>
    %135 = arith.addf %133, %134 : vector<1x8xf32>
    %cst_24 = arith.constant 7.396450e-04 : f32
    %136 = vector.broadcast %cst_24 : f32 to vector<1x8xf32>
    %137 = arith.mulf %135, %136 : vector<1x8xf32>
    %cst_25 = arith.constant 9.99999974E-6 : f32
    %138 = vector.broadcast %cst_25 : f32 to vector<1x8xf32>
    %139 = arith.addf %137, %138 : vector<1x8xf32>
    %140 = math.rsqrt %139 : vector<1x8xf32>
    %141 = arith.mulf %20, %140 : vector<1x8xf32>
    %142 = tpu.concatenate %141, %141, %141, %141, %141, %141, %141, %141, %141, %141, %141, %141, %141, %141, %141, %141 in 1 : vector<1x8xf32>, vector<1x8xf32>, vector<1x8xf32>, vector<1x8xf32>, vector<1x8xf32>, vector<1x8xf32>, vector<1x8xf32>, vector<1x8xf32>, vector<1x8xf32>, vector<1x8xf32>, vector<1x8xf32>, vector<1x8xf32>, vector<1x8xf32>, vector<1x8xf32>, vector<1x8xf32>, vector<1x8xf32> -> vector<1x128xf32>
    %143 = tpu.concatenate %141, %141, %141, %141, %141, %141, %141, %141, %141, %141 in 1 : vector<1x8xf32>, vector<1x8xf32>, vector<1x8xf32>, vector<1x8xf32>, vector<1x8xf32>, vector<1x8xf32>, vector<1x8xf32>, vector<1x8xf32>, vector<1x8xf32>, vector<1x8xf32> -> vector<1x80xf32>
    %144 = tpu.concatenate %142, %143 in 1 : vector<1x128xf32>, vector<1x80xf32> -> vector<1x208xf32>
    %145 = tpu.concatenate %21, %21, %21, %21, %21, %21, %21, %21, %21, %21, %21, %21, %21, %21, %21, %21 in 1 : vector<1x8xf32>, vector<1x8xf32>, vector<1x8xf32>, vector<1x8xf32>, vector<1x8xf32>, vector<1x8xf32>, vector<1x8xf32>, vector<1x8xf32>, vector<1x8xf32>, vector<1x8xf32>, vector<1x8xf32>, vector<1x8xf32>, vector<1x8xf32>, vector<1x8xf32>, vector<1x8xf32>, vector<1x8xf32> -> vector<1x128xf32>
    %146 = tpu.concatenate %21, %21, %21, %21, %21, %21, %21, %21, %21, %21 in 1 : vector<1x8xf32>, vector<1x8xf32>, vector<1x8xf32>, vector<1x8xf32>, vector<1x8xf32>, vector<1x8xf32>, vector<1x8xf32>, vector<1x8xf32>, vector<1x8xf32>, vector<1x8xf32> -> vector<1x80xf32>
    %147 = tpu.concatenate %145, %146 in 1 : vector<1x128xf32>, vector<1x80xf32> -> vector<1x208xf32>
    %148 = vector.broadcast %144 : vector<1x208xf32> to vector<52x208xf32>
    %149 = arith.mulf %81, %148 : vector<52x208xf32>
    %150 = vector.broadcast %147 : vector<1x208xf32> to vector<52x208xf32>
    %151 = arith.addf %149, %150 : vector<52x208xf32>
    %cst_26 = arith.constant 0.000000e+00 : f32
    %152 = vector.broadcast %cst_26 : f32 to vector<52x208xf32>
    %153 = arith.maximumf %151, %152 : vector<52x208xf32>
    %154 = vector.extract_strided_slice %153 {offsets = [0, 8], sizes = [52, 200], strides = [1, 1]} : vector<52x208xf32> to vector<52x200xf32>
    %155 = vector.extract_strided_slice %153 {offsets = [0, 0], sizes = [52, 8], strides = [1, 1]} : vector<52x208xf32> to vector<52x8xf32>
    %156 = tpu.concatenate %154, %155 in 1 : vector<52x200xf32>, vector<52x8xf32> -> vector<52x208xf32>
    %157 = arith.maximumf %153, %156 : vector<52x208xf32>
    %158 = vector.extract_strided_slice %157 {offsets = [1, 0], sizes = [51, 208], strides = [1, 1]} : vector<52x208xf32> to vector<51x208xf32>
    %159 = vector.extract_strided_slice %157 {offsets = [0, 0], sizes = [1, 208], strides = [1, 1]} : vector<52x208xf32> to vector<1x208xf32>
    %160 = tpu.concatenate %158, %159 in 0 : vector<51x208xf32>, vector<1x208xf32> -> vector<52x208xf32>
    %161 = arith.maximumf %157, %160 : vector<52x208xf32>
    %162 = vector.extract_strided_slice %161 {offsets = [0, 0], sizes = [1, 208], strides = [1, 1]} : vector<52x208xf32> to vector<1x208xf32>
    %163 = vector.extract_strided_slice %161 {offsets = [2, 0], sizes = [1, 208], strides = [1, 1]} : vector<52x208xf32> to vector<1x208xf32>
    %164 = vector.extract_strided_slice %161 {offsets = [4, 0], sizes = [1, 208], strides = [1, 1]} : vector<52x208xf32> to vector<1x208xf32>
    %165 = vector.extract_strided_slice %161 {offsets = [6, 0], sizes = [1, 208], strides = [1, 1]} : vector<52x208xf32> to vector<1x208xf32>
    %166 = vector.extract_strided_slice %161 {offsets = [8, 0], sizes = [1, 208], strides = [1, 1]} : vector<52x208xf32> to vector<1x208xf32>
    %167 = vector.extract_strided_slice %161 {offsets = [10, 0], sizes = [1, 208], strides = [1, 1]} : vector<52x208xf32> to vector<1x208xf32>
    %168 = vector.extract_strided_slice %161 {offsets = [12, 0], sizes = [1, 208], strides = [1, 1]} : vector<52x208xf32> to vector<1x208xf32>
    %169 = vector.extract_strided_slice %161 {offsets = [14, 0], sizes = [1, 208], strides = [1, 1]} : vector<52x208xf32> to vector<1x208xf32>
    %170 = vector.extract_strided_slice %161 {offsets = [16, 0], sizes = [1, 208], strides = [1, 1]} : vector<52x208xf32> to vector<1x208xf32>
    %171 = vector.extract_strided_slice %161 {offsets = [18, 0], sizes = [1, 208], strides = [1, 1]} : vector<52x208xf32> to vector<1x208xf32>
    %172 = vector.extract_strided_slice %161 {offsets = [20, 0], sizes = [1, 208], strides = [1, 1]} : vector<52x208xf32> to vector<1x208xf32>
    %173 = vector.extract_strided_slice %161 {offsets = [22, 0], sizes = [1, 208], strides = [1, 1]} : vector<52x208xf32> to vector<1x208xf32>
    %174 = vector.extract_strided_slice %161 {offsets = [24, 0], sizes = [1, 208], strides = [1, 1]} : vector<52x208xf32> to vector<1x208xf32>
    %175 = vector.extract_strided_slice %161 {offsets = [26, 0], sizes = [1, 208], strides = [1, 1]} : vector<52x208xf32> to vector<1x208xf32>
    %176 = vector.extract_strided_slice %161 {offsets = [28, 0], sizes = [1, 208], strides = [1, 1]} : vector<52x208xf32> to vector<1x208xf32>
    %177 = vector.extract_strided_slice %161 {offsets = [30, 0], sizes = [1, 208], strides = [1, 1]} : vector<52x208xf32> to vector<1x208xf32>
    %178 = vector.extract_strided_slice %161 {offsets = [32, 0], sizes = [1, 208], strides = [1, 1]} : vector<52x208xf32> to vector<1x208xf32>
    %179 = vector.extract_strided_slice %161 {offsets = [34, 0], sizes = [1, 208], strides = [1, 1]} : vector<52x208xf32> to vector<1x208xf32>
    %180 = vector.extract_strided_slice %161 {offsets = [36, 0], sizes = [1, 208], strides = [1, 1]} : vector<52x208xf32> to vector<1x208xf32>
    %181 = vector.extract_strided_slice %161 {offsets = [38, 0], sizes = [1, 208], strides = [1, 1]} : vector<52x208xf32> to vector<1x208xf32>
    %182 = vector.extract_strided_slice %161 {offsets = [40, 0], sizes = [1, 208], strides = [1, 1]} : vector<52x208xf32> to vector<1x208xf32>
    %183 = vector.extract_strided_slice %161 {offsets = [42, 0], sizes = [1, 208], strides = [1, 1]} : vector<52x208xf32> to vector<1x208xf32>
    %184 = vector.extract_strided_slice %161 {offsets = [44, 0], sizes = [1, 208], strides = [1, 1]} : vector<52x208xf32> to vector<1x208xf32>
    %185 = vector.extract_strided_slice %161 {offsets = [46, 0], sizes = [1, 208], strides = [1, 1]} : vector<52x208xf32> to vector<1x208xf32>
    %186 = vector.extract_strided_slice %161 {offsets = [48, 0], sizes = [1, 208], strides = [1, 1]} : vector<52x208xf32> to vector<1x208xf32>
    %187 = vector.extract_strided_slice %161 {offsets = [50, 0], sizes = [1, 208], strides = [1, 1]} : vector<52x208xf32> to vector<1x208xf32>
    %188 = tpu.concatenate %162, %163, %164, %165, %166, %167, %168, %169, %170, %171, %172, %173, %174, %175, %176, %177 in 0 : vector<1x208xf32>, vector<1x208xf32>, vector<1x208xf32>, vector<1x208xf32>, vector<1x208xf32>, vector<1x208xf32>, vector<1x208xf32>, vector<1x208xf32>, vector<1x208xf32>, vector<1x208xf32>, vector<1x208xf32>, vector<1x208xf32>, vector<1x208xf32>, vector<1x208xf32>, vector<1x208xf32>, vector<1x208xf32> -> vector<16x208xf32>
    %189 = tpu.concatenate %178, %179, %180, %181, %182, %183, %184, %185, %186, %187 in 0 : vector<1x208xf32>, vector<1x208xf32>, vector<1x208xf32>, vector<1x208xf32>, vector<1x208xf32>, vector<1x208xf32>, vector<1x208xf32>, vector<1x208xf32>, vector<1x208xf32>, vector<1x208xf32> -> vector<10x208xf32>
    %190 = tpu.concatenate %188, %189 in 0 : vector<16x208xf32>, vector<10x208xf32> -> vector<26x208xf32>
    %191 = vector.extract_strided_slice %190 {offsets = [0, 0], sizes = [9, 208], strides = [1, 1]} : vector<26x208xf32> to vector<9x208xf32>
    %192 = vector.extract_strided_slice %190 {offsets = [13, 0], sizes = [9, 208], strides = [1, 1]} : vector<26x208xf32> to vector<9x208xf32>
    %193 = tpu.concatenate %191, %192 in 0 : vector<9x208xf32>, vector<9x208xf32> -> vector<18x208xf32>
    %c0_27 = arith.constant 0 : index
    %c0_28 = arith.constant 0 : index
    %c0_29 = arith.constant 0 : index
    %194 = vector.load %arg4[%c0_27, %c0_28, %c0_29] : memref<5x208x144xf32, #tpu.memory_space<vmem>>, vector<1x208x144xf32>
    %195 = vector.shape_cast %194 : vector<1x208x144xf32> to vector<208x144xf32>
    %cst_30 = arith.constant dense<0.000000e+00> : vector<18x144xf32>
    %196 = tpu.matmul %193, %195, %cst_30 {dimension_numbers = #tpu.dot_dimension_numbers<[1], [0], [0], [1], [0, 0, 1, 1], [], []>} : vector<18x208xf32>, vector<208x144xf32>, vector<18x144xf32> -> vector<18x144xf32>
    %197 = vector.extract_strided_slice %190 {offsets = [1, 0], sizes = [9, 208], strides = [1, 1]} : vector<26x208xf32> to vector<9x208xf32>
    %198 = vector.extract_strided_slice %190 {offsets = [14, 0], sizes = [9, 208], strides = [1, 1]} : vector<26x208xf32> to vector<9x208xf32>
    %199 = tpu.concatenate %197, %198 in 0 : vector<9x208xf32>, vector<9x208xf32> -> vector<18x208xf32>
    %c1_31 = arith.constant 1 : index
    %c0_32 = arith.constant 0 : index
    %c0_33 = arith.constant 0 : index
    %200 = vector.load %arg4[%c1_31, %c0_32, %c0_33] : memref<5x208x144xf32, #tpu.memory_space<vmem>>, vector<1x208x144xf32>
    %201 = vector.shape_cast %200 : vector<1x208x144xf32> to vector<208x144xf32>
    %cst_34 = arith.constant dense<0.000000e+00> : vector<18x144xf32>
    %202 = tpu.matmul %199, %201, %cst_34 {dimension_numbers = #tpu.dot_dimension_numbers<[1], [0], [0], [1], [0, 0, 1, 1], [], []>} : vector<18x208xf32>, vector<208x144xf32>, vector<18x144xf32> -> vector<18x144xf32>
    %203 = arith.addf %196, %202 : vector<18x144xf32>
    %204 = vector.extract_strided_slice %190 {offsets = [2, 0], sizes = [9, 208], strides = [1, 1]} : vector<26x208xf32> to vector<9x208xf32>
    %205 = vector.extract_strided_slice %190 {offsets = [15, 0], sizes = [9, 208], strides = [1, 1]} : vector<26x208xf32> to vector<9x208xf32>
    %206 = tpu.concatenate %204, %205 in 0 : vector<9x208xf32>, vector<9x208xf32> -> vector<18x208xf32>
    %c2_35 = arith.constant 2 : index
    %c0_36 = arith.constant 0 : index
    %c0_37 = arith.constant 0 : index
    %207 = vector.load %arg4[%c2_35, %c0_36, %c0_37] : memref<5x208x144xf32, #tpu.memory_space<vmem>>, vector<1x208x144xf32>
    %208 = vector.shape_cast %207 : vector<1x208x144xf32> to vector<208x144xf32>
    %cst_38 = arith.constant dense<0.000000e+00> : vector<18x144xf32>
    %209 = tpu.matmul %206, %208, %cst_38 {dimension_numbers = #tpu.dot_dimension_numbers<[1], [0], [0], [1], [0, 0, 1, 1], [], []>} : vector<18x208xf32>, vector<208x144xf32>, vector<18x144xf32> -> vector<18x144xf32>
    %210 = arith.addf %203, %209 : vector<18x144xf32>
    %211 = vector.extract_strided_slice %190 {offsets = [3, 0], sizes = [9, 208], strides = [1, 1]} : vector<26x208xf32> to vector<9x208xf32>
    %212 = vector.extract_strided_slice %190 {offsets = [16, 0], sizes = [9, 208], strides = [1, 1]} : vector<26x208xf32> to vector<9x208xf32>
    %213 = tpu.concatenate %211, %212 in 0 : vector<9x208xf32>, vector<9x208xf32> -> vector<18x208xf32>
    %c3 = arith.constant 3 : index
    %c0_39 = arith.constant 0 : index
    %c0_40 = arith.constant 0 : index
    %214 = vector.load %arg4[%c3, %c0_39, %c0_40] : memref<5x208x144xf32, #tpu.memory_space<vmem>>, vector<1x208x144xf32>
    %215 = vector.shape_cast %214 : vector<1x208x144xf32> to vector<208x144xf32>
    %cst_41 = arith.constant dense<0.000000e+00> : vector<18x144xf32>
    %216 = tpu.matmul %213, %215, %cst_41 {dimension_numbers = #tpu.dot_dimension_numbers<[1], [0], [0], [1], [0, 0, 1, 1], [], []>} : vector<18x208xf32>, vector<208x144xf32>, vector<18x144xf32> -> vector<18x144xf32>
    %217 = arith.addf %210, %216 : vector<18x144xf32>
    %218 = vector.extract_strided_slice %190 {offsets = [4, 0], sizes = [9, 208], strides = [1, 1]} : vector<26x208xf32> to vector<9x208xf32>
    %219 = vector.extract_strided_slice %190 {offsets = [17, 0], sizes = [9, 208], strides = [1, 1]} : vector<26x208xf32> to vector<9x208xf32>
    %220 = tpu.concatenate %218, %219 in 0 : vector<9x208xf32>, vector<9x208xf32> -> vector<18x208xf32>
    %c4 = arith.constant 4 : index
    %c0_42 = arith.constant 0 : index
    %c0_43 = arith.constant 0 : index
    %221 = vector.load %arg4[%c4, %c0_42, %c0_43] : memref<5x208x144xf32, #tpu.memory_space<vmem>>, vector<1x208x144xf32>
    %222 = vector.shape_cast %221 : vector<1x208x144xf32> to vector<208x144xf32>
    %cst_44 = arith.constant dense<0.000000e+00> : vector<18x144xf32>
    %223 = tpu.matmul %220, %222, %cst_44 {dimension_numbers = #tpu.dot_dimension_numbers<[1], [0], [0], [1], [0, 0, 1, 1], [], []>} : vector<18x208xf32>, vector<208x144xf32>, vector<18x144xf32> -> vector<18x144xf32>
    %224 = arith.addf %217, %223 : vector<18x144xf32>
    %c0_45 = arith.constant 0 : index
    %c0_46 = arith.constant 0 : index
    %225 = vector.load %arg5[%c0_45, %c0_46] : memref<1x16xf32, #tpu.memory_space<vmem>>, vector<1x16xf32>
    %c0_47 = arith.constant 0 : index
    %c0_48 = arith.constant 0 : index
    %226 = vector.load %arg6[%c0_47, %c0_48] : memref<1x16xf32, #tpu.memory_space<vmem>>, vector<1x16xf32>
    %cst_49 = arith.constant dense<0.000000e+00> : vector<144xf32>
    %227 = vector.multi_reduction <add>, %224, %cst_49 [0] : vector<18x144xf32> to vector<144xf32>
    %228 = vector.shape_cast %227 : vector<144xf32> to vector<1x144xf32>
    %229 = vector.extract_strided_slice %228 {offsets = [0, 0], sizes = [1, 16], strides = [1, 1]} : vector<1x144xf32> to vector<1x16xf32>
    %230 = vector.extract_strided_slice %228 {offsets = [0, 16], sizes = [1, 16], strides = [1, 1]} : vector<1x144xf32> to vector<1x16xf32>
    %231 = arith.addf %229, %230 : vector<1x16xf32>
    %232 = vector.extract_strided_slice %228 {offsets = [0, 32], sizes = [1, 16], strides = [1, 1]} : vector<1x144xf32> to vector<1x16xf32>
    %233 = arith.addf %231, %232 : vector<1x16xf32>
    %234 = vector.extract_strided_slice %228 {offsets = [0, 48], sizes = [1, 16], strides = [1, 1]} : vector<1x144xf32> to vector<1x16xf32>
    %235 = arith.addf %233, %234 : vector<1x16xf32>
    %236 = vector.extract_strided_slice %228 {offsets = [0, 64], sizes = [1, 16], strides = [1, 1]} : vector<1x144xf32> to vector<1x16xf32>
    %237 = arith.addf %235, %236 : vector<1x16xf32>
    %238 = vector.extract_strided_slice %228 {offsets = [0, 80], sizes = [1, 16], strides = [1, 1]} : vector<1x144xf32> to vector<1x16xf32>
    %239 = arith.addf %237, %238 : vector<1x16xf32>
    %240 = vector.extract_strided_slice %228 {offsets = [0, 96], sizes = [1, 16], strides = [1, 1]} : vector<1x144xf32> to vector<1x16xf32>
    %241 = arith.addf %239, %240 : vector<1x16xf32>
    %242 = vector.extract_strided_slice %228 {offsets = [0, 112], sizes = [1, 16], strides = [1, 1]} : vector<1x144xf32> to vector<1x16xf32>
    %243 = arith.addf %241, %242 : vector<1x16xf32>
    %244 = vector.extract_strided_slice %228 {offsets = [0, 128], sizes = [1, 16], strides = [1, 1]} : vector<1x144xf32> to vector<1x16xf32>
    %245 = arith.addf %243, %244 : vector<1x16xf32>
    %cst_50 = arith.constant 0.00617283955 : f32
    %246 = vector.broadcast %cst_50 : f32 to vector<1x16xf32>
    %247 = arith.mulf %245, %246 : vector<1x16xf32>
    %248 = tpu.concatenate %247, %247, %247, %247, %247, %247, %247, %247, %247 in 1 : vector<1x16xf32>, vector<1x16xf32>, vector<1x16xf32>, vector<1x16xf32>, vector<1x16xf32>, vector<1x16xf32>, vector<1x16xf32>, vector<1x16xf32>, vector<1x16xf32> -> vector<1x144xf32>
    %249 = vector.broadcast %248 : vector<1x144xf32> to vector<18x144xf32>
    %250 = arith.subf %224, %249 : vector<18x144xf32>
    %251 = arith.mulf %250, %250 : vector<18x144xf32>
    %cst_51 = arith.constant dense<0.000000e+00> : vector<144xf32>
    %252 = vector.multi_reduction <add>, %251, %cst_51 [0] : vector<18x144xf32> to vector<144xf32>
    %253 = vector.shape_cast %252 : vector<144xf32> to vector<1x144xf32>
    %254 = vector.extract_strided_slice %253 {offsets = [0, 0], sizes = [1, 16], strides = [1, 1]} : vector<1x144xf32> to vector<1x16xf32>
    %255 = vector.extract_strided_slice %253 {offsets = [0, 16], sizes = [1, 16], strides = [1, 1]} : vector<1x144xf32> to vector<1x16xf32>
    %256 = arith.addf %254, %255 : vector<1x16xf32>
    %257 = vector.extract_strided_slice %253 {offsets = [0, 32], sizes = [1, 16], strides = [1, 1]} : vector<1x144xf32> to vector<1x16xf32>
    %258 = arith.addf %256, %257 : vector<1x16xf32>
    %259 = vector.extract_strided_slice %253 {offsets = [0, 48], sizes = [1, 16], strides = [1, 1]} : vector<1x144xf32> to vector<1x16xf32>
    %260 = arith.addf %258, %259 : vector<1x16xf32>
    %261 = vector.extract_strided_slice %253 {offsets = [0, 64], sizes = [1, 16], strides = [1, 1]} : vector<1x144xf32> to vector<1x16xf32>
    %262 = arith.addf %260, %261 : vector<1x16xf32>
    %263 = vector.extract_strided_slice %253 {offsets = [0, 80], sizes = [1, 16], strides = [1, 1]} : vector<1x144xf32> to vector<1x16xf32>
    %264 = arith.addf %262, %263 : vector<1x16xf32>
    %265 = vector.extract_strided_slice %253 {offsets = [0, 96], sizes = [1, 16], strides = [1, 1]} : vector<1x144xf32> to vector<1x16xf32>
    %266 = arith.addf %264, %265 : vector<1x16xf32>
    %267 = vector.extract_strided_slice %253 {offsets = [0, 112], sizes = [1, 16], strides = [1, 1]} : vector<1x144xf32> to vector<1x16xf32>
    %268 = arith.addf %266, %267 : vector<1x16xf32>
    %269 = vector.extract_strided_slice %253 {offsets = [0, 128], sizes = [1, 16], strides = [1, 1]} : vector<1x144xf32> to vector<1x16xf32>
    %270 = arith.addf %268, %269 : vector<1x16xf32>
    %cst_52 = arith.constant 0.00617283955 : f32
    %271 = vector.broadcast %cst_52 : f32 to vector<1x16xf32>
    %272 = arith.mulf %270, %271 : vector<1x16xf32>
    %cst_53 = arith.constant 9.99999974E-6 : f32
    %273 = vector.broadcast %cst_53 : f32 to vector<1x16xf32>
    %274 = arith.addf %272, %273 : vector<1x16xf32>
    %275 = math.rsqrt %274 : vector<1x16xf32>
    %276 = arith.mulf %225, %275 : vector<1x16xf32>
    %277 = tpu.concatenate %276, %276, %276, %276, %276, %276, %276, %276, %276 in 1 : vector<1x16xf32>, vector<1x16xf32>, vector<1x16xf32>, vector<1x16xf32>, vector<1x16xf32>, vector<1x16xf32>, vector<1x16xf32>, vector<1x16xf32>, vector<1x16xf32> -> vector<1x144xf32>
    %278 = tpu.concatenate %226, %226, %226, %226, %226, %226, %226, %226, %226 in 1 : vector<1x16xf32>, vector<1x16xf32>, vector<1x16xf32>, vector<1x16xf32>, vector<1x16xf32>, vector<1x16xf32>, vector<1x16xf32>, vector<1x16xf32>, vector<1x16xf32> -> vector<1x144xf32>
    %279 = vector.broadcast %277 : vector<1x144xf32> to vector<18x144xf32>
    %280 = arith.mulf %250, %279 : vector<18x144xf32>
    %281 = vector.broadcast %278 : vector<1x144xf32> to vector<18x144xf32>
    %282 = arith.addf %280, %281 : vector<18x144xf32>
    %cst_54 = arith.constant 0.000000e+00 : f32
    %283 = vector.broadcast %cst_54 : f32 to vector<18x144xf32>
    %284 = arith.maximumf %282, %283 : vector<18x144xf32>
    %285 = vector.extract_strided_slice %284 {offsets = [0, 16], sizes = [18, 128], strides = [1, 1]} : vector<18x144xf32> to vector<18x128xf32>
    %286 = vector.extract_strided_slice %284 {offsets = [0, 0], sizes = [18, 16], strides = [1, 1]} : vector<18x144xf32> to vector<18x16xf32>
    %287 = tpu.concatenate %285, %286 in 1 : vector<18x128xf32>, vector<18x16xf32> -> vector<18x144xf32>
    %288 = arith.maximumf %284, %287 : vector<18x144xf32>
    %289 = vector.extract_strided_slice %288 {offsets = [1, 0], sizes = [17, 144], strides = [1, 1]} : vector<18x144xf32> to vector<17x144xf32>
    %290 = vector.extract_strided_slice %288 {offsets = [0, 0], sizes = [1, 144], strides = [1, 1]} : vector<18x144xf32> to vector<1x144xf32>
    %291 = tpu.concatenate %289, %290 in 0 : vector<17x144xf32>, vector<1x144xf32> -> vector<18x144xf32>
    %292 = arith.maximumf %288, %291 : vector<18x144xf32>
    %cst_55 = arith.constant 0.000000e+00 : f32
    %293 = vector.broadcast %cst_55 : f32 to vector<2x128xf32>
    %294 = vector.extract_strided_slice %292 {offsets = [0, 0], sizes = [1, 144], strides = [1, 1]} : vector<18x144xf32> to vector<1x144xf32>
    %295 = vector.extract_strided_slice %292 {offsets = [9, 0], sizes = [1, 144], strides = [1, 1]} : vector<18x144xf32> to vector<1x144xf32>
    %296 = tpu.concatenate %294, %295 in 0 : vector<1x144xf32>, vector<1x144xf32> -> vector<2x144xf32>
    %c0_56 = arith.constant 0 : index
    %c0_57 = arith.constant 0 : index
    %c0_58 = arith.constant 0 : index
    %297 = vector.load %arg7[%c0_56, %c0_57, %c0_58] : memref<4x144x128xf32, #tpu.memory_space<vmem>>, vector<1x144x128xf32>
    %298 = vector.shape_cast %297 : vector<1x144x128xf32> to vector<144x128xf32>
    %cst_59 = arith.constant dense<0.000000e+00> : vector<2x128xf32>
    %299 = tpu.matmul %296, %298, %cst_59 {dimension_numbers = #tpu.dot_dimension_numbers<[1], [0], [0], [1], [0, 0, 1, 1], [], []>} : vector<2x144xf32>, vector<144x128xf32>, vector<2x128xf32> -> vector<2x128xf32>
    %300 = arith.addf %293, %299 : vector<2x128xf32>
    %301 = vector.extract_strided_slice %292 {offsets = [2, 0], sizes = [1, 144], strides = [1, 1]} : vector<18x144xf32> to vector<1x144xf32>
    %302 = vector.extract_strided_slice %292 {offsets = [11, 0], sizes = [1, 144], strides = [1, 1]} : vector<18x144xf32> to vector<1x144xf32>
    %303 = tpu.concatenate %301, %302 in 0 : vector<1x144xf32>, vector<1x144xf32> -> vector<2x144xf32>
    %c1_60 = arith.constant 1 : index
    %c0_61 = arith.constant 0 : index
    %c0_62 = arith.constant 0 : index
    %304 = vector.load %arg7[%c1_60, %c0_61, %c0_62] : memref<4x144x128xf32, #tpu.memory_space<vmem>>, vector<1x144x128xf32>
    %305 = vector.shape_cast %304 : vector<1x144x128xf32> to vector<144x128xf32>
    %cst_63 = arith.constant dense<0.000000e+00> : vector<2x128xf32>
    %306 = tpu.matmul %303, %305, %cst_63 {dimension_numbers = #tpu.dot_dimension_numbers<[1], [0], [0], [1], [0, 0, 1, 1], [], []>} : vector<2x144xf32>, vector<144x128xf32>, vector<2x128xf32> -> vector<2x128xf32>
    %307 = arith.addf %300, %306 : vector<2x128xf32>
    %308 = vector.extract_strided_slice %292 {offsets = [4, 0], sizes = [1, 144], strides = [1, 1]} : vector<18x144xf32> to vector<1x144xf32>
    %309 = vector.extract_strided_slice %292 {offsets = [13, 0], sizes = [1, 144], strides = [1, 1]} : vector<18x144xf32> to vector<1x144xf32>
    %310 = tpu.concatenate %308, %309 in 0 : vector<1x144xf32>, vector<1x144xf32> -> vector<2x144xf32>
    %c2_64 = arith.constant 2 : index
    %c0_65 = arith.constant 0 : index
    %c0_66 = arith.constant 0 : index
    %311 = vector.load %arg7[%c2_64, %c0_65, %c0_66] : memref<4x144x128xf32, #tpu.memory_space<vmem>>, vector<1x144x128xf32>
    %312 = vector.shape_cast %311 : vector<1x144x128xf32> to vector<144x128xf32>
    %cst_67 = arith.constant dense<0.000000e+00> : vector<2x128xf32>
    %313 = tpu.matmul %310, %312, %cst_67 {dimension_numbers = #tpu.dot_dimension_numbers<[1], [0], [0], [1], [0, 0, 1, 1], [], []>} : vector<2x144xf32>, vector<144x128xf32>, vector<2x128xf32> -> vector<2x128xf32>
    %314 = arith.addf %307, %313 : vector<2x128xf32>
    %315 = vector.extract_strided_slice %292 {offsets = [6, 0], sizes = [1, 144], strides = [1, 1]} : vector<18x144xf32> to vector<1x144xf32>
    %316 = vector.extract_strided_slice %292 {offsets = [15, 0], sizes = [1, 144], strides = [1, 1]} : vector<18x144xf32> to vector<1x144xf32>
    %317 = tpu.concatenate %315, %316 in 0 : vector<1x144xf32>, vector<1x144xf32> -> vector<2x144xf32>
    %c3_68 = arith.constant 3 : index
    %c0_69 = arith.constant 0 : index
    %c0_70 = arith.constant 0 : index
    %318 = vector.load %arg7[%c3_68, %c0_69, %c0_70] : memref<4x144x128xf32, #tpu.memory_space<vmem>>, vector<1x144x128xf32>
    %319 = vector.shape_cast %318 : vector<1x144x128xf32> to vector<144x128xf32>
    %cst_71 = arith.constant dense<0.000000e+00> : vector<2x128xf32>
    %320 = tpu.matmul %317, %319, %cst_71 {dimension_numbers = #tpu.dot_dimension_numbers<[1], [0], [0], [1], [0, 0, 1, 1], [], []>} : vector<2x144xf32>, vector<144x128xf32>, vector<2x128xf32> -> vector<2x128xf32>
    %321 = arith.addf %314, %320 : vector<2x128xf32>
    %c0_72 = arith.constant 0 : index
    %c0_73 = arith.constant 0 : index
    %322 = vector.load %arg8[%c0_72, %c0_73] : memref<1x128xf32, #tpu.memory_space<vmem>>, vector<1x128xf32>
    %323 = vector.broadcast %322 : vector<1x128xf32> to vector<2x128xf32>
    %324 = arith.addf %321, %323 : vector<2x128xf32>
    %c0_74 = arith.constant 0 : index
    %c0_75 = arith.constant 0 : index
    %325 = vector.load %arg9[%c0_74, %c0_75] : memref<2x128xf32, #tpu.memory_space<vmem>>, vector<2x128xf32>
    tpu.vector_store %arg9[%c0_74, %c0_75], %324 {strides = array<i32>} : memref<2x128xf32, #tpu.memory_space<vmem>>, vector<2x128xf32>,
    return
  }
}

</mosaic_0001>

<bundles_post_ra>
// kernel: forward.1
= control target key start
LH: loop header
LB: loop body
LE: loop exit
PB: predicated region body
PF: predicated region fallthrough
CT: control target
= control target key end

     0   :  { %14 = vsyncpa [#allocation3], 0  ;;  %s5298_s0 = inlined_call_operand.hbm [shape: f32[56,28], index: 0, kind: input, shape index: {}]   ;;  %s5299_s1 = inlined_call_operand.hbm [shape: f32[3,28,208], index: 1, kind: input, shape index: {}]   ;;  %s5300_s2 = inlined_call_operand.hbm [shape: f32[1,8], index: 2, kind: input, shape index: {}]   ;;  %s5301_s3 = inlined_call_operand.hbm [shape: f32[1,8], index: 3, kind: input, shape index: {}]   ;;  %s5302_s4 = inlined_call_operand.hbm [shape: f32[5,208,144], index: 4, kind: input, shape index: {}]   ;;  %s5303_s5 = inlined_call_operand.hbm [shape: f32[1,16], index: 5, kind: input, shape index: {}]   ;;  %s5304_s6 = inlined_call_operand.hbm [shape: f32[1,16], index: 6, kind: input, shape index: {}]   ;;  %s5305_s7 = inlined_call_operand.hbm [shape: f32[4,144,128], index: 7, kind: input, shape index: {}]   ;;  %s5306_s8 = inlined_call_operand.hbm [shape: f32[1,128], index: 8, kind: input, shape index: {}]   ;;  %s5307_s9 = inlined_call_operand.hbm [shape: f32[2,128], index: 9, kind: output, shape index: {}]  }
   0x1   :  { %15 = vsyncpa [#allocation6], 0 }
   0x2   :  { %16 = vsyncpa [#allocation9], 0 }
   0x3   :  { %17 = vsyncpa [#allocation12], 0 }
   0x4   :  { %18 = vsyncpa [#allocation15], 0 }
   0x5   :  { %19 = vsyncpa [#allocation4], 0  ;;  %s3896_s30 = smov [#allocation5]   ;;  %s3664_s13 = scalar_lea.hbm %s5299_s1, 3072 }
   0x6   :  { %s37_s10 = sshll.u32 %s3896_s30, 4  ;;  %p3665_p0 = scmp.ne.s32.totalorder %s5299_s1, %s3664_s13  ;;  %s38_s10 = int_to_ptr.vmem [resolvable:$true] %s37_s10 }
   0x7   :  { %p3668_p1 = scmp.lt.u32.totalorder %s3664_s13, %s5299_s1 }
   0x9   :  { %p3670_p2 = pnand %p3668_p1, %p3665_p0 }
   0xb   :  { %3673 = shalt.err (!%p3670_p2)
}
   0xc   :  { %s3674_s18 = scalar_lea.vmem %s38_s10, 3072  ;;  %p3679_p4 = scmp.lt.s32.totalorder %s38_s10, %s38_s10 }
   0xd   :  { %p3675_p3 = scmp.ne.s32.totalorder %s38_s10, %s3674_s18  ;;  %p3680_p5 = scmp.lt.s32.totalorder %s3674_s18, %s3674_s18 }
   0xf   :  { %p3681_p6 = por %p3680_p5, %p3679_p4 }
  0x11   :  { %p3682_p7 = pnand %p3681_p6, %p3675_p3 }
  0x13   :  { %3685 = shalt.err (!%p3682_p7)
}
  0x14   :  { %s3897_s19 = smov 256   ;;  %s3898_s20 = smov 16  }
  0x15   :  { %43 = dma.hbm_to_vmem [thread:$0]  %s5299_s1, 3072, %s38_s10, [#allocation6], %s3897_s19, %s3897_s19, %s3898_s20  }
  0x16   :  { %s3899_s23 = smov [#allocation8]   ;;  %s3900_s25 = smov [#allocation11]  }
  0x17   :  { %s60_s24 = sshll.u32 %s3899_s23, 4  ;;  %s82_s26 = sshll.u32 %s3900_s25, 4  ;;  %s61_s24 = int_to_ptr.vmem [resolvable:$true] %s60_s24  ;;  %s83_s26 = int_to_ptr.vmem [resolvable:$true] %s82_s26 }
  0x18   :  { %s3686_s29 = scalar_lea.hbm %s5301_s3, 16 }
  0x19   :  { %p3687_p8 = scmp.ne.s32.totalorder %s5301_s3, %s3686_s29  ;;  %p3690_p9 = scmp.lt.u32.totalorder %s3686_s29, %s5301_s3 }
  0x1b   :  { %p3692_p10 = pnand %p3690_p9, %p3687_p8 }
  0x1d   :  { %3695 = shalt.err (!%p3692_p10)
}
  0x1e   :  { %s3696_s1 = scalar_lea.vmem %s61_s24, 16  ;;  %s3700_s10 = scalar_lea.vmem %s61_s24, 32 }
  0x1f   :  { %p3697_p11 = scmp.ne.s32.totalorder %s61_s24, %s3696_s1  ;;  %p3701_p12 = scmp.lt.s32.totalorder %s61_s24, %s61_s24 }
  0x20   :  { %p3702_p13 = scmp.lt.s32.totalorder %s3700_s10, %s3696_s1 }
  0x22   :  { %p3703_p0 = por %p3702_p13, %p3701_p12 }
  0x24   :  { %p3704_p1 = pnand %p3703_p0, %p3697_p11 }
  0x26   :  { %3707 = shalt.err (!%p3704_p1)
}
  0x27   :  { %63 = dma.hbm_to_vmem [thread:$0]  %s5301_s3, 16, %s61_s24, [#allocation9]  }
  0x28   :  { %s3708_s18 = scalar_lea.hbm %s5303_s5, 16 }
  0x29   :  { %p3709_p2 = scmp.ne.s32.totalorder %s5303_s5, %s3708_s18  ;;  %p3712_p3 = scmp.lt.u32.totalorder %s3708_s18, %s5303_s5 }
  0x2b   :  { %p3714_p4 = pnand %p3712_p3, %p3709_p2 }
  0x2d   :  { %3717 = shalt.err (!%p3714_p4)
}
  0x2e   :  { %s3718_s27 = scalar_lea.vmem %s83_s26, 16  ;;  %s3722_s28 = scalar_lea.vmem %s83_s26, 32 }
  0x2f   :  { %p3719_p5 = scmp.ne.s32.totalorder %s83_s26, %s3718_s27  ;;  %p3723_p6 = scmp.lt.s32.totalorder %s83_s26, %s83_s26 }
  0x30   :  { %p3724_p7 = scmp.lt.s32.totalorder %s3722_s28, %s3718_s27 }
  0x32   :  { %p3725_p8 = por %p3724_p7, %p3723_p6 }
  0x34   :  { %p3726_p9 = pnand %p3725_p8, %p3719_p5 }
  0x36   :  { %3729 = shalt.err (!%p3726_p9)
}
  0x37   :  { %85 = dma.hbm_to_vmem [thread:$0]  %s5303_s5, 16, %s83_s26, [#allocation12]  }
  0x38   :  { %s3901_s29 = smov [#allocation14]   ;;  %s3902_s11 = smov [#allocation2]  }
  0x39   :  { %s101_s30 = sshll.u32 %s3901_s29, 4  ;;  %s25_s12 = sshll.u32 %s3902_s11, 4  ;;  %s102_s30 = int_to_ptr.vmem [resolvable:$true] %s101_s30  ;;  %s26_s12 = int_to_ptr.vmem [resolvable:$true] %s25_s12 }
  0x3a   :  { %s3730_s10 = scalar_lea.hbm %s5305_s7, 9216 }
  0x3b   :  { %p3731_p10 = scmp.ne.s32.totalorder %s5305_s7, %s3730_s10  ;;  %p3734_p11 = scmp.lt.u32.totalorder %s3730_s10, %s5305_s7 }
  0x3d   :  { %p3736_p12 = pnand %p3734_p11, %p3731_p10 }
  0x3f   :  { %3739 = shalt.err (!%p3736_p12)
}
  0x40   :  { %s3740_s5 = scalar_lea.vmem %s102_s30, 9216  ;;  %p3745_p0 = scmp.lt.s32.totalorder %s102_s30, %s102_s30 }
  0x41   :  { %p3741_p13 = scmp.ne.s32.totalorder %s102_s30, %s3740_s5  ;;  %p3746_p1 = scmp.lt.s32.totalorder %s3740_s5, %s3740_s5 }
  0x43   :  { %p3747_p2 = por %p3746_p1, %p3745_p0 }
  0x45   :  { %p3748_p3 = pnand %p3747_p2, %p3741_p13 }
  0x47   :  { %3751 = shalt.err (!%p3748_p3)
}
  0x48   :  { %s3903_s26 = smov 128   ;;  %s3904_s18 = smov 8  }
  0x49   :  { %107 = dma.hbm_to_vmem [thread:$0]  %s5305_s7, 9216, %s102_s30, [#allocation15], %s3903_s26, %s3903_s26, %s3904_s18  }
  0x4a   :  { %s3752_s27 = scalar_lea.hbm %s5298_s0, 896 }
  0x4b   :  { %p3753_p4 = scmp.ne.s32.totalorder %s5298_s0, %s3752_s27  ;;  %p3756_p5 = scmp.lt.u32.totalorder %s3752_s27, %s5298_s0 }
  0x4d   :  { %p3758_p6 = pnand %p3756_p5, %p3753_p4 }
  0x4f   :  { %3761 = shalt.err (!%p3758_p6)
}
  0x50   :  { %s3762_s11 = scalar_lea.vmem %s26_s12, 896  ;;  %p3767_p8 = scmp.lt.s32.totalorder %s26_s12, %s26_s12 }
  0x51   :  { %p3763_p7 = scmp.ne.s32.totalorder %s26_s12, %s3762_s11  ;;  %p3768_p9 = scmp.lt.s32.totalorder %s3762_s11, %s3762_s11 }
  0x53   :  { %p3769_p10 = por %p3768_p9, %p3767_p8 }
  0x55   :  { %p3770_p11 = pnand %p3769_p10, %p3763_p7 }
  0x57   :  { %3773 = shalt.err (!%p3770_p11)
}
  0x58   :  { %31 = dma.hbm_to_vmem [thread:$0]  %s5298_s0, 896, %s26_s12, [#allocation3], %s3903_s26, %s3903_s26, %s3904_s18  }
  0x59   :  { %s3905_s13 = smov [#allocation7]   ;;  %s3906_s10 = smov [#allocation10]  }
  0x5a   :  { %s50_s1 = sshll.u32 %s3905_s13, 4  ;;  %s69_s14 = sshll.u32 %s3906_s10, 4  ;;  %s51_s1 = int_to_ptr.vmem [resolvable:$true] %s50_s1  ;;  %s70_s14 = int_to_ptr.vmem [resolvable:$true] %s69_s14 }
  0x5b   :  { %s3774_s17 = scalar_lea.hbm %s5300_s2, 16 }
  0x5c   :  { %p3775_p12 = scmp.ne.s32.totalorder %s5300_s2, %s3774_s17  ;;  %p3778_p13 = scmp.lt.u32.totalorder %s3774_s17, %s5300_s2 }
  0x5e   :  { %p3780_p0 = pnand %p3778_p13, %p3775_p12 }
  0x60   :  { %3783 = shalt.err (!%p3780_p0)
}
  0x61   :  { %s3784_s0 = scalar_lea.vmem %s51_s1, 16  ;;  %s3788_s12 = scalar_lea.vmem %s51_s1, 32 }
  0x62   :  { %p3785_p1 = scmp.ne.s32.totalorder %s51_s1, %s3784_s0  ;;  %p3789_p2 = scmp.lt.s32.totalorder %s51_s1, %s51_s1 }
  0x63   :  { %p3790_p3 = scmp.lt.s32.totalorder %s3788_s12, %s3784_s0 }
  0x65   :  { %p3791_p4 = por %p3790_p3, %p3789_p2 }
  0x67   :  { %p3792_p5 = pnand %p3791_p4, %p3785_p1 }
  0x69   :  { %3795 = shalt.err (!%p3792_p5)
}
  0x6a   :  { %53 = dma.hbm_to_vmem [thread:$0]  %s5300_s2, 16, %s51_s1, [#allocation6]  }
  0x6b   :  { %s3796_s3 = scalar_lea.hbm %s5302_s4, 33280 }
  0x6c   :  { %p3797_p6 = scmp.ne.s32.totalorder %s5302_s4, %s3796_s3  ;;  %p3800_p7 = scmp.lt.u32.totalorder %s3796_s3, %s5302_s4 }
  0x6e   :  { %p3802_p8 = pnand %p3800_p7, %p3797_p6 }
  0x70   :  { %3805 = shalt.err (!%p3802_p8)
}
  0x71   :  { %s3806_s30 = scalar_lea.vmem %s70_s14, 33280  ;;  %p3811_p10 = scmp.lt.s32.totalorder %s70_s14, %s70_s14 }
  0x72   :  { %p3807_p9 = scmp.ne.s32.totalorder %s70_s14, %s3806_s30  ;;  %p3812_p11 = scmp.lt.s32.totalorder %s3806_s30, %s3806_s30 }
  0x74   :  { %p3813_p12 = por %p3812_p11, %p3811_p10 }
  0x76   :  { %p3814_p13 = pnand %p3813_p12, %p3807_p9 }
  0x78   :  { %3817 = shalt.err (!%p3814_p13)
}
  0x79   :  { %75 = dma.hbm_to_vmem [thread:$0]  %s5302_s4, 33280, %s70_s14, [#allocation9], %s3897_s19, %s3897_s19, %s3898_s20  }
  0x7a   :  { %s3907_s1 = smov [#allocation13]   ;;  %s3908_s15 = smov [#allocation16]  }
  0x7b   :  { %s92_s10 = sshll.u32 %s3907_s1, 4  ;;  %s114_s16 = sshll.u32 %s3908_s15, 4  ;;  %s93_s10 = int_to_ptr.vmem [resolvable:$true] %s92_s10  ;;  %s115_s16 = int_to_ptr.vmem [resolvable:$true] %s114_s16 }
  0x7c   :  { %s3818_s21 = scalar_lea.hbm %s5304_s6, 16 }
  0x7d   :  { %p3819_p0 = scmp.ne.s32.totalorder %s5304_s6, %s3818_s21  ;;  %p3822_p1 = scmp.lt.u32.totalorder %s3818_s21, %s5304_s6 }
  0x7f   :  { %p3824_p2 = pnand %p3822_p1, %p3819_p0 }
  0x81   :  { %3827 = shalt.err (!%p3824_p2)
}
  0x82   :  { %s3828_s4 = scalar_lea.vmem %s93_s10, 16  ;;  %s3832_s19 = scalar_lea.vmem %s93_s10, 32 }
  0x83   :  { %p3829_p3 = scmp.ne.s32.totalorder %s93_s10, %s3828_s4  ;;  %p3833_p4 = scmp.lt.s32.totalorder %s93_s10, %s93_s10 }
  0x84   :  { %p3834_p5 = scmp.lt.s32.totalorder %s3832_s19, %s3828_s4 }
  0x86   :  { %p3835_p6 = por %p3834_p5, %p3833_p4 }
  0x88   :  { %p3836_p7 = pnand %p3835_p6, %p3829_p3 }
  0x8a   :  { %3839 = shalt.err (!%p3836_p7)
}
  0x8b   :  { %95 = dma.hbm_to_vmem [thread:$0]  %s5304_s6, 16, %s93_s10, [#allocation12]  }
  0x8c   :  { %s3840_s28 = scalar_lea.hbm %s5306_s8, 16 }
  0x8d   :  { %p3841_p8 = scmp.ne.s32.totalorder %s5306_s8, %s3840_s28  ;;  %p3844_p9 = scmp.lt.u32.totalorder %s3840_s28, %s5306_s8 }
  0x8f   :  { %p3846_p10 = pnand %p3844_p9, %p3841_p8 }
  0x91   :  { %3849 = shalt.err (!%p3846_p10)
}
  0x92   :  { %s3850_s7 = scalar_lea.vmem %s115_s16, 16  ;;  %s3854_s30 = scalar_lea.vmem %s115_s16, 32 }
  0x93   :  { %p3851_p11 = scmp.ne.s32.totalorder %s115_s16, %s3850_s7  ;;  %p3855_p12 = scmp.lt.s32.totalorder %s115_s16, %s115_s16 }
  0x94   :  { %p3856_p13 = scmp.lt.s32.totalorder %s3854_s30, %s3850_s7 }
  0x96   :  { %p3857_p0 = por %p3856_p13, %p3855_p12 }
  0x98   :  { %p3858_p1 = pnand %p3857_p0, %p3851_p11 }
  0x9a   :  { %3861 = shalt.err (!%p3858_p1)
}
  0x9b   :  { %117 = dma.hbm_to_vmem [thread:$0]  %s5306_s8, 16, %s115_s16, [#allocation15]  }
  0x9c   :  { %3884 = dma.done.wait [#allocation3], 896  }
  0x9d   :  { %3885 = vsyncadd [#allocation3], 4294966400 }
  0x9e   :  { %3886 = dma.done.wait [#allocation6], 3088  }
  0x9f   :  { %3887 = vsyncadd [#allocation6], 4294964208 }
  0xa0   :  { %3888 = dma.done.wait [#allocation9], 33296  }
  0xa1   :  { %3889 = vsyncadd [#allocation9], 4294934000 }
  0xa2   :  { %3890 = dma.done.wait [#allocation12], 32  }
  0xa3   :  { %3891 = vsyncadd [#allocation12], 4294967264 }
  0xa4   :  { %3892 = dma.done.wait [#allocation15], 9232  }
  0xa5   :  { %3893 = vsyncadd [#allocation15], 4294958064  ;;  %v3909_v0 = vmov 0.0   ;;  %vm224_vm0 = vcmask 1043456   ;;  %v168_v1 = vld [vmem:[#allocation5 + $0x8] sm:$0xff]  ;;  %v170_v2 = vld [vmem:[#allocation5 + $0x18] sm:$0xff] }
  0xa6   :  { %426 = vmatprep.mubr.f32.mxu0 %v3909_v0  ;;  %295 = vmatprep.mubr.f32.mxu1 %v3909_v0  ;;  %v167_v3 = vld [vmem:[#allocation5] sm:$0xff]  ;;  %v3165_v4 = vpack.c.bf16 %v170_v2, %v168_v1  ;;  %v169_v5 = vld [vmem:[#allocation5 + $0x10] sm:$0xff]  ;;  %v172_v6 = vld [vmem:[#allocation5 + $0x28] sm:$0xff]  ;;  %vm3910_vm1 = vmmov 1   ;;  %vm205_vm3 = vcmask 228352   ;;  %vm5308_vm4 = vcmask 1041408  }
  0xa7   :  { %v174_v7 = vld [vmem:[#allocation5 + $0x38] sm:$0xf]  ;;  %v3167_v8 = vpack.c.bf16 %v169_v5, %v167_v3  ;;  %vm4095_vm2 = vmpackc.low %vm224_vm0, %vm3910_vm1  ;;  %v171_v11 = vld [vmem:[#allocation5 + $0x20] sm:$0xff]  ;;  %vm659_vm5 = vcmask 654336   ;;  %vm671_vm6 = vcmask 650240   ;;  %s3911_s8 = smov 104  }
  0xa8   :  { %v3169_v10 = vpack.c.bf16 %v174_v7, %v172_v6  ;;  %v173_v12 = vld [vmem:[#allocation5 + $0x30] sm:$0xf]  ;;  %3166 = vmatprep.subr.bf16.mxu0 %v3165_v4  ;;  %v492_v13 = vld [vmem:[#allocation5 + $0x88] sm:$0xff]  ;;  %v494_v14 = vld [vmem:[#allocation5 + $0x98] sm:$0xff]  ;;  %s3912_s13 = smov 120   ;;  %s3913_s1 = smov 96  }
  0xa9   :  { %3168 = vmatpush1.bf16.msra.mxu0 %v3167_v8  ;;  %v3172_v15 = vpack.c.bf16 %v173_v12, %v171_v11  ;;  %v3175_v16 = vpack.c.bf16 %v494_v14, %v492_v13  ;;  %v491_v17 = vld [vmem:[#allocation5 + $0x80] sm:$0xff]  ;;  %v493_v18 = vld [vmem:[#allocation5 + $0x90] sm:$0xff]  ;;  %v496_v19 = vld [vmem:[#allocation5 + $0xa8] sm:$0xff]  ;;  %s3914_s10 = smov 112   ;;  %s3915_s15 = smov 80   ;;  %vm826_vm7 = vcmask 64512  }
  0xaa   :  { %3171 = vmatprep.subr.msk.bf16.mxu0 %vm4095_vm2, %v3169_v10  ;;  %v498_v20 = vld [vmem:[#allocation5 + $0xb8] sm:$0xf]  ;;  %v145_v21 = vld [vmem:[#allocation2] sm:$0xff]  ;;  %v3177_v24 = vpack.c.bf16 %v493_v18, %v491_v17  ;;  %v495_v25 = vld [vmem:[#allocation5 + $0xa0] sm:$0xff]  ;;  %s3916_s16 = smov 88   ;;  %s3917_s17 = smov 64  }
  0xab   :  { %v198_v22 = vld [vmem:[#allocation5 + $0x48] sm:$0xff]  ;;  %v200_v23 = vld [vmem:[#allocation5 + $0x58] sm:$0xff]  ;;  %v197_v27 = vld [vmem:[#allocation5 + $0x40] sm:$0xff]  ;;  %v3179_v29 = vpack.c.bf16 %v498_v20, %v496_v19  ;;  %s3918_s5 = smov 72   ;;  %s3919_s21 = smov 48   ;;  %vm828_vm8 = vcmask 130048  }
  0xac   :  { %v3155_v26 = vpack.c.bf16 %v200_v23, %v198_v22  ;;  %v199_v28 = vld [vmem:[#allocation5 + $0x50] sm:$0xff]  ;;  %v202_v32 = vld [vmem:[#allocation5 + $0x68] sm:$0xff]  ;;  %v204_v33 = vld [vmem:[#allocation5 + $0x78] sm:$0xf]  ;;  %s3920_s22 = smov 56   ;;  %s3921_s23 = smov 32  }
  0xad   :  { %3174 = vmatpush1.bf16.msk.msra.mxu0 %vm4095_vm2, %v3172_v15  ;;  %v497_v30 = vld [vmem:[#allocation5 + $0xb0] sm:$0xf]  ;;  %v3157_v31 = vpack.c.bf16 %v199_v28, %v197_v27  ;;  %v3159_v34 = vpack.c.bf16 %v204_v33, %v202_v32  ;;  %v201_v35 = vld [vmem:[#allocation5 + $0x60] sm:$0xff]  ;;  %v147_v42 = vld [vmem:[#allocation2 + $0x10] sm:$0xff]  ;;  %s3922_s0 = smov 40   ;;  %s3923_s12 = smov 24  }
  0xae   :  { %3176 = vmatprep.subr.bf16.mxu0 %v3175_v16  ;;  %3156 = vmatprep.subr.bf16.mxu1 %v3155_v26  ;;  %v203_v36 = vld [vmem:[#allocation5 + $0x70] sm:$0xf]  ;;  %v3182_v39 = vpack.c.bf16 %v497_v30, %v495_v25  ;;  %v149_v40 = vld [vmem:[#allocation2 + $0x1c] sm:$0xff]  ;;  %v148_v44 = vld [vmem:[#allocation2 + $0x18] sm:$0x3]  ;;  %vm830_vm9 = vcmask 195584  }
  0xaf   :  { %3158 = vmatpush1.bf16.msra.mxu1 %v3157_v31  ;;  %v3162_v37 = vpack.c.bf16 %v203_v36, %v201_v35  ;;  %v146_v38 = vld [vmem:[#allocation2 + $0x8] sm:$0xff]  ;;  %v158_v43 = vrot.slane %v149_v40, 6  ;;  %v179_v49 = vld [vmem:[#allocation2 + $0x1d] sm:$0xff]  ;;  %v177_v51 = vld [vmem:[#allocation2 + $0x11] sm:$0xff]  ;;  %vm832_vm10 = vcmask 261120   ;;  %vm834_vm11 = vcmask 326656  }
  0xb0   :  { %3119 = vmatmul.mubr.msk.f32.vlgmr.msra.gmra.mrb[0].mxu0 %vm205_vm3, %v145_v21  ;;  %3161 = vmatprep.subr.msk.bf16.mxu1 %vm4095_vm2, %v3159_v34  ;;  %v175_v41 = vld [vmem:[#allocation2 + $0x1] sm:$0xff]  ;;  %v176_v46 = vld [vmem:[#allocation2 + $0x9] sm:$0xff]  ;;  %v187_v52 = vrot.slane %v179_v49, 6  ;;  %v178_v55 = vld [vmem:[#allocation2 + $0x19] sm:$0x3]  ;;  %vm836_vm12 = vcmask 392192  }
  0xb1   :  { %3178 = vmatpush1.bf16.msra.mxu0 %v3177_v24  ;;  %432 = vmatprep.mubr.f32.mxu0 %v3909_v0  ;;  %v150_v45 = vld [vmem:[#allocation2 + $0x24] sm:$0xff]  ;;  %v166_v47 = vsel %vm5308_vm4, %v148_v44, %v158_v43  ;;  %v151_v50 = vld [vmem:[#allocation2 + $0x2c] sm:$0xff]  ;;  %v152_v57 = vld [vmem:[#allocation2 + $0x34] sm:$0x3]  ;;  %vm838_vm13 = vcmask 457728   ;;  %vm840_vm14 = vcmask 523264  }
  0xb2   :  { %3181 = vmatprep.subr.msk.bf16.mxu0 %vm4095_vm2, %v3179_v29  ;;  %v159_v48 = vrot.slane %v150_v45, 6  ;;  %v161_v54 = vrot.slane %v151_v50, 6  ;;  %v180_v56 = vld [vmem:[#allocation2 + $0x25] sm:$0xff]  ;;  %v195_v58 = vsel %vm5308_vm4, %v178_v55, %v187_v52  ;;  %v163_v61 = vrot.slane %v152_v57, 6  ;;  %v181_v62 = vld [vmem:[#allocation2 + $0x2d] sm:$0xff] }
  0xb3   :  { %3164 = vmatpush1.bf16.msk.msra.mxu1 %vm4095_vm2, %v3162_v37  ;;  %v188_v59 = vrot.slane %v180_v56, 6  ;;  %v190_v1 = vrot.slane %v181_v62, 6  ;;  %v182_v3 = vld [vmem:[#allocation2 + $0x35] sm:$0x3]  ;;  %v469_v6 = vld [vmem:[#allocation2 + $0x2] sm:$0xff]  ;;  %v470_v8 = vld [vmem:[#allocation2 + $0xa] sm:$0xff] }
  0xb4   :  { %3120 = vmatmul.mubr.msk.f32.gmra.mrb[2].mxu0 %vm205_vm3, %v146_v38  ;;  %v160_v53 = vsel %vm5308_vm4, %v158_v43, %v159_v48  ;;  %v162_v60 = vsel %vm5308_vm4, %v159_v48, %v161_v54  ;;  %v164_v2 = vsel %vm5308_vm4, %v161_v54, %v163_v61  ;;  %v192_v5 = vrot.slane %v182_v3, 6  ;;  %v473_v9 = vld [vmem:[#allocation2 + $0x1e] sm:$0xff]  ;;  %v471_v10 = vld [vmem:[#allocation2 + $0x12] sm:$0xff]  ;;  %v472_v12 = vld [vmem:[#allocation2 + $0x1a] sm:$0x3] }
  0xb5   :  { %438 = vmatprep.mubr.f32.mxu0 %v3909_v0  ;;  %3184 = vmatpush1.bf16.msk.msra.mxu0 %vm4095_vm2, %v3182_v39  ;;  %v189_v63 = vsel %vm5308_vm4, %v187_v52, %v188_v59  ;;  %v191_v4 = vsel %vm5308_vm4, %v188_v59, %v190_v1  ;;  %v481_v11 = vrot.slane %v473_v9, 6  ;;  %v474_v13 = vld [vmem:[#allocation2 + $0x26] sm:$0xff]  ;;  %v475_v16 = vld [vmem:[#allocation2 + $0x2e] sm:$0xff]  ;;  %v476_v19 = vld [vmem:[#allocation2 + $0x36] sm:$0x3]  ;;  %vm5309_vm15 = vcmask 588800  }
  0xb6   :  { %3110 = vmatmul.mubr.msk.f32.vlgmr.msra.gmra.mrb[0].mxu1 %vm205_vm3, %v175_v41  ;;  %v193_v7 = vsel %vm5308_vm4, %v190_v1, %v192_v5  ;;  %v482_v15 = vrot.slane %v474_v13, 6  ;;  %v484_v18 = vrot.slane %v475_v16, 6  ;;  %v486_v21 = vrot.slane %v476_v19, 6 }
  0xb7   :  { %301 = vmatprep.mubr.f32.mxu1 %v3909_v0  ;;  %v489_v14 = vsel %vm5308_vm4, %v472_v12, %v481_v11  ;;  %vm845_vm1 = vcmask 719872   ;;  %vm847_vm2 = vcmask 785408  }
  0xb8   :  { %3121 = vmatmul.mubr.msk.f32.gmra.mrb[4].mxu0 %vm205_vm3, %v147_v42  ;;  %v483_v17 = vsel %vm5308_vm4, %v481_v11, %v482_v15  ;;  %v485_v20 = vsel %vm5308_vm4, %v482_v15, %v484_v18  ;;  %v487_v22 = vsel %vm5308_vm4, %v484_v18, %v486_v21  ;;  %vm851_vm4 = vcmask 916480  }
  0xb9   :  { %444 = vmatprep.mubr.f32.mxu0 %v3909_v0 }
  0xba   :  { %3111 = vmatmul.mubr.msk.f32.gmra.mrb[2].mxu1 %vm205_vm3, %v176_v46 }
  0xbb   :  { %307 = vmatprep.mubr.f32.mxu1 %v3909_v0 }
  0xbc   :  { %3122 = vmatmul.mubr.msk.f32.gmra.mrb[6].mxu0 %vm205_vm3, %v166_v47 }
  0xbd   :  { %450 = vmatprep.mubr.f32.mxu0 %v3909_v0 }
  0xbe   :  { %3112 = vmatmul.mubr.msk.f32.gmra.mrb[4].mxu1 %vm205_vm3, %v177_v51 }
  0xbf   :  { %313 = vmatprep.mubr.f32.mxu1 %v3909_v0 }
  0xc0   :  { %3123 = vmatmul.mubr.msk.f32.gmra.mrb[8].mxu0 %vm205_vm3, %v160_v53 }
  0xc1   :  { %456 = vmatprep.mubr.f32.mxu0 %v3909_v0 }
  0xc2   :  { %3113 = vmatmul.mubr.msk.f32.gmra.mrb[6].mxu1 %vm205_vm3, %v195_v58 }
  0xc3   :  { %319 = vmatprep.mubr.f32.mxu1 %v3909_v0 }
  0xc4   :  { %3124 = vmatmul.mubr.msk.f32.gmra.mrb[10].mxu0 %vm205_vm3, %v162_v60 }
  0xc5   :  { %462 = vmatprep.mubr.f32.mxu0 %v3909_v0 }
  0xc6   :  { %3114 = vmatmul.mubr.msk.f32.gmra.mrb[8].mxu1 %vm205_vm3, %v189_v63 }
  0xc7   :  { %325 = vmatprep.mubr.f32.mxu1 %v3909_v0 }
  0xc8   :  { %3125 = vmatmul.mubr.msk.f32.gmra.mrb[12].mxu0 %vm205_vm3, %v164_v2 }
  0xc9   :  { %587 = vmatprep.mubr.f32.mxu0 %v3909_v0 }
  0xca   :  { %3115 = vmatmul.mubr.msk.f32.gmra.mrb[10].mxu1 %vm205_vm3, %v191_v4 }
  0xcb   :  { %331 = vmatprep.mubr.f32.mxu1 %v3909_v0 }
  0xcc   :  { %3128 = vmatmul.mubr.msk.f32.vlgmr.msra.gmra.mrb[0].mxu0 %vm205_vm3, %v469_v6 }
  0xcd   :  { %593 = vmatprep.mubr.f32.mxu0 %v3909_v0 }
  0xce   :  { %3116 = vmatmul.mubr.msk.f32.gmra.mrb[12].mxu1 %vm205_vm3, %v193_v7 }
  0xd0   :  { %3129 = vmatmul.mubr.msk.f32.gmra.mrb[2].mxu0 %vm205_vm3, %v470_v8 }
  0xd1   :  { %599 = vmatprep.mubr.f32.mxu0 %v3909_v0 }
  0xd4   :  { %3130 = vmatmul.mubr.msk.f32.gmra.mrb[4].mxu0 %vm205_vm3, %v471_v10 }
  0xd5   :  { %605 = vmatprep.mubr.f32.mxu0 %v3909_v0 }
  0xd8   :  { %3131 = vmatmul.mubr.msk.f32.gmra.mrb[6].mxu0 %vm205_vm3, %v489_v14 }
  0xd9   :  { %611 = vmatprep.mubr.f32.mxu0 %v3909_v0 }
  0xdc   :  { %3132 = vmatmul.mubr.msk.f32.gmra.mrb[8].mxu0 %vm205_vm3, %v483_v17 }
  0xdd   :  { %617 = vmatprep.mubr.f32.mxu0 %v3909_v0 }
  0xe0   :  { %3133 = vmatmul.mubr.msk.f32.gmra.mrb[10].mxu0 %vm205_vm3, %v485_v20 }
  0xe1   :  { %623 = vmatprep.mubr.f32.mxu0 %v3909_v0 }
  0xe4   :  { %3134 = vmatmul.mubr.msk.f32.gmra.mrb[12].mxu0 %vm205_vm3, %v487_v22  ;;  %vm849_vm3 = vcmask 850944  }
 0x189   :  { %v297_v23 = vpop.f32.mrb[0].mxu1 }
 0x18a   :  { %v299_v24 = vpop.f32.mrb[1].mxu1 }
 0x18d   :  { %v303_v25 = vpop.f32.mrb[2].mxu1 }
 0x18e   :  { %v305_v26 = vpop.f32.mrb[3].mxu1 }
 0x191   :  { %v309_v27 = vpop.f32.mrb[4].mxu1 }
 0x192   :  { %v311_v28 = vpop.f32.mrb[5].mxu1 }
 0x195   :  { %v315_v29 = vpop.f32.mrb[6].mxu1 }
 0x196   :  { %v317_v30 = vpop.f32.mrb[7].mxu1 }
 0x199   :  { %v321_v31 = vpop.f32.mrb[8].mxu1 }
 0x19a   :  { %v323_v32 = vpop.f32.mrb[9].mxu1 }
 0x19d   :  { %v327_v33 = vpop.f32.mrb[10].mxu1 }
 0x19e   :  { %v329_v35 = vpop.f32.mrb[11].mxu1 }
 0x19f   :  { %v589_v34 = vpop.f32.mrb[0].mxu0 }
 0x1a0   :  { %v4163_v36 = vadd.f32 %v589_v34, %v297_v23  ;;  %v591_v0 = vpop.f32.mrb[1].mxu0 }
 0x1a1   :  { %v4165_v37 = vadd.f32 %v591_v0, %v299_v24  ;;  %v333_v38 = vpop.f32.mrb[12].mxu1 }
 0x1a2   :  { %v335_v40 = vpop.f32.mrb[13].mxu1 }
 0x1a3   :  { %v595_v39 = vpop.f32.mrb[2].mxu0  ;;  %v660_v11 = vsel %vm659_vm5, %v4165_v37, 0.0 }
 0x1a4   :  { %v4167_v41 = vadd.f32 %v595_v39, %v303_v25  ;;  %v597_v42 = vpop.f32.mrb[3].mxu0 }
 0x1a5   :  { %v4169_v43 = vadd.f32 %v597_v42, %v305_v26 }
 0x1a6   :  { %v646_v55 = vadd.f32 %v4167_v41, %v4163_v36 }
 0x1a7   :  { %v601_v44 = vpop.f32.mrb[4].mxu0  ;;  %v661_v9 = vsel %vm659_vm5, %v4169_v43, 0.0 }
 0x1a8   :  { %v4171_v45 = vadd.f32 %v601_v44, %v309_v27  ;;  %v603_v46 = vpop.f32.mrb[5].mxu0  ;;  %v662_v13 = vadd.f32 %v661_v9, %v660_v11 }
 0x1a9   :  { %v4173_v47 = vadd.f32 %v603_v46, %v311_v28 }
 0x1aa   :  { %v647_v57 = vadd.f32 %v4171_v45, %v646_v55 }
 0x1ab   :  { %v607_v48 = vpop.f32.mrb[6].mxu0  ;;  %v663_v12 = vsel %vm659_vm5, %v4173_v47, 0.0 }
 0x1ac   :  { %v4175_v49 = vadd.f32 %v607_v48, %v315_v29  ;;  %v609_v50 = vpop.f32.mrb[7].mxu0  ;;  %v664_v16 = vadd.f32 %v663_v12, %v662_v13 }
 0x1ad   :  { %v4177_v51 = vadd.f32 %v609_v50, %v317_v30 }
 0x1ae   :  { %v648_v61 = vadd.f32 %v4175_v49, %v647_v57 }
 0x1af   :  { %v613_v52 = vpop.f32.mrb[8].mxu0  ;;  %v665_v15 = vsel %vm659_vm5, %v4177_v51, 0.0 }
 0x1b0   :  { %v4179_v53 = vadd.f32 %v613_v52, %v321_v31  ;;  %v615_v54 = vpop.f32.mrb[9].mxu0  ;;  %v666_v19 = vadd.f32 %v665_v15, %v664_v16 }
 0x1b1   :  { %v4183_v56 = vadd.f32 %v615_v54, %v323_v32 }
 0x1b2   :  { %v649_v63 = vadd.f32 %v4179_v53, %v648_v61 }
 0x1b3   :  { %v619_v58 = vpop.f32.mrb[10].mxu0  ;;  %v667_v18 = vsel %vm659_vm5, %v4183_v56, 0.0 }
 0x1b4   :  { %v4186_v59 = vadd.f32 %v619_v58, %v327_v33  ;;  %v621_v60 = vpop.f32.mrb[11].mxu0  ;;  %v668_v22 = vadd.f32 %v667_v18, %v666_v19 }
 0x1b5   :  { %v4189_v62 = vadd.f32 %v621_v60, %v329_v35 }
 0x1b6   :  { %v650_v4 = vadd.f32 %v4186_v59, %v649_v63 }
 0x1b7   :  { %v625_v1 = vpop.f32.mrb[12].mxu0  ;;  %v669_v21 = vsel %vm659_vm5, %v4189_v62, 0.0 }
 0x1b8   :  { %v4192_v2 = vadd.f32 %v625_v1, %v333_v38  ;;  %v627_v3 = vpop.f32.mrb[13].mxu0  ;;  %v670_v25 = vadd.f32 %v669_v21, %v668_v22 }
 0x1b9   :  { %v4195_v5 = vadd.f32 %v627_v3, %v335_v40 }
 0x1ba   :  { %v651_v6 = vsel %vm224_vm0, %v4192_v2, 0.0 }
 0x1bb   :  { %v652_v7 = vadd.f32 %v651_v6, %v650_v4  ;;  %v672_v24 = vsel %vm671_vm6, %v4195_v5, 0.0 }
 0x1bc   :  { %v673_v26 = vadd.f32 %v672_v24, %v670_v25 }
 0x1bd   :  { %v653_v8 = vrot.slane %v652_v7, 4 }
 0x1be   :  { %v674_v27 = vrot.slane %v673_v26, 4 }
 0x1bf   :  { %v654_v10 = vadd.f32 %v653_v8, %v652_v7 }
 0x1c0   :  { %v675_v28 = vadd.f32 %v674_v27, %v673_v26 }
 0x1c1   :  { %v655_v14 = vrot.slane %v654_v10, 2 }
 0x1c2   :  { %v676_v29 = vrot.slane %v675_v28, 2 }
 0x1c3   :  { %v656_v17 = vadd.f32 %v655_v14, %v654_v10 }
 0x1c4   :  { %v677_v30 = vadd.f32 %v676_v29, %v675_v28 }
 0x1c5   :  { %v657_v20 = vrot.slane %v656_v17, 1 }
 0x1c6   :  { %v678_v31 = vrot.slane %v677_v30, 1 }
 0x1c7   :  { %v658_v23 = vadd.f32 %v657_v20, %v656_v17 }
 0x1c8   :  { %v679_v32 = vadd.f32 %v678_v31, %v677_v30 }
 0x1c9   :  { %689 = vrot.lane.b32.xlu1 %v658_v23, %s3911_s8  ;;  %681 = vrot.lane.b32.xlu0 %v658_v23, %s3912_s13 }
 0x1cd   :  { %693 = vrot.lane.b32.xlu1 %v658_v23, %s3913_s1  ;;  %685 = vrot.lane.b32.xlu0 %v658_v23, %s3914_s10 }
 0x1d1   :  { %701 = vrot.lane.b32.xlu1 %v658_v23, %s3915_s15  ;;  %697 = vrot.lane.b32.xlu0 %v658_v23, %s3916_s16 }
 0x1d5   :  { %709 = vrot.lane.b32.xlu1 %v658_v23, %s3917_s17  ;;  %705 = vrot.lane.b32.xlu0 %v658_v23, %s3918_s5 }
 0x1d9   :  { %717 = vrot.lane.b32.xlu1 %v658_v23, %s3919_s21  ;;  %713 = vrot.lane.b32.xlu0 %v658_v23, %s3920_s22 }
 0x1dd   :  { %725 = vrot.lane.b32.xlu1 %v658_v23, %s3921_s23  ;;  %721 = vrot.lane.b32.xlu0 %v658_v23, %s3922_s0 }
 0x1e1   :  { %733 = vrot.lane.b32.xlu1 %v658_v23, %s3898_s20  ;;  %729 = vrot.lane.b32.xlu0 %v658_v23, %s3923_s12 }
 0x1e5   :  { %737 = vrot.lane.b32.xlu0 %v658_v23, %s3904_s18  ;;  %743 = vrot.lane.b32.xlu1 %v679_v32, %s3912_s13 }
 0x1e9   :  { %747 = vrot.lane.b32.xlu0 %v679_v32, %s3914_s10  ;;  %751 = vrot.lane.b32.xlu1 %v679_v32, %s3911_s8 }
 0x1ed   :  { %755 = vrot.lane.b32.xlu0 %v679_v32, %s3913_s1  ;;  %759 = vrot.lane.b32.xlu1 %v679_v32, %s3916_s16 }
 0x1f1   :  { %763 = vrot.lane.b32.xlu0 %v679_v32, %s3915_s15  ;;  %767 = vrot.lane.b32.xlu1 %v679_v32, %s3918_s5 }
 0x1f5   :  { %771 = vrot.lane.b32.xlu0 %v679_v32, %s3917_s17  ;;  %775 = vrot.lane.b32.xlu1 %v679_v32, %s3920_s22 }
 0x23b   :  { %v690_v33 = vpop.permute.xlu1 %689  ;;  %v682_v34 = vpop.permute.xlu0 %681 }
 0x23c   :  { %v684_v35 = vadd.f32 %v682_v34, %v658_v23 }
 0x23f   :  { %v694_v0 = vpop.permute.xlu1 %693  ;;  %v686_v38 = vpop.permute.xlu0 %685 }
 0x240   :  { %v688_v39 = vadd.f32 %v686_v38, %v684_v35 }
 0x242   :  { %v692_v40 = vadd.f32 %v690_v33, %v688_v39 }
 0x243   :  { %v702_v42 = vpop.permute.xlu1 %701  ;;  %v698_v44 = vpop.permute.xlu0 %697 }
 0x244   :  { %v696_v46 = vadd.f32 %v694_v0, %v692_v40 }
 0x246   :  { %v700_v48 = vadd.f32 %v698_v44, %v696_v46 }
 0x247   :  { %v710_v50 = vpop.permute.xlu1 %709  ;;  %v706_v52 = vpop.permute.xlu0 %705 }
 0x248   :  { %v704_v54 = vadd.f32 %v702_v42, %v700_v48 }
 0x24a   :  { %v708_v55 = vadd.f32 %v706_v52, %v704_v54 }
 0x24b   :  { %v718_v57 = vpop.permute.xlu1 %717  ;;  %v714_v58 = vpop.permute.xlu0 %713 }
 0x24c   :  { %v712_v60 = vadd.f32 %v710_v50, %v708_v55 }
 0x24e   :  { %v716_v61 = vadd.f32 %v714_v58, %v712_v60 }
 0x24f   :  { %v726_v63 = vpop.permute.xlu1 %725  ;;  %v722_v1 = vpop.permute.xlu0 %721 }
 0x250   :  { %v720_v3 = vadd.f32 %v718_v57, %v716_v61  ;;  %v855_v57 = vlaneseq }
 0x252   :  { %v724_v4 = vadd.f32 %v722_v1, %v720_v3  ;;  %v856_v1 = vshrl.u32 %v855_v57, 7 }
 0x253   :  { %v734_v6 = vpop.permute.xlu1 %733  ;;  %v730_v7 = vpop.permute.xlu0 %729 }
 0x254   :  { %v728_v8 = vadd.f32 %v726_v63, %v724_v4 }
 0x256   :  { %v732_v9 = vadd.f32 %v730_v7, %v728_v8  ;;  %v4263_v8 = vsub.s32 0, %v856_v1 }
 0x257   :  { %v738_v10 = vpop.permute.xlu0 %737  ;;  %v744_v11 = vpop.permute.xlu1 %743 }
 0x258   :  { %v736_v12 = vadd.f32 %v734_v6, %v732_v9 }
 0x25a   :  { %v740_v13 = vadd.f32 %v738_v10, %v736_v12 }
 0x25b   :  { %v748_v14 = vpop.permute.xlu0 %747  ;;  %v752_v15 = vpop.permute.xlu1 %751 }
 0x25c   :  { %v741_v16 = vadd.f32 %v740_v13, %v679_v32 }
 0x25e   :  { %v746_v17 = vadd.f32 %v744_v11, %v741_v16 }
 0x25f   :  { %v756_v18 = vpop.permute.xlu0 %755  ;;  %v760_v20 = vpop.permute.xlu1 %759 }
 0x260   :  { %v750_v19 = vadd.f32 %v748_v14, %v746_v17 }
 0x262   :  { %v754_v21 = vadd.f32 %v752_v15, %v750_v19 }
 0x263   :  { %v764_v23 = vpop.permute.xlu0 %763  ;;  %v768_v25 = vpop.permute.xlu1 %767 }
 0x264   :  { %v758_v22 = vadd.f32 %v756_v18, %v754_v21 }
 0x266   :  { %v762_v24 = vadd.f32 %v760_v20, %v758_v22 }
 0x267   :  { %v772_v28 = vpop.permute.xlu0 %771  ;;  %v776_v30 = vpop.permute.xlu1 %775 }
 0x268   :  { %v766_v26 = vadd.f32 %v764_v23, %v762_v24 }
 0x26a   :  { %v770_v27 = vadd.f32 %v768_v25, %v766_v26 }
 0x26c   :  { %v774_v29 = vadd.f32 %v772_v28, %v770_v27 }
 0x26e   :  { %v778_v31 = vadd.f32 %v776_v30, %v774_v29 }
 0x270   :  { %v779_v33 = vmul.f32 0.000739645, %v778_v31 }
 0x272   :  { %784 = vrot.lane.b32.xlu1 %v779_v33, %s3898_s20  ;;  %781 = vrot.lane.b32.xlu0 %v779_v33, %s3904_s18 }
 0x276   :  { %790 = vrot.lane.b32.xlu1 %v779_v33, %s3921_s23  ;;  %787 = vrot.lane.b32.xlu0 %v779_v33, %s3923_s12 }
 0x27a   :  { %796 = vrot.lane.b32.xlu1 %v779_v33, %s3919_s21  ;;  %793 = vrot.lane.b32.xlu0 %v779_v33, %s3922_s0 }
 0x27e   :  { %802 = vrot.lane.b32.xlu1 %v779_v33, %s3917_s17  ;;  %799 = vrot.lane.b32.xlu0 %v779_v33, %s3920_s22 }
 0x282   :  { %808 = vrot.lane.b32.xlu1 %v779_v33, %s3915_s15  ;;  %805 = vrot.lane.b32.xlu0 %v779_v33, %s3918_s5 }
 0x286   :  { %814 = vrot.lane.b32.xlu1 %v779_v33, %s3913_s1  ;;  %811 = vrot.lane.b32.xlu0 %v779_v33, %s3916_s16 }
 0x28a   :  { %820 = vrot.lane.b32.xlu1 %v779_v33, %s3914_s10  ;;  %817 = vrot.lane.b32.xlu0 %v779_v33, %s3911_s8 }
 0x28e   :  { %823 = vrot.lane.b32.xlu0 %v779_v33, %s3912_s13 }
 0x2e4   :  { %v785_v32 = vpop.permute.xlu1 %784  ;;  %v782_v34 = vpop.permute.xlu0 %781 }
 0x2e5   :  { %v827_v35 = vsel %vm826_vm7, %v779_v33, %v782_v34 }
 0x2e6   :  { %v829_v39 = vsel %vm828_vm8, %v827_v35, %v785_v32 }
 0x2e8   :  { %v791_v0 = vpop.permute.xlu1 %790  ;;  %v788_v38 = vpop.permute.xlu0 %787 }
 0x2e9   :  { %v831_v40 = vsel %vm830_vm9, %v829_v39, %v788_v38 }
 0x2ea   :  { %v833_v46 = vsel %vm832_vm10, %v831_v40, %v791_v0 }
 0x2ec   :  { %v797_v42 = vpop.permute.xlu1 %796  ;;  %v794_v44 = vpop.permute.xlu0 %793 }
 0x2ed   :  { %v835_v48 = vsel %vm834_vm11, %v833_v46, %v794_v44 }
 0x2ee   :  { %v837_v54 = vsel %vm836_vm12, %v835_v48, %v797_v42 }
 0x2f0   :  { %v803_v50 = vpop.permute.xlu1 %802  ;;  %v800_v52 = vpop.permute.xlu0 %799 }
 0x2f1   :  { %v839_v55 = vsel %vm838_vm13, %v837_v54, %v800_v52 }
 0x2f2   :  { %v841_v61 = vsel %vm840_vm14, %v839_v55, %v803_v50 }
 0x2f4   :  { %v809_v58 = vpop.permute.xlu1 %808  ;;  %v806_v60 = vpop.permute.xlu0 %805 }
 0x2f5   :  { %v843_v63 = vsel %vm5309_vm15, %v841_v61, %v806_v60  ;;  %vm853_vm15 = vcmask 982016  }
 0x2f6   :  { %v844_v6 = vsel %vm659_vm5, %v843_v63, %v809_v58  ;;  %v862_v13 = vrot.slane %v843_v63, %v4263_v8 }
 0x2f8   :  { %v815_v3 = vpop.permute.xlu1 %814  ;;  %v812_v4 = vpop.permute.xlu0 %811  ;;  %v4272_v18 = vsub.f32 %v4165_v37, %v862_v13  ;;  %v4275_v19 = vsub.f32 %v4169_v43, %v862_v13  ;;  %v4303_v25 = vsub.f32 %v4173_v47, %v862_v13  ;;  %v4318_v47 = vsub.f32 %v4177_v51, %v862_v13 }
 0x2f9   :  { %v846_v7 = vsel %vm845_vm1, %v844_v6, %v812_v4  ;;  %v4327_v38 = vsub.f32 %v4183_v56, %v862_v13  ;;  %v4334_v48 = vsub.f32 %v4189_v62, %v862_v13  ;;  %v4340_v57 = vsub.f32 %v4195_v5, %v862_v13 }
 0x2fa   :  { %v848_v11 = vsel %vm847_vm2, %v846_v7, %v815_v3  ;;  %v878_v43 = vmul.f32 %v4272_v18, %v4272_v18  ;;  %v884_v39 = vmul.f32 %v4318_v47, %v4318_v47 }
 0x2fb   :  { %v886_v50 = vmul.f32 %v4327_v38, %v4327_v38  ;;  %v888_v58 = vmul.f32 %v4334_v48, %v4334_v48  ;;  %v890_v1 = vmul.f32 %v4340_v57, %v4340_v57 }
 0x2fc   :  { %v818_v9 = vpop.permute.xlu0 %817  ;;  %v821_v10 = vpop.permute.xlu1 %820  ;;  %v909_v52 = vsel %vm659_vm5, %v884_v39, 0.0 }
 0x2fd   :  { %v850_v12 = vsel %vm849_vm3, %v848_v11, %v818_v9  ;;  %v911_v60 = vsel %vm659_vm5, %v886_v50, 0.0  ;;  %v913_v3 = vsel %vm659_vm5, %v888_v58, 0.0  ;;  %v915_v5 = vsel %vm671_vm6, %v890_v1, 0.0 }
 0x2fe   :  { %v852_v14 = vsel %vm851_vm4, %v850_v12, %v821_v10  ;;  %vm5314_vm6 = vcmask 588800  }
 0x300   :  { %v824_v15 = vpop.permute.xlu0 %823 }
 0x301   :  { %v854_v16 = vsel %vm853_vm15, %v852_v14, %v824_v15  ;;  %v4371_v15 = vld [vmem:[#allocation8] sm:$0x1] }
 0x302   :  { %v858_v17 = vrot.slane %v854_v16, %v4263_v8  ;;  %v4377_v16 = vrot.slane %v4371_v15, %v4263_v8 }
 0x304   :  { %v4278_v20 = vsub.f32 %v4163_v36, %v858_v17  ;;  %v4281_v21 = vsub.f32 %v4167_v41, %v858_v17  ;;  %v4284_v22 = vsub.f32 %v4171_v45, %v858_v17  ;;  %v4287_v23 = vsub.f32 %v4175_v49, %v858_v17 }
 0x305   :  { %v880_v36 = vmul.f32 %v4275_v19, %v4275_v19  ;;  %v4298_v41 = vsub.f32 %v4179_v53, %v858_v17  ;;  %v4306_v26 = vsub.f32 %v4192_v2, %v858_v17  ;;  %v4309_v27 = vsub.f32 %v4186_v59, %v858_v17 }
 0x306   :  { %v877_v24 = vmul.f32 %v4278_v20, %v4278_v20  ;;  %v879_v37 = vmul.f32 %v4281_v21, %v4281_v21  ;;  %v881_v45 = vmul.f32 %v4284_v22, %v4284_v22  ;;  %v883_v28 = vmul.f32 %v4287_v23, %v4287_v23 }
 0x307   :  { %v904_v53 = vsel %vm659_vm5, %v878_v43, 0.0  ;;  %v905_v30 = vsel %vm659_vm5, %v880_v36, 0.0  ;;  %v885_v31 = vmul.f32 %v4298_v41, %v4298_v41  ;;  %v882_v2 = vmul.f32 %v4303_v25, %v4303_v25 }
 0x308   :  { %v891_v49 = vadd.f32 %v879_v37, %v877_v24  ;;  %v889_v59 = vmul.f32 %v4306_v26, %v4306_v26  ;;  %v906_v32 = vadd.f32 %v905_v30, %v904_v53  ;;  %v887_v34 = vmul.f32 %v4309_v27, %v4309_v27 }
 0x309   :  { %v907_v51 = vsel %vm659_vm5, %v882_v2, 0.0 }
 0x30a   :  { %v892_v29 = vadd.f32 %v891_v49, %v881_v45  ;;  %v896_v40 = vsel %vm224_vm0, %v889_v59, 0.0  ;;  %v908_v42 = vadd.f32 %v907_v51, %v906_v32 }
 0x30c   :  { %v893_v33 = vadd.f32 %v892_v29, %v883_v28  ;;  %v910_v56 = vadd.f32 %v909_v52, %v908_v42 }
 0x30e   :  { %v894_v35 = vadd.f32 %v893_v33, %v885_v31  ;;  %v912_v61 = vadd.f32 %v911_v60, %v910_v56 }
 0x310   :  { %v895_v0 = vadd.f32 %v894_v35, %v887_v34  ;;  %v914_v4 = vadd.f32 %v913_v3, %v912_v61 }
 0x312   :  { %v897_v44 = vadd.f32 %v896_v40, %v895_v0  ;;  %v916_v7 = vadd.f32 %v915_v5, %v914_v4 }
 0x314   :  { %v898_v46 = vrot.slane %v897_v44, 4  ;;  %v917_v9 = vrot.slane %v916_v7, 4 }
 0x316   :  { %v899_v54 = vadd.f32 %v898_v46, %v897_v44  ;;  %v918_v10 = vadd.f32 %v917_v9, %v916_v7 }
 0x318   :  { %v900_v55 = vrot.slane %v899_v54, 2  ;;  %v919_v11 = vrot.slane %v918_v10, 2 }
 0x31a   :  { %v901_v63 = vadd.f32 %v900_v55, %v899_v54  ;;  %v920_v12 = vadd.f32 %v919_v11, %v918_v10 }
 0x31c   :  { %v902_v62 = vrot.slane %v901_v63, 1  ;;  %v921_v13 = vrot.slane %v920_v12, 1 }
 0x31e   :  { %v903_v6 = vadd.f32 %v902_v62, %v901_v63  ;;  %v922_v14 = vadd.f32 %v921_v13, %v920_v12 }
 0x320   :  { %928 = vrot.lane.b32.xlu0 %v903_v6, %s3914_s10  ;;  %924 = vrot.lane.b32.xlu1 %v903_v6, %s3912_s13 }
 0x324   :  { %936 = vrot.lane.b32.xlu0 %v903_v6, %s3913_s1  ;;  %932 = vrot.lane.b32.xlu1 %v903_v6, %s3911_s8 }
 0x328   :  { %944 = vrot.lane.b32.xlu0 %v903_v6, %s3915_s15  ;;  %940 = vrot.lane.b32.xlu1 %v903_v6, %s3916_s16 }
 0x32c   :  { %952 = vrot.lane.b32.xlu0 %v903_v6, %s3917_s17  ;;  %948 = vrot.lane.b32.xlu1 %v903_v6, %s3918_s5 }
 0x330   :  { %960 = vrot.lane.b32.xlu0 %v903_v6, %s3919_s21  ;;  %956 = vrot.lane.b32.xlu1 %v903_v6, %s3920_s22 }
 0x334   :  { %968 = vrot.lane.b32.xlu0 %v903_v6, %s3921_s23  ;;  %964 = vrot.lane.b32.xlu1 %v903_v6, %s3922_s0 }
 0x338   :  { %976 = vrot.lane.b32.xlu0 %v903_v6, %s3898_s20  ;;  %972 = vrot.lane.b32.xlu1 %v903_v6, %s3923_s12 }
 0x33c   :  { %986 = vrot.lane.b32.xlu0 %v922_v14, %s3912_s13  ;;  %980 = vrot.lane.b32.xlu1 %v903_v6, %s3904_s18 }
 0x340   :  { %994 = vrot.lane.b32.xlu0 %v922_v14, %s3911_s8  ;;  %990 = vrot.lane.b32.xlu1 %v922_v14, %s3914_s10 }
 0x344   :  { %1002 = vrot.lane.b32.xlu0 %v922_v14, %s3916_s16  ;;  %998 = vrot.lane.b32.xlu1 %v922_v14, %s3913_s1 }
 0x348   :  { %1010 = vrot.lane.b32.xlu0 %v922_v14, %s3918_s5  ;;  %1006 = vrot.lane.b32.xlu1 %v922_v14, %s3915_s15 }
 0x34c   :  { %1018 = vrot.lane.b32.xlu0 %v922_v14, %s3920_s22  ;;  %1014 = vrot.lane.b32.xlu1 %v922_v14, %s3917_s17 }
 0x350   :  { %1096 = vrot.lane.b32.xlu0 %v4377_v16, %s3904_s18 }
 0x354   :  { %1099 = vrot.lane.b32.xlu0 %v4377_v16, %s3898_s20 }
 0x358   :  { %1102 = vrot.lane.b32.xlu0 %v4377_v16, %s3923_s12 }
 0x35c   :  { %1105 = vrot.lane.b32.xlu0 %v4377_v16, %s3921_s23 }
 0x360   :  { %1108 = vrot.lane.b32.xlu0 %v4377_v16, %s3922_s0 }
 0x364   :  { %1111 = vrot.lane.b32.xlu0 %v4377_v16, %s3919_s21 }
 0x368   :  { %1114 = vrot.lane.b32.xlu0 %v4377_v16, %s3920_s22 }
 0x36c   :  { %1117 = vrot.lane.b32.xlu0 %v4377_v16, %s3917_s17 }
 0x370   :  { %1120 = vrot.lane.b32.xlu0 %v4377_v16, %s3918_s5 }
 0x374   :  { %1123 = vrot.lane.b32.xlu0 %v4377_v16, %s3915_s15 }
 0x392   :  { %v929_v17 = vpop.permute.xlu0 %928  ;;  %v925_v24 = vpop.permute.xlu1 %924 }
 0x393   :  { %v927_v37 = vadd.f32 %v925_v24, %v903_v6 }
 0x395   :  { %v931_v43 = vadd.f32 %v929_v17, %v927_v37 }
 0x396   :  { %v937_v36 = vpop.permute.xlu0 %936  ;;  %v933_v45 = vpop.permute.xlu1 %932 }
 0x397   :  { %v935_v49 = vadd.f32 %v933_v45, %v931_v43 }
 0x399   :  { %v939_v28 = vadd.f32 %v937_v36, %v935_v49 }
 0x39a   :  { %v945_v29 = vpop.permute.xlu0 %944  ;;  %v941_v53 = vpop.permute.xlu1 %940 }
 0x39b   :  { %v943_v30 = vadd.f32 %v941_v53, %v939_v28 }
 0x39d   :  { %v947_v31 = vadd.f32 %v945_v29, %v943_v30  ;;  %v1560_v30 = vld [vmem:[#allocation10 + $0x8] sm:$0xff] }
 0x39e   :  { %v953_v33 = vpop.permute.xlu0 %952  ;;  %v949_v2 = vpop.permute.xlu1 %948 }
 0x39f   :  { %v951_v59 = vadd.f32 %v949_v2, %v947_v31  ;;  %v1562_v31 = vld [vmem:[#allocation10 + $0x18] sm:$0xff] }
 0x3a0   :  { %v3237_v2 = vpack.c.bf16 %v1562_v31, %v1560_v30 }
 0x3a1   :  { %v955_v32 = vadd.f32 %v953_v33, %v951_v59  ;;  %v1559_v33 = vld [vmem:[#allocation10] sm:$0xff]  ;;  %v1561_v59 = vld [vmem:[#allocation10 + $0x10] sm:$0xff] }
 0x3a2   :  { %v961_v34 = vpop.permute.xlu0 %960  ;;  %v957_v35 = vpop.permute.xlu1 %956  ;;  %3238 = vmatprep.subr.bf16.mxu1 %v3237_v2  ;;  %v1572_v2 = vld [vmem:[#allocation10 + $0x68] sm:$0xff] }
 0x3a3   :  { %v959_v0 = vadd.f32 %v957_v35, %v955_v32 }
 0x3a5   :  { %v963_v39 = vadd.f32 %v961_v34, %v959_v0  ;;  %v3239_v34 = vpack.c.bf16 %v1561_v59, %v1559_v33  ;;  %v1569_v33 = vld [vmem:[#allocation10 + $0x50] sm:$0xff]  ;;  %v1574_v59 = vld [vmem:[#allocation10 + $0x78] sm:$0xff] }
 0x3a6   :  { %v969_v51 = vpop.permute.xlu0 %968  ;;  %v965_v40 = vpop.permute.xlu1 %964 }
 0x3a7   :  { %v967_v42 = vadd.f32 %v965_v40, %v963_v39  ;;  %3240 = vmatpush1.bf16.msra.mxu1 %v3239_v34 }
 0x3a9   :  { %v971_v44 = vadd.f32 %v969_v51, %v967_v42 }
 0x3aa   :  { %v977_v46 = vpop.permute.xlu0 %976  ;;  %v973_v50 = vpop.permute.xlu1 %972 }
 0x3ab   :  { %v975_v52 = vadd.f32 %v973_v50, %v971_v44 }
 0x3ad   :  { %v979_v56 = vadd.f32 %v977_v46, %v975_v52 }
 0x3ae   :  { %v987_v54 = vpop.permute.xlu0 %986  ;;  %v981_v55 = vpop.permute.xlu1 %980 }
 0x3af   :  { %v983_v58 = vadd.f32 %v981_v55, %v979_v56 }
 0x3b1   :  { %v984_v60 = vadd.f32 %v983_v58, %v922_v14  ;;  %v644_v14 = vld [vmem:[#allocation7] sm:$0x1] }
 0x3b2   :  { %v995_v61 = vpop.permute.xlu0 %994  ;;  %v991_v63 = vpop.permute.xlu1 %990 }
 0x3b3   :  { %v989_v62 = vadd.f32 %v987_v54, %v984_v60 }
 0x3b5   :  { %v993_v1 = vadd.f32 %v991_v63, %v989_v62 }
 0x3b6   :  { %v1003_v3 = vpop.permute.xlu0 %1002  ;;  %v999_v4 = vpop.permute.xlu1 %998 }
 0x3b7   :  { %v997_v6 = vadd.f32 %v995_v61, %v993_v1 }
 0x3b9   :  { %v1001_v5 = vadd.f32 %v999_v4, %v997_v6 }
 0x3ba   :  { %v1007_v7 = vpop.permute.xlu1 %1006  ;;  %v1011_v10 = vpop.permute.xlu0 %1010 }
 0x3bb   :  { %v1005_v9 = vadd.f32 %v1003_v3, %v1001_v5 }
 0x3bd   :  { %v1009_v11 = vadd.f32 %v1007_v7, %v1005_v9  ;;  %v1564_v9 = vld [vmem:[#allocation10 + $0x28] sm:$0xff] }
 0x3be   :  { %v1015_v13 = vpop.permute.xlu1 %1014  ;;  %v1019_v24 = vpop.permute.xlu0 %1018 }
 0x3bf   :  { %v1013_v12 = vadd.f32 %v1011_v10, %v1009_v11  ;;  %v1566_v10 = vld [vmem:[#allocation10 + $0x38] sm:$0xff]  ;;  %v1563_v11 = vld [vmem:[#allocation10 + $0x20] sm:$0xff] }
 0x3c1   :  { %v1017_v17 = vadd.f32 %v1015_v13, %v1013_v12 }
 0x3c2   :  { %v1097_v29 = vpop.permute.xlu0 %1096 }
 0x3c3   :  { %v1021_v37 = vadd.f32 %v1019_v24, %v1017_v17  ;;  %v3241_v17 = vpack.c.bf16 %v1566_v10, %v1564_v9  ;;  %v1565_v24 = vld [vmem:[#allocation10 + $0x30] sm:$0xff] }
 0x3c5   :  { %v1022_v43 = vmul.f32 0.000739645, %v1021_v37  ;;  %3242 = vmatprep.subr.bf16.mxu1 %v3241_v17 }
 0x3c6   :  { %v1100_v53 = vpop.permute.xlu0 %1099 }
 0x3c7   :  { %v1023_v36 = vadd.f32 1e-05, %v1022_v43  ;;  %v3243_v43 = vpack.c.bf16 %v1565_v24, %v1563_v11  ;;  %v1584_v11 = vld [vmem:[#allocation10 + $0xc8] sm:$0xff] }
 0x3c9   :  { %3660 = vrsqrt.f32 %v1023_v36  ;;  %3244 = vmatpush1.bf16.msra.mxu1 %v3243_v43 }
 0x3ca   :  { %v1103_v32 = vpop.permute.xlu0 %1102 }
 0x3ce   :  { %v1106_v35 = vpop.permute.xlu0 %1105 }
 0x3d2   :  { %v1109_v0 = vpop.permute.xlu0 %1108 }
 0x3d3   :  { %v3661_v45 = vpop.eup %3660 }
 0x3d4   :  { %v1025_v49 = vmul.f32 %v3661_v45, %v644_v14 }
 0x3d6   :  { %v1030_v28 = vrot.slane %v1025_v49, %v4263_v8  ;;  %v1112_v39 = vpop.permute.xlu0 %1111 }
 0x3d8   :  { %1034 = vrot.lane.b32.xlu0 %v1030_v28, %s3898_s20  ;;  %1031 = vrot.lane.b32.xlu1 %v1030_v28, %s3904_s18 }
 0x3da   :  { %v1115_v51 = vpop.permute.xlu0 %1114 }
 0x3dc   :  { %1037 = vrot.lane.b32.xlu1 %v1030_v28, %s3923_s12  ;;  %1126 = vrot.lane.b32.xlu0 %v4377_v16, %s3916_s16 }
 0x3de   :  { %v1118_v42 = vpop.permute.xlu0 %1117 }
 0x3e0   :  { %1040 = vrot.lane.b32.xlu1 %v1030_v28, %s3921_s23  ;;  %1129 = vrot.lane.b32.xlu0 %v4377_v16, %s3913_s1 }
 0x3e2   :  { %v1121_v50 = vpop.permute.xlu0 %1120 }
 0x3e4   :  { %1043 = vrot.lane.b32.xlu1 %v1030_v28, %s3922_s0  ;;  %1132 = vrot.lane.b32.xlu0 %v4377_v16, %s3911_s8 }
 0x3e6   :  { %v4430_v58 = vpop.permute.xlu0 %1123 }
 0x3e8   :  { %1046 = vrot.lane.b32.xlu1 %v1030_v28, %s3919_s21  ;;  %1138 = vrot.lane.b32.xlu0 %v4377_v16, %s3912_s13 }
 0x3ec   :  { %1049 = vrot.lane.b32.xlu1 %v1030_v28, %s3920_s22 }
 0x3f0   :  { %1052 = vrot.lane.b32.xlu1 %v1030_v28, %s3917_s17 }
 0x3f4   :  { %1055 = vrot.lane.b32.xlu1 %v1030_v28, %s3918_s5 }
 0x3f8   :  { %1058 = vrot.lane.b32.xlu1 %v1030_v28, %s3915_s15 }
 0x3fc   :  { %1061 = vrot.lane.b32.xlu1 %v1030_v28, %s3916_s16 }
 0x400   :  { %1064 = vrot.lane.b32.xlu1 %v1030_v28, %s3913_s1 }
 0x404   :  { %1067 = vrot.lane.b32.xlu1 %v1030_v28, %s3911_s8 }
 0x408   :  { %1070 = vrot.lane.b32.xlu1 %v1030_v28, %s3914_s10 }
 0x40c   :  { %1073 = vrot.lane.b32.xlu1 %v1030_v28, %s3912_s13  ;;  %v1568_v28 = vld [vmem:[#allocation10 + $0x48] sm:$0xff] }
 0x410   :  { %1135 = vrot.lane.b32.xlu1 %v4377_v16, %s3914_s10  ;;  %v1141_v16 = vsel %vm826_vm7, %v4371_v15, %v1097_v29  ;;  %v1570_v29 = vld [vmem:[#allocation10 + $0x58] sm:$0xff] }
 0x411   :  { %v1142_v46 = vsel %vm828_vm8, %v1141_v16, %v1100_v53  ;;  %v1567_v53 = vld [vmem:[#allocation10 + $0x40] sm:$0xff]  ;;  %v3245_v31 = vpack.c.bf16 %v1570_v29, %v1568_v28  ;;  %v1585_v28 = vld [vmem:[#allocation10 + $0xd0] sm:$0xff]  ;;  %v1588_v29 = vld [vmem:[#allocation10 + $0xe8] sm:$0xff] }
 0x412   :  { %v1143_v56 = vsel %vm830_vm9, %v1142_v46, %v1103_v32  ;;  %v3247_v34 = vpack.c.bf16 %v1569_v33, %v1567_v53  ;;  %v1590_v53 = vld [vmem:[#allocation10 + $0xf8] sm:$0xff] }
 0x413   :  { %v1144_v55 = vsel %vm832_vm10, %v1143_v56, %v1106_v35  ;;  %v3249_v35 = vpack.c.bf16 %v1574_v59, %v1572_v2  ;;  %3246 = vmatprep.subr.bf16.mxu1 %v3245_v31  ;;  %v3265_v59 = vpack.c.bf16 %v1590_v53, %v1588_v29 }
 0x414   :  { %v1145_v60 = vsel %vm834_vm11, %v1144_v55, %v1109_v0  ;;  %v1571_v0 = vld [vmem:[#allocation10 + $0x60] sm:$0xff]  ;;  %3248 = vmatpush1.bf16.msra.mxu1 %v3247_v34 }
 0x415   :  { %v1146_v63 = vsel %vm836_vm12, %v1145_v60, %v1112_v39  ;;  %v1573_v39 = vld [vmem:[#allocation10 + $0x70] sm:$0xff]  ;;  %3250 = vmatprep.subr.bf16.mxu1 %v3249_v35  ;;  %v1575_v55 = vld [vmem:[#allocation10 + $0x80] sm:$0xff] }
 0x416   :  { %v1147_v3 = vsel %vm838_vm13, %v1146_v63, %v1115_v51  ;;  %v3251_v46 = vpack.c.bf16 %v1573_v39, %v1571_v0  ;;  %v1582_v63 = vld [vmem:[#allocation10 + $0xb8] sm:$0xff]  ;;  %v1587_v34 = vld [vmem:[#allocation10 + $0xe0] sm:$0xff]  ;;  %v1589_v35 = vld [vmem:[#allocation10 + $0xf0] sm:$0xff] }
 0x417   :  { %v1148_v12 = vsel %vm840_vm14, %v1147_v3, %v1118_v42  ;;  %v1635_v3 = vld [vmem:[#allocation10 + $0x1a8] sm:$0xff] }
 0x418   :  { %v4444_v14 = vsel %vm5314_vm6, %v1148_v12, %v1121_v50  ;;  %v1576_v50 = vld [vmem:[#allocation10 + $0x88] sm:$0xff]  ;;  %3252 = vmatpush1.bf16.msra.mxu1 %v3251_v46  ;;  %v1586_v12 = vld [vmem:[#allocation10 + $0xd8] sm:$0xff] }
 0x419   :  { %v4456_v51 = vrot.slane %v4444_v14, %v4263_v8  ;;  %v1150_v0 = vsel %vm659_vm5, %v4444_v14, %v4430_v58  ;;  %v1639_v58 = vld [vmem:[#allocation10 + $0x1c8] sm:$0xff]  ;;  %v1641_v14 = vld [vmem:[#allocation10 + $0x1d8] sm:$0xff] }
 0x44a   :  { %v1032_v40 = vpop.permute.xlu1 %1031  ;;  %v1035_v62 = vpop.permute.xlu0 %1034 }
 0x44b   :  { %v1076_v15 = vsel %vm826_vm7, %v1025_v49, %v1032_v40  ;;  %vm5315_vm7 = vmmov %vm5314_vm6 }
 0x44c   :  { %v1077_v4 = vsel %vm828_vm8, %v1076_v15, %v1035_v62 }
 0x44e   :  { %v1038_v44 = vpop.permute.xlu1 %1037 }
 0x44f   :  { %v1078_v6 = vsel %vm830_vm9, %v1077_v4, %v1038_v44  ;;  %v1637_v4 = vld [vmem:[#allocation10 + $0x1b8] sm:$0xff]  ;;  %vm5316_vm9 = vmmov %vm5314_vm6 }
 0x450   :  { %v3185_v17 = vpack.c.bf16 %v1637_v4, %v1635_v3  ;;  %v1640_v3 = vld [vmem:[#allocation10 + $0x1d0] sm:$0xff] }
 0x452   :  { %v1041_v52 = vpop.permute.xlu1 %1040  ;;  %3186 = vmatprep.subr.bf16.mxu0 %v3185_v17  ;;  %v1643_v17 = vld [vmem:[#allocation10 + $0x1e8] sm:$0xff] }
 0x453   :  { %v1079_v5 = vsel %vm832_vm10, %v1078_v6, %v1041_v52  ;;  %v1578_v52 = vld [vmem:[#allocation10 + $0x98] sm:$0xff]  ;;  %v1581_v6 = vld [vmem:[#allocation10 + $0xb0] sm:$0xff] }
 0x454   :  { %v3253_v60 = vpack.c.bf16 %v1578_v52, %v1576_v50 }
 0x456   :  { %v1044_v54 = vpop.permute.xlu1 %1043  ;;  %3254 = vmatprep.subr.bf16.mxu1 %v3253_v60 }
 0x457   :  { %v1080_v13 = vsel %vm834_vm11, %v1079_v5, %v1044_v54  ;;  %v1634_v5 = vld [vmem:[#allocation10 + $0x1a0] sm:$0xff]  ;;  %vm5317_vm11 = vmmov %vm5314_vm6 }
 0x45a   :  { %v1047_v61 = vpop.permute.xlu1 %1046 }
 0x45b   :  { %v1081_v37 = vsel %vm836_vm12, %v1080_v13, %v1047_v61  ;;  %v1580_v61 = vld [vmem:[#allocation10 + $0xa8] sm:$0xff]  ;;  %v1127_v13 = vpop.permute.xlu0 %1126 }
 0x45c   :  { %v3257_v10 = vpack.c.bf16 %v1582_v63, %v1580_v61  ;;  %v1151_v46 = vsel %vm845_vm1, %v1150_v0, %v1127_v13  ;;  %v3189_v63 = vpack.c.bf16 %v1641_v14, %v1639_v58  ;;  %v1599_v58 = vld [vmem:[#allocation10 + $0x140] sm:$0xff]  ;;  %v1601_v14 = vld [vmem:[#allocation10 + $0x150] sm:$0xff] }
 0x45e   :  { %v1050_v1 = vpop.permute.xlu1 %1049 }
 0x45f   :  { %v1082_v36 = vsel %vm838_vm13, %v1081_v37, %v1050_v1  ;;  %v1579_v1 = vld [vmem:[#allocation10 + $0xa0] sm:$0xff]  ;;  %v1130_v2 = vpop.permute.xlu0 %1129  ;;  %vm1333_vm13 = vcmask 1046528  }
 0x460   :  { %v3259_v43 = vpack.c.bf16 %v1581_v6, %v1579_v1  ;;  %v1638_v1 = vld [vmem:[#allocation10 + $0x1c0] sm:$0xff] }
 0x461   :  { %v3191_v6 = vpack.c.bf16 %v1640_v3, %v1638_v1  ;;  %v1604_v1 = vld [vmem:[#allocation10 + $0x168] sm:$0xff]  ;;  %v3279_v3 = vpack.c.bf16 %v1601_v14, %v1599_v58 }
 0x462   :  { %v1053_v7 = vpop.permute.xlu1 %1052 }
 0x463   :  { %v1083_v45 = vsel %vm840_vm14, %v1082_v36, %v1053_v7  ;;  %v1636_v7 = vld [vmem:[#allocation10 + $0x1b0] sm:$0xff]  ;;  %v1133_v52 = vpop.permute.xlu0 %1132 }
 0x464   :  { %v3187_v36 = vpack.c.bf16 %v1636_v7, %v1634_v5  ;;  %v1591_v5 = vld [vmem:[#allocation10 + $0x100] sm:$0xff]  ;;  %v1593_v7 = vld [vmem:[#allocation10 + $0x110] sm:$0xff] }
 0x466   :  { %v1056_v49 = vpop.permute.xlu1 %1055  ;;  %3188 = vmatpush1.bf16.msra.mxu0 %v3187_v36 }
 0x467   :  { %v4448_v30 = vsel %vm5315_vm7, %v1083_v45, %v1056_v49  ;;  %v3261_v45 = vpack.c.bf16 %v1586_v12, %v1584_v11  ;;  %v1583_v49 = vld [vmem:[#allocation10 + $0xc0] sm:$0xff]  ;;  %3190 = vmatprep.subr.bf16.mxu0 %v3189_v63  ;;  %v3271_v11 = vpack.c.bf16 %v1593_v7, %v1591_v5  ;;  %v1651_v63 = vld [vmem:[#allocation10 + $0x228] sm:$0xff]  ;;  %v1652_v5 = vld [vmem:[#allocation10 + $0x230] sm:$0xff]  ;;  %vm1468_vm7 = vcmask 1044480  }
 0x468   :  { %v4452_v32 = vrot.slane %v4448_v30, %v4263_v8  ;;  %v3263_v33 = vpack.c.bf16 %v1585_v28, %v1583_v49  ;;  %v1642_v49 = vld [vmem:[#allocation10 + $0x1e0] sm:$0xff]  ;;  %v1644_v28 = vld [vmem:[#allocation10 + $0x1f0] sm:$0xff] }
 0x46a   :  { %v1059_v40 = vpop.permute.xlu1 %1058  ;;  %v1167_v42 = vmul.f32 %v4452_v32, %v4275_v19  ;;  %v1165_v16 = vmul.f32 %v4452_v32, %v4272_v18  ;;  %v1169_v44 = vmul.f32 %v4452_v32, %v4303_v25  ;;  %v1577_v19 = vld [vmem:[#allocation10 + $0x90] sm:$0xff]  ;;  %3192 = vmatpush1.bf16.msra.mxu0 %v3191_v6  ;;  %v1650_v6 = vld [vmem:[#allocation10 + $0x220] sm:$0xff]  ;;  %v1177_v14 = vmul.f32 %v4452_v32, %v4340_v57 }
 0x46b   :  { %v3255_v9 = vpack.c.bf16 %v1577_v19, %v1575_v55  ;;  %v1085_v39 = vsel %vm659_vm5, %v4448_v30, %v1059_v40  ;;  %v1592_v30 = vld [vmem:[#allocation10 + $0x108] sm:$0xff]  ;;  %v1152_v40 = vsel %vm847_vm2, %v1151_v46, %v1130_v2  ;;  %v1595_v2 = vld [vmem:[#allocation10 + $0x120] sm:$0xff] }
 0x46c   :  { %v4465_v56 = vadd.f32 %v4456_v51, %v1167_v42  ;;  %v4468_v54 = vadd.f32 %v4456_v51, %v1165_v16  ;;  %v4473_v15 = vadd.f32 %v4456_v51, %v1169_v44  ;;  %v3267_v16 = vpack.c.bf16 %v1589_v35, %v1587_v34 }
 0x46d   :  { %3256 = vmatpush1.bf16.msra.mxu1 %v3255_v9  ;;  %v1153_v12 = vsel %vm849_vm3, %v1152_v40, %v1133_v52  ;;  %v1600_v52 = vld [vmem:[#allocation10 + $0x148] sm:$0xff] }
 0x46e   :  { %v1062_v18 = vpop.permute.xlu1 %1061  ;;  %v1203_v62 = vmax.f32 %v4465_v56, 0.0  ;;  %v1201_v25 = vmax.f32 %v4468_v54, 0.0  ;;  %v1205_v37 = vmax.f32 %v4473_v15, 0.0  ;;  %3258 = vmatprep.subr.bf16.mxu1 %v3257_v10  ;;  %v1139_v10 = vpop.permute.xlu0 %1138 }
 0x46f   :  { %v1086_v44 = vsel %vm845_vm1, %v1085_v39, %v1062_v18  ;;  %v1594_v18 = vld [vmem:[#allocation10 + $0x118] sm:$0xff]  ;;  %vm1459_vm1 = vcmask 1040384  }
 0x470   :  { %1234 = vrot.lane.b32.xlu0 %v1203_v62, %s3912_s13  ;;  %1230 = vrot.lane.b32.xlu1 %v1201_v25, %s3912_s13  ;;  %v3269_v4 = vpack.c.bf16 %v1594_v18, %v1592_v30  ;;  %v1653_v18 = vld [vmem:[#allocation10 + $0x238] sm:$0xff] }
 0x471   :  { %3260 = vmatpush1.bf16.msra.mxu1 %v3259_v43  ;;  %v1596_v43 = vld [vmem:[#allocation10 + $0x128] sm:$0xff] }
 0x472   :  { %v1065_v24 = vpop.permute.xlu1 %1064  ;;  %3262 = vmatprep.subr.bf16.mxu1 %v3261_v45  ;;  %v1598_v45 = vld [vmem:[#allocation10 + $0x138] sm:$0xff] }
 0x473   :  { %v1087_v50 = vsel %vm847_vm2, %v1086_v44, %v1065_v24  ;;  %v1645_v24 = vld [vmem:[#allocation10 + $0x1f8] sm:$0xff] }
 0x474   :  { %1238 = vrot.lane.b32.xlu0 %v1205_v37, %s3912_s13  ;;  %v3193_v53 = vpack.c.bf16 %v1645_v24, %v1643_v17  ;;  %v1605_v17 = vld [vmem:[#allocation10 + $0x170] sm:$0xff] }
 0x475   :  { %3264 = vmatpush1.bf16.msra.mxu1 %v3263_v33  ;;  %v3195_v33 = vpack.c.bf16 %v1644_v28, %v1642_v49  ;;  %v1655_v49 = vld [vmem:[#allocation10 + $0x248] sm:$0xff]  ;;  %v1657_v28 = vld [vmem:[#allocation10 + $0x258] sm:$0xff] }
 0x476   :  { %v1068_v31 = vpop.permute.xlu1 %1067  ;;  %3266 = vmatprep.subr.bf16.mxu1 %v3265_v59  ;;  %v1597_v59 = vld [vmem:[#allocation10 + $0x130] sm:$0xff]  ;;  %3194 = vmatprep.subr.bf16.mxu0 %v3193_v53  ;;  %v3205_v53 = vpack.c.bf16 %v1657_v28, %v1655_v49 }
 0x477   :  { %v1088_v55 = vsel %vm849_vm3, %v1087_v50, %v1068_v31  ;;  %v3273_v31 = vpack.c.bf16 %v1598_v45, %v1596_v43  ;;  %v3275_v39 = vpack.c.bf16 %v1597_v59, %v1595_v2  ;;  %3196 = vmatpush1.bf16.msra.mxu0 %v3195_v33  ;;  %v1654_v33 = vld [vmem:[#allocation10 + $0x240] sm:$0xff]  ;;  %v1656_v2 = vld [vmem:[#allocation10 + $0x250] sm:$0xff]  ;;  %vm5318_vm3 = vmmov %vm5314_vm6  ;;  %vm1378_vm6 = vcmask 1042432  }
 0x479   :  { %3268 = vmatpush1.bf16.msra.mxu1 %v3267_v16  ;;  %v1649_v16 = vld [vmem:[#allocation10 + $0x218] sm:$0xff] }
 0x47a   :  { %v1071_v42 = vpop.permute.xlu1 %1070  ;;  %3270 = vmatprep.subr.bf16.mxu1 %v3269_v4  ;;  %v1606_v4 = vld [vmem:[#allocation10 + $0x178] sm:$0xff] }
 0x47b   :  { %v1089_v60 = vsel %vm851_vm4, %v1088_v55, %v1071_v42  ;;  %v1647_v42 = vld [vmem:[#allocation10 + $0x208] sm:$0xff]  ;;  %v1602_v55 = vld [vmem:[#allocation10 + $0x158] sm:$0xff] }
 0x47d   :  { %3272 = vmatpush1.bf16.msra.mxu1 %v3271_v11  ;;  %v3201_v11 = vpack.c.bf16 %v1653_v18, %v1651_v63 }
 0x47e   :  { %v1074_v19 = vpop.permute.xlu1 %1073  ;;  %3274 = vmatprep.subr.bf16.mxu1 %v3273_v31  ;;  %v1610_v31 = vld [vmem:[#allocation10 + $0x198] sm:$0xff] }
 0x47f   :  { %v1090_v61 = vsel %vm853_vm15, %v1089_v60, %v1074_v19  ;;  %v1646_v60 = vld [vmem:[#allocation10 + $0x200] sm:$0xff]  ;;  %v1648_v19 = vld [vmem:[#allocation10 + $0x210] sm:$0xff] }
 0x480   :  { %v4498_v9 = vrot.slane %v1090_v61, %v4263_v8 }
 0x481   :  { %3276 = vmatpush1.bf16.msra.mxu1 %v3275_v39  ;;  %v1607_v39 = vld [vmem:[#allocation10 + $0x180] sm:$0xff] }
 0x482   :  { %v1136_v13 = vpop.permute.xlu1 %1135  ;;  %v1166_v35 = vmul.f32 %v4498_v9, %v4281_v21  ;;  %v1164_v0 = vmul.f32 %v4498_v9, %v4278_v20  ;;  %v1168_v50 = vmul.f32 %v4498_v9, %v4284_v22  ;;  %v1173_v21 = vmul.f32 %v4452_v32, %v4327_v38 }
 0x483   :  { %v1154_v36 = vsel %vm851_vm4, %v1153_v12, %v1136_v13  ;;  %v3197_v20 = vpack.c.bf16 %v1649_v16, %v1647_v42  ;;  %v3277_v22 = vpack.c.bf16 %v1602_v55, %v1600_v52  ;;  %v3199_v38 = vpack.c.bf16 %v1648_v19, %v1646_v60  ;;  %v1603_v13 = vld [vmem:[#allocation10 + $0x160] sm:$0xff]  ;;  %v1609_v42 = vld [vmem:[#allocation10 + $0x190] sm:$0xff]  ;;  %v1661_v52 = vld [vmem:[#allocation10 + $0x278] sm:$0xff] }
 0x484   :  { %v1155_v29 = vsel %vm853_vm15, %v1154_v36, %v1139_v10  ;;  %v4526_v7 = vadd.f32 %v4456_v51, %v1173_v21  ;;  %v1171_v10 = vmul.f32 %v4452_v32, %v4318_v47  ;;  %v3281_v12 = vpack.c.bf16 %v1606_v4, %v1604_v1  ;;  %v1888_v55 = vld [vmem:[#allocation10 + $0x348] sm:$0xff]  ;;  %v1890_v21 = vld [vmem:[#allocation10 + $0x358] sm:$0xff]  ;;  %v1660_v19 = vld [vmem:[#allocation10 + $0x270] sm:$0xff] }
 0x485   :  { %v4504_v34 = vrot.slane %v1155_v29, %v4263_v8  ;;  %3198 = vmatprep.subr.bf16.mxu0 %v3197_v20  ;;  %3278 = vmatprep.subr.bf16.mxu1 %v3277_v22  ;;  %v3203_v36 = vpack.c.bf16 %v1652_v5, %v1650_v6  ;;  %v3283_v45 = vpack.c.bf16 %v1605_v17, %v1603_v13  ;;  %v1608_v29 = vld [vmem:[#allocation10 + $0x188] sm:$0xff]  ;;  %v1658_v20 = vld [vmem:[#allocation10 + $0x260] sm:$0xff]  ;;  %v1664_v5 = vld [vmem:[#allocation10 + $0x290] sm:$0xff] }
 0x486   :  { %3200 = vmatpush1.bf16.msra.mxu0 %v3199_v38  ;;  %3280 = vmatpush1.bf16.msra.mxu1 %v3279_v3  ;;  %v1170_v47 = vmul.f32 %v4498_v9, %v4287_v23  ;;  %v4540_v59 = vadd.f32 %v4456_v51, %v1171_v10  ;;  %v1209_v16 = vmax.f32 %v4526_v7, 0.0  ;;  %v3207_v23 = vpack.c.bf16 %v1656_v2, %v1654_v33  ;;  %v1663_v38 = vld [vmem:[#allocation10 + $0x288] sm:$0xff]  ;;  %v1665_v3 = vld [vmem:[#allocation10 + $0x298] sm:$0xff]  ;;  %v1662_v6 = vld [vmem:[#allocation10 + $0x280] sm:$0xff] }
 0x487   :  { %v1188_v44 = vadd.f32 %v4504_v34, %v1166_v35  ;;  %v1186_v46 = vadd.f32 %v4504_v34, %v1164_v0  ;;  %v1190_v61 = vadd.f32 %v4504_v34, %v1168_v50  ;;  %3202 = vmatprep.subr.bf16.mxu0 %v3201_v11  ;;  %3282 = vmatprep.subr.bf16.mxu1 %v3281_v12  ;;  %v1659_v50 = vld [vmem:[#allocation10 + $0x268] sm:$0xff]  ;;  %v1672_v33 = vld [vmem:[#allocation10 + $0x2d0] sm:$0xff] }
 0x488   :  { %v1175_v35 = vmul.f32 %v4452_v32, %v4334_v48  ;;  %v3285_v0 = vpack.c.bf16 %v1610_v31, %v1608_v29  ;;  %v1174_v48 = vmul.f32 %v4498_v9, %v4309_v27  ;;  %v3209_v60 = vpack.c.bf16 %v1661_v52, %v1659_v50  ;;  %v1673_v29 = vld [vmem:[#allocation10 + $0x2d8] sm:$0xff]  ;;  %v1670_v31 = vld [vmem:[#allocation10 + $0x2c0] sm:$0xff] }
 0x489   :  { %v4516_v30 = vmax.f32 %v1188_v44, 0.0  ;;  %v4518_v40 = vmax.f32 %v1186_v46, 0.0  ;;  %v4530_v24 = vmax.f32 %v1190_v61, 0.0  ;;  %v1192_v44 = vadd.f32 %v4504_v34, %v1170_v47  ;;  %v1681_v50 = vld [vmem:[#allocation10 + $0x318] sm:$0xff] }
 0x48a   :  { %3204 = vmatpush1.bf16.msra.mxu0 %v3203_v36  ;;  %3284 = vmatpush1.bf16.msra.mxu1 %v3283_v45  ;;  %v3287_v46 = vpack.c.bf16 %v1609_v42, %v1607_v39  ;;  %v4554_v58 = vadd.f32 %v4456_v51, %v1175_v35  ;;  %v3289_v61 = vpack.c.bf16 %v1890_v21, %v1888_v55  ;;  %v1207_v63 = vmax.f32 %v4540_v59, 0.0  ;;  %v1675_v35 = vld [vmem:[#allocation10 + $0x2e8] sm:$0xff]  ;;  %v1674_v42 = vld [vmem:[#allocation10 + $0x2e0] sm:$0xff] }
 0x48b   :  { %1279 = vrot.lane.b32.xlu0 %v4516_v30, %s3918_s5  ;;  %1277 = vrot.lane.b32.xlu1 %v4518_v40, %s3918_s5  ;;  %v3635_v43 = vpack.i.bf16 %v4516_v30, %v4518_v40  ;;  %v4558_v22 = vmax.f32 %v1192_v44, 0.0  ;;  %v1196_v18 = vadd.f32 %v4504_v34, %v1174_v48  ;;  %v3211_v27 = vpack.c.bf16 %v1660_v19, %v1658_v20  ;;  %v1676_v44 = vld [vmem:[#allocation10 + $0x2f0] sm:$0xff]  ;;  %v1678_v55 = vld [vmem:[#allocation10 + $0x300] sm:$0xff]  ;;  %v1683_v21 = vld [vmem:[#allocation10 + $0x328] sm:$0xff] }
 0x48c   :  { %3206 = vmatprep.subr.bf16.mxu0 %v3205_v53  ;;  %3286 = vmatprep.subr.bf16.mxu1 %v3285_v0  ;;  %v1211_v32 = vmax.f32 %v4554_v58, 0.0  ;;  %v4571_v1 = vadd.f32 %v4456_v51, %v1177_v14  ;;  %v3213_v4 = vpack.c.bf16 %v1665_v3, %v1663_v38  ;;  %v1176_v10 = vmul.f32 %v4498_v9, %v4306_v26  ;;  %v1667_v26 = vld [vmem:[#allocation10 + $0x2a8] sm:$0xff]  ;;  %v1677_v0 = vld [vmem:[#allocation10 + $0x2f8] sm:$0xff]  ;;  %v1680_v48 = vld [vmem:[#allocation10 + $0x310] sm:$0xff] }
 0x48d   :  { %v4567_v57 = vmax.f32 %v1196_v18, 0.0  ;;  %v1172_v51 = vmul.f32 %v4498_v9, %v4298_v41  ;;  %v3215_v11 = vpack.c.bf16 %v1664_v5, %v1662_v6  ;;  %v1666_v41 = vld [vmem:[#allocation10 + $0x2a0] sm:$0xff]  ;;  %v1668_v9 = vld [vmem:[#allocation10 + $0x2b0] sm:$0xff]  ;;  %v3223_v2 = vpack.c.bf16 %v1672_v33, %v1670_v31  ;;  %v1685_v20 = vld [vmem:[#allocation10 + $0x338] sm:$0xff] }
 0x48e   :  { %3208 = vmatpush1.bf16.msra.mxu0 %v3207_v23  ;;  %3288 = vmatpush1.bf16.msra.mxu1 %v3287_v46  ;;  %v1213_v12 = vmax.f32 %v4571_v1, 0.0  ;;  %v1198_v13 = vadd.f32 %v4504_v34, %v1176_v10  ;;  %v3219_v28 = vpack.c.bf16 %v1668_v9, %v1666_v41  ;;  %v3225_v39 = vpack.c.bf16 %v1677_v0, %v1675_v35  ;;  %v1679_v46 = vld [vmem:[#allocation10 + $0x308] sm:$0xff]  ;;  %v1682_v14 = vld [vmem:[#allocation10 + $0x320] sm:$0xff]  ;;  %v4798_v1 = vld [vmem:[#allocation10 + $0x458] sm:$0xff] }
 0x48f   :  { %1236 = vrot.lane.b32.xlu0 %v4530_v24, %s3912_s13  ;;  %3636 = vrot.lane.b32.xlu1 %v3635_v43, %s3912_s13  ;;  %v1194_v17 = vadd.f32 %v4504_v34, %v1172_v51  ;;  %v1669_v43 = vld [vmem:[#allocation10 + $0x2b8] sm:$0xff]  ;;  %v1671_v34 = vld [vmem:[#allocation10 + $0x2c8] sm:$0xff]  ;;  %v3227_v23 = vpack.c.bf16 %v1676_v44, %v1674_v42  ;;  %v3229_v52 = vpack.c.bf16 %v1681_v50, %v1679_v46  ;;  %v4642_v44 = vld [vmem:[#allocation10 + $0x360] sm:$0xff] }
 0x490   :  { %3210 = vmatprep.subr.bf16.mxu0 %v3209_v60  ;;  %3290 = vmatprep.subr.bf16.mxu1 %v3289_v61  ;;  %v3217_v36 = vpack.c.bf16 %v1669_v43, %v1667_v26  ;;  %v4590_v45 = vmax.f32 %v1198_v13, 0.0  ;;  %v3221_v53 = vpack.c.bf16 %v1673_v29, %v1671_v34  ;;  %v3231_v60 = vpack.c.bf16 %v1680_v48, %v1678_v55  ;;  %v1684_v61 = vld [vmem:[#allocation10 + $0x330] sm:$0xff]  ;;  %v4652_v48 = vld [vmem:[#allocation10 + $0x388] sm:$0xff] }
 0x491   :  { %v4592_v49 = vmax.f32 %v1194_v17, 0.0  ;;  %v3233_v19 = vpack.c.bf16 %v1685_v20, %v1683_v21  ;;  %v3235_v18 = vpack.c.bf16 %v1684_v61, %v1682_v14  ;;  %v4663_v61 = vld [vmem:[#allocation10 + $0x380] sm:$0xff]  ;;  %v4688_v59 = vld [vmem:[#allocation10 + $0x3c8] sm:$0xff] }
 0x492   :  { %3212 = vmatpush1.bf16.msra.mxu0 %v3211_v27 }
 0x493   :  { %1246 = vrot.lane.b32.xlu0 %v1209_v16, %s3912_s13  ;;  %1281 = vrot.lane.b32.xlu1 %v4530_v24, %s3918_s5  ;;  %v3640_v47 = vpack.i.bf16 %v4592_v49, %v4558_v22 }
 0x494   :  { %3214 = vmatprep.subr.bf16.mxu0 %v3213_v4 }
 0x496   :  { %3216 = vmatpush1.bf16.msra.mxu0 %v3215_v11 }
 0x497   :  { %1283 = vrot.lane.b32.xlu0 %v4558_v22, %s3918_s5  ;;  %1242 = vrot.lane.b32.xlu1 %v1207_v63, %s3912_s13 }
 0x498   :  { %3218 = vmatprep.subr.bf16.mxu0 %v3217_v36 }
 0x49a   :  { %3220 = vmatpush1.bf16.msra.mxu0 %v3219_v28 }
 0x49b   :  { %1287 = vrot.lane.b32.xlu0 %v4567_v57, %s3918_s5  ;;  %1250 = vrot.lane.b32.xlu1 %v1211_v32, %s3912_s13 }
 0x49c   :  { %3222 = vmatprep.subr.bf16.mxu0 %v3221_v53 }
 0x49e   :  { %3224 = vmatpush1.bf16.msra.mxu0 %v3223_v2  ;;  %v4630_v2 = vld [vmem:[#allocation10 + $0x340] sm:$0xff] }
 0x49f   :  { %1248 = vrot.lane.b32.xlu0 %v4567_v57, %s3912_s13  ;;  %1254 = vrot.lane.b32.xlu1 %v1213_v12, %s3912_s13 }
 0x4a0   :  { %3226 = vmatprep.subr.bf16.mxu0 %v3225_v39  ;;  %v4639_v39 = vld [vmem:[#allocation10 + $0x378] sm:$0xff] }
 0x4a2   :  { %3228 = vmatpush1.bf16.msra.mxu0 %v3227_v23  ;;  %v4644_v23 = vld [vmem:[#allocation10 + $0x370] sm:$0xff] }
 0x4a3   :  { %1289 = vrot.lane.b32.xlu0 %v4590_v45, %s3918_s5  ;;  %1285 = vrot.lane.b32.xlu1 %v4592_v49, %s3918_s5 }
 0x4a4   :  { %3230 = vmatprep.subr.bf16.mxu0 %v3229_v52 }
 0x4a6   :  { %3232 = vmatpush1.bf16.msra.mxu0 %v3231_v60  ;;  %v4654_v60 = vld [vmem:[#allocation10 + $0x398] sm:$0xff] }
 0x4a7   :  { %3641 = vrot.lane.b32.xlu1 %v3640_v47, %s3912_s13  ;;  %3234 = vmatprep.subr.bf16.mxu0 %v3233_v19 }
 0x4aa   :  { %3236 = vmatpush1.bf16.msra.mxu0 %v3235_v18  ;;  %v4665_v18 = vld [vmem:[#allocation10 + $0x390] sm:$0xff] }
 0x4ab   :  { %1252 = vrot.lane.b32.xlu1 %v4590_v45, %s3912_s13 }
 0x4e2   :  { %v1235_v27 = vpop.permute.xlu0 %1234  ;;  %v1231_v38 = vpop.permute.xlu1 %1230 }
 0x4e6   :  { %v1239_v3 = vpop.permute.xlu0 %1238 }
 0x4fd   :  { %v1280_v4 = vpop.permute.xlu0 %1279  ;;  %v1278_v6 = vpop.permute.xlu1 %1277 }
 0x4fe   :  { %v1299_v5 = vsel %vm5316_vm9, %v1235_v27, %v1280_v4  ;;  %v1298_v10 = vsel %vm5317_vm11, %v1231_v38, %v1278_v6  ;;  %vm1471_vm9 = vcmask 1045504   ;;  %vm5319_vm11 = vmmov %vm5318_vm3  ;;  %v4677_v6 = vld [vmem:[#allocation10 + $0x3a8] sm:$0xff] }
 0x4ff   :  { %v1308_v51 = vmax.f32 %v1203_v62, %v1299_v5  ;;  %v4609_v11 = vmax.f32 %v1201_v25, %v1298_v10  ;;  %v4679_v5 = vld [vmem:[#allocation10 + $0x3b8] sm:$0xff]  ;;  %v4681_v10 = vld [vmem:[#allocation10 + $0x3a0] sm:$0xff] }
 0x501   :  { %v1338_v13 = vrot.slane %v1308_v51, 1  ;;  %v1337_v17 = vrot.slane %v4609_v11, 1  ;;  %v1237_v26 = vpop.permute.xlu0 %1236  ;;  %v3637_v43 = vpop.permute.xlu1 %3636 }
 0x502   :  { %v1258_v36 = vsel %vm853_vm15, %v1237_v26, %v1239_v3  ;;  %v3639_v41 = vunpack.i.h.bf16 %v3637_v43  ;;  %v3638_v9 = vunpack.i.l.bf16 %v3637_v43 }
 0x503   :  { %v1339_v28 = vsel %vm1333_vm13, %v1337_v17, %v1338_v13  ;;  %v4620_v62 = vmax.f32 %v4530_v24, %v1258_v36  ;;  %v4686_v36 = vld [vmem:[#allocation10 + $0x3b0] sm:$0xff] }
 0x504   :  { %v4615_v34 = vmax.f32 %v4609_v11, %v1339_v28  ;;  %v1257_v56 = vsel %vm853_vm15, %v3639_v41, %v1235_v27  ;;  %v1256_v54 = vsel %vm853_vm15, %v3638_v9, %v1231_v38 }
 0x505   :  { %v1307_v25 = vmax.f32 %v4516_v30, %v1257_v56  ;;  %v4624_v29 = vmax.f32 %v4518_v40, %v1256_v54  ;;  %v4626_v47 = vpop.permute.xlu0 %1246  ;;  %v1282_v53 = vpop.permute.xlu1 %1281  ;;  %v4635_v30 = vld [vmem:[#allocation10 + $0x350] sm:$0xff]  ;;  %v4637_v40 = vld [vmem:[#allocation10 + $0x368] sm:$0xff]  ;;  %v5310_v15 = vrot.slane %v4620_v62, 1 }
 0x506   :  { %v1398_v31 = vrot.slane %v4615_v34, 1  ;;  %v1300_v33 = vsel %vm5318_vm3, %v1239_v3, %v1282_v53  ;;  %v1402_v42 = vrot.slane %v4615_v34, 2  ;;  %vm5320_vm3 = vcmask 1041408   ;;  %v4696_v53 = vld [vmem:[#allocation10 + $0x3c0] sm:$0xff] }
 0x507   :  { %v1335_v35 = vrot.slane %v1307_v25, 1  ;;  %v1334_v0 = vrot.slane %v4624_v29, 1  ;;  %v1310_v24 = vmax.f32 %v1205_v37, %v1300_v33  ;;  %v1406_v41 = vrot.slane %v4615_v34, 3 }
 0x508   :  { %v1461_v46 = vsel %vm1459_vm1, %v4615_v34, %v1398_v31  ;;  %v4698_v31 = vld [vmem:[#allocation10 + $0x3d0] sm:$0xff] }
 0x509   :  { %v1336_v37 = vsel %vm1333_vm13, %v1334_v0, %v1335_v35  ;;  %v1342_v50 = vrot.slane %v1310_v24, 1  ;;  %v1284_v52 = vpop.permute.xlu0 %1283  ;;  %v4650_v55 = vpop.permute.xlu1 %1242  ;;  %v1341_v27 = vsel %vm1333_vm13, %v1335_v35, %v5310_v15  ;;  %v1463_v43 = vsel %vm5320_vm3, %v1461_v46, %v1402_v42 }
 0x50a   :  { %v1381_v21 = vmax.f32 %v4624_v29, %v1336_v37  ;;  %v1301_v20 = vsel %vm5319_vm11, %v4650_v55, %v1284_v52  ;;  %v1383_v33 = vmax.f32 %v1307_v25, %v1341_v27  ;;  %v1465_v46 = vsel %vm1378_vm6, %v1463_v43, %v1406_v41  ;;  %v4712_v25 = vld [vmem:[#allocation10 + $0x3f8] sm:$0xff]  ;;  %vm5321_vm11 = vmmov %vm5320_vm3 }
 0x50b   :  { %v1343_v38 = vsel %vm1333_vm13, %v1338_v13, %v1342_v50  ;;  %v4673_v3 = vmax.f32 %v1207_v63, %v1301_v20  ;;  %v4690_v63 = vld [vmem:[#allocation10 + $0x3d8] sm:$0xff]  ;;  %v4710_v20 = vld [vmem:[#allocation10 + $0x3e8] sm:$0xff]  ;;  %v4724_v13 = vld [vmem:[#allocation10 + $0x3e0] sm:$0xff]  ;;  %vm5322_vm3 = vcmask 588800  }
 0x50c   :  { %v1397_v17 = vrot.slane %v1381_v21, 1  ;;  %v1384_v26 = vmax.f32 %v1308_v51, %v1343_v38  ;;  %v1401_v9 = vrot.slane %v1381_v21, 2  ;;  %v1405_v52 = vrot.slane %v1381_v21, 3 }
 0x50d   :  { %v5311_v28 = vrot.slane %v4673_v3, 1  ;;  %v1288_v56 = vpop.permute.xlu0 %1287  ;;  %v1251_v54 = vpop.permute.xlu1 %1250 }
 0x50e   :  { %v1412_v35 = vrot.slane %v1384_v26, 4  ;;  %v1416_v0 = vrot.slane %v1384_v26, 5  ;;  %v1460_v15 = vsel %vm1459_vm1, %v1381_v21, %v1397_v17  ;;  %v1420_v37 = vrot.slane %v1384_v26, 6 }
 0x50f   :  { %v1347_v34 = vsel %vm1333_vm13, %v1342_v50, %v5311_v28  ;;  %v1462_v51 = vsel %vm5321_vm11, %v1460_v15, %v1401_v9  ;;  %v1411_v17 = vrot.slane %v1383_v33, 4  ;;  %v1415_v28 = vrot.slane %v1383_v33, 5  ;;  %vm5323_vm11 = vmmov %vm5322_vm3 }
 0x510   :  { %v4714_v27 = vmax.f32 %v1310_v24, %v1347_v34  ;;  %v1467_v38 = vsel %vm224_vm0, %v1465_v46, %v1412_v35  ;;  %v4726_v24 = vld [vmem:[#allocation10 + $0x3f0] sm:$0xff]  ;;  %v1303_v35 = vsel %vm5322_vm3, %v1251_v54, %v1288_v56  ;;  %v1424_v34 = vrot.slane %v1384_v26, 7  ;;  %v4740_v56 = vld [vmem:[#allocation10 + $0x408] sm:$0xff]  ;;  %v4744_v46 = vld [vmem:[#allocation10 + $0x400] sm:$0xff] }
 0x511   :  { %v1249_v43 = vpop.permute.xlu0 %1248  ;;  %v4720_v41 = vpop.permute.xlu1 %1254  ;;  %v1470_v42 = vsel %vm1468_vm7, %v1467_v38, %v1416_v0  ;;  %v1464_v21 = vsel %vm1378_vm6, %v1462_v51, %v1405_v52  ;;  %v1419_v9 = vrot.slane %v1383_v33, 6  ;;  %v4742_v38 = vld [vmem:[#allocation10 + $0x418] sm:$0xff]  ;;  %v1316_v51 = vmax.f32 %v1211_v32, %v1303_v35 }
 0x512   :  { %v1430_v50 = vrot.slane %v4714_v27, 1  ;;  %v1473_v4 = vsel %vm1471_vm9, %v1470_v42, %v1420_v37  ;;  %v1466_v0 = vsel %vm224_vm0, %v1464_v21, %v1411_v17  ;;  %v1434_v42 = vrot.slane %v4714_v27, 2  ;;  %v4752_v17 = vld [vmem:[#allocation10 + $0x410] sm:$0xff]  ;;  %v4754_v21 = vld [vmem:[#allocation10 + $0x428] sm:$0xff]  ;;  %v4756_v26 = vld [vmem:[#allocation10 + $0x438] sm:$0xff] }
 0x513   :  { %v4735_v15 = vsel %vm1333_vm13, %v1473_v4, %v1424_v34  ;;  %v1423_v52 = vrot.slane %v1383_v33, 7  ;;  %v1469_v34 = vsel %vm1468_vm7, %v1466_v0, %v1415_v28  ;;  %v1261_v14 = vsel %vm853_vm15, %v1249_v43, %v1251_v54 }
 0x514   :  { %3138 = vmatprep.mubr.msk.f32.mxu1 %vm659_vm5, %v4735_v15  ;;  %v1472_v35 = vsel %vm1471_vm9, %v1469_v34, %v1419_v9  ;;  %v1477_v33 = vsel %vm1459_vm1, %v4714_v27, %v1430_v50  ;;  %v1375_v54 = vrot.slane %v4609_v11, 5  ;;  %v3313_v43 = vpack.c.bf16 %v4742_v38, %v4740_v56 }
 0x515   :  { %v1290_v4 = vpop.permute.xlu0 %1289  ;;  %v1286_v37 = vpop.permute.xlu1 %1285  ;;  %v4771_v19 = vsel %vm1333_vm13, %v1472_v35, %v1423_v52  ;;  %v4782_v7 = vmax.f32 %v4567_v57, %v1261_v14  ;;  %v5324_v11 = vpack.c.bf16 %v4635_v30, %v4630_v2  ;;  %v1438_v52 = vrot.slane %v4714_v27, 3  ;;  %v4794_v14 = vld [vmem:[#allocation10 + $0x430] sm:$0xff]  ;;  %v4796_v35 = vld [vmem:[#allocation10 + $0x448] sm:$0xff] }
 0x516   :  { %v1304_v58 = vsel %vm5323_vm11, %v4720_v41, %v1290_v4  ;;  %v1302_v32 = vsel %vm5322_vm3, %v4626_v47, %v1286_v37  ;;  %1848 = vmatmul.mubr.f32.vlgmr.msra.gmra.mrb[14].mxu1 %v4771_v19  ;;  %v4787_v37 = vld [vmem:[#allocation10 + $0x420] sm:$0xff]  ;;  %vm5325_vm11 = vcmask 1041408   ;;  %v5327_v27 = vrot.slane %v4673_v3, 1 }
 0x517   :  { %v1318_v28 = vmax.f32 %v1213_v12, %v1304_v58  ;;  %v1314_v0 = vmax.f32 %v1209_v16, %v1302_v32  ;;  %v1354_v12 = vrot.slane %v1316_v51, 1  ;;  %3292 = vmatpush1.bf16.msra.mxu1 %v5324_v11  ;;  %v1479_v34 = vsel %vm5325_vm11, %v1477_v33, %v1434_v42  ;;  %vm5332_vm3 = vmmov %vm5325_vm11 }
 0x518   :  { %v5326_v58 = vpack.c.bf16 %v4639_v39, %v4637_v40  ;;  %v5328_v9 = vpack.c.bf16 %v4644_v23, %v4642_v44  ;;  %v5329_v44 = vpack.c.bf16 %v4654_v60, %v4652_v48  ;;  %vm5339_vm11 = vmmov %vm5332_vm3  ;;  %v5341_v38 = vpack.c.bf16 %v4752_v17, %v4744_v46  ;;  %v1919_v17 = vld [vmem:[#allocation10 + $0x440] sm:$0xff] }
 0x519   :  { %v1358_v16 = vrot.slane %v1318_v28, 1  ;;  %v1350_v50 = vrot.slane %v1314_v0, 1  ;;  %v3642_v4 = vpop.permute.xlu1 %3641 }
 0x51a   :  { %3294 = vmatprep.subr.bf16.mxu1 %v5326_v58  ;;  %v3644_v32 = vunpack.i.h.bf16 %v3642_v4  ;;  %v3643_v57 = vunpack.i.l.bf16 %v3642_v4  ;;  %v1352_v58 = vrot.slane %v4782_v7, 1 }
 0x51b   :  { %v1359_v2 = vsel %vm1333_vm13, %v1354_v12, %v1358_v16  ;;  %v1380_v30 = vsel %vm1378_vm6, %v1358_v16, %v1375_v54  ;;  %v1351_v42 = vsel %vm1333_vm13, %v5327_v27, %v1350_v50  ;;  %v1355_v33 = vsel %vm1333_vm13, %v1350_v50, %v1354_v12  ;;  %3296 = vmatpush1.bf16.msra.mxu1 %v5328_v9 }
 0x51c   :  { %v4806_v40 = vmax.f32 %v1316_v51, %v1359_v2  ;;  %v4808_v39 = vmax.f32 %v1318_v28, %v1380_v30  ;;  %v1388_v11 = vmax.f32 %v4673_v3, %v1351_v42  ;;  %v1390_v4 = vmax.f32 %v1314_v0, %v1355_v33  ;;  %3298 = vmatprep.subr.bf16.mxu1 %v5329_v44 }
 0x51d   :  { %v1374_v54 = vrot.slane %v4624_v29, 5  ;;  %v3319_v16 = vpack.c.bf16 %v4794_v14, %v4787_v37  ;;  %v3321_v51 = vpack.c.bf16 %v4798_v1, %v4796_v35  ;;  %v1481_v28 = vsel %vm1378_vm6, %v1479_v34, %v1438_v52  ;;  %v1253_v23 = vpop.permute.xlu1 %1252 }
 0x51e   :  { %v1260_v3 = vsel %vm853_vm15, %v3644_v32, %v4626_v47  ;;  %v1259_v0 = vsel %vm853_vm15, %v3643_v57, %v4650_v55  ;;  %v1616_v29 = vrot.slane %v4735_v15, 1  ;;  %v1507_v9 = vrot.slane %v4806_v40, 4 }
 0x51f   :  { %v1444_v12 = vrot.slane %v1388_v11, 4  ;;  %v1448_v50 = vrot.slane %v1388_v11, 5  ;;  %v1613_v2 = vrot.slane %v4771_v19, 1  ;;  %v1452_v52 = vrot.slane %v1388_v11, 6 }
 0x520   :  { %v1456_v34 = vrot.slane %v1388_v11, 7  ;;  %v1493_v30 = vrot.slane %v1390_v4, 1  ;;  %v1497_v47 = vrot.slane %v1390_v4, 2  ;;  %v1313_v55 = vmax.f32 %v4592_v49, %v1260_v3 }
 0x521   :  { %v1483_v32 = vsel %vm224_vm0, %v1481_v28, %v1444_v12  ;;  %v1311_v48 = vmax.f32 %v4558_v22, %v1259_v0  ;;  %v1262_v60 = vsel %vm853_vm15, %v1253_v23, %v4720_v41  ;;  %v5330_v57 = vpack.c.bf16 %v4665_v18, %v4663_v61  ;;  %vm5338_vm15 = vmmov %vm5332_vm3 }
 0x522   :  { %v1485_v27 = vsel %vm1468_vm7, %v1483_v32, %v1448_v50  ;;  %v1501_v42 = vrot.slane %v1390_v4, 3  ;;  %v1529_v33 = vsel %vm1459_vm1, %v1390_v4, %v1493_v30  ;;  %v1317_v11 = vmax.f32 %v4590_v45, %v1262_v60 }
 0x523   :  { %3300 = vmatpush1.bf16.msra.mxu1 %v5330_v57  ;;  %v5331_v28 = vpack.c.bf16 %v4679_v5, %v4677_v6  ;;  %v1531_v22 = vsel %vm5332_vm3, %v1529_v33, %v1497_v47  ;;  %v1348_v49 = vrot.slane %v1313_v55, 1  ;;  %v1344_v3 = vrot.slane %v1311_v48, 1 }
 0x524   :  { %v1487_v41 = vsel %vm1471_vm9, %v1485_v27, %v1452_v52  ;;  %v1511_v61 = vrot.slane %v4806_v40, 5  ;;  %v1533_v18 = vsel %vm1378_vm6, %v1531_v22, %v1501_v42  ;;  %v1356_v0 = vrot.slane %v1317_v11, 1 }
 0x525   :  { %3302 = vmatprep.subr.bf16.mxu1 %v5331_v28  ;;  %v4850_v44 = vsel %vm1333_vm13, %v1487_v41, %v1456_v34  ;;  %v1535_v45 = vsel %vm224_vm0, %v1533_v18, %v1507_v9  ;;  %v1353_v4 = vsel %vm1333_vm13, %v1348_v49, %v1352_v58  ;;  %v5333_v6 = vrot.slane %v4620_v62, 1 }
 0x526   :  { %v1349_v23 = vsel %vm1333_vm13, %v1344_v3, %v1348_v49  ;;  %v5334_v12 = vpack.c.bf16 %v4686_v36, %v4681_v10  ;;  %v1389_v50 = vmax.f32 %v1313_v55, %v1353_v4  ;;  %v1357_v34 = vsel %vm1333_vm13, %v1352_v58, %v1356_v0 }
 0x527   :  { %v1345_v5 = vsel %vm1333_vm13, %v5333_v6, %v1344_v3  ;;  %v1387_v30 = vmax.f32 %v1311_v48, %v1349_v23  ;;  %v5335_v9 = vpack.c.bf16 %v4690_v63, %v4688_v59  ;;  %v1515_v47 = vrot.slane %v4806_v40, 6 }
 0x528   :  { %3304 = vmatpush1.bf16.msra.mxu1 %v5334_v12  ;;  %v1385_v52 = vmax.f32 %v4620_v62, %v1345_v5  ;;  %v1519_v32 = vrot.slane %v4806_v40, 7  ;;  %v1379_v60 = vsel %vm1378_vm6, %v1356_v0, %v1374_v54  ;;  %v1391_v57 = vmax.f32 %v4782_v7, %v1357_v34 }
 0x529   :  { %3306 = vmatprep.subr.bf16.mxu1 %v5335_v9  ;;  %v1492_v10 = vrot.slane %v1389_v50, 1  ;;  %v1496_v36 = vrot.slane %v1389_v50, 2  ;;  %v1617_v62 = vrot.slane %v4850_v44, 1  ;;  %v1500_v48 = vrot.slane %v1389_v50, 3 }
 0x52a   :  { %v1429_v55 = vrot.slane %v1385_v52, 1  ;;  %v1433_v27 = vrot.slane %v1385_v52, 2  ;;  %v1437_v58 = vrot.slane %v1385_v52, 3  ;;  %v5336_v59 = vpack.c.bf16 %v4698_v31, %v4696_v53 }
 0x52b   :  { %v1537_v63 = vsel %vm1468_vm7, %v1535_v45, %v1511_v61  ;;  %v1528_v40 = vsel %vm1459_vm1, %v1389_v50, %v1492_v10  ;;  %v1443_v42 = vrot.slane %v1387_v30, 4  ;;  %v1447_v54 = vrot.slane %v1387_v30, 5  ;;  %v1921_v10 = vld [vmem:[#allocation10 + $0x450] sm:$0xff] }
 0x52c   :  { %3308 = vmatpush1.bf16.msra.mxu1 %v5336_v59  ;;  %v1476_v7 = vsel %vm1459_vm1, %v1385_v52, %v1429_v55  ;;  %v5337_v33 = vpack.c.bf16 %v4712_v25, %v4710_v20  ;;  %v1530_v28 = vsel %vm5338_vm15, %v1528_v40, %v1496_v36  ;;  %v4882_v49 = vmax.f32 %v1317_v11, %v1379_v60 }
 0x52d   :  { %v1478_v22 = vsel %vm5339_vm11, %v1476_v7, %v1433_v27  ;;  %v1506_v53 = vrot.slane %v1391_v57, 4  ;;  %v1532_v31 = vsel %vm1378_vm6, %v1530_v28, %v1500_v48  ;;  %v1451_v3 = vrot.slane %v1387_v30, 6  ;;  %v1923_v7 = vld [vmem:[#allocation10 + $0x460] sm:$0xff] }
 0x52e   :  { %3310 = vmatprep.subr.bf16.mxu1 %v5337_v33  ;;  %v1455_v41 = vrot.slane %v1387_v30, 7  ;;  %v1480_v61 = vsel %vm1378_vm6, %v1478_v22, %v1437_v58  ;;  %v1510_v0 = vrot.slane %v1391_v57, 5  ;;  %v1514_v45 = vrot.slane %v1391_v57, 6  ;;  %v1925_v33 = vld [vmem:[#allocation10 + $0x470] sm:$0xff] }
 0x52f   :  { %v1482_v18 = vsel %vm224_vm0, %v1480_v61, %v1443_v42  ;;  %v1618_v20 = vsel %vm1333_vm13, %v1616_v29, %v1617_v62  ;;  %v5340_v25 = vpack.c.bf16 %v4726_v24, %v4724_v13  ;;  %v1518_v4 = vrot.slane %v1391_v57, 7 }
 0x530   :  { %v1484_v11 = vsel %vm1468_vm7, %v1482_v18, %v1447_v54  ;;  %3135 = vmatprep.mubr.msk.f32.mxu0 %vm659_vm5, %v1618_v20  ;;  %v1539_v6 = vsel %vm1471_vm9, %v1537_v63, %v1515_v47  ;;  %v4897_v5 = vrot.slane %v4850_v44, 4  ;;  %v1625_v13 = vrot.slane %v4850_v44, 5 }
 0x531   :  { %3312 = vmatpush1.bf16.msra.mxu1 %v5340_v25  ;;  %v1486_v29 = vsel %vm1471_vm9, %v1484_v11, %v1451_v3  ;;  %v4904_v23 = vsel %vm1333_vm13, %v1539_v6, %v1519_v32  ;;  %v1534_v24 = vsel %vm224_vm0, %v1532_v31, %v1506_v53  ;;  %v1525_v56 = vrot.slane %v4808_v39, 1  ;;  %v1934_v6 = vld [vmem:[#allocation10 + $0x4b8] sm:$0xff] }
 0x532   :  { %3314 = vmatprep.subr.bf16.mxu1 %v3313_v43  ;;  %v4909_v12 = vsel %vm1333_vm13, %v1486_v29, %v1455_v41  ;;  %v1552_v50 = vrot.slane %v4904_v23, 4  ;;  %v1626_v52 = vrot.slane %v4904_v23, 5  ;;  %v1536_v30 = vsel %vm1468_vm7, %v1534_v24, %v1510_v0  ;;  %v1927_v0 = vld [vmem:[#allocation10 + $0x480] sm:$0xff] }
 0x533   :  { %v1614_v43 = vrot.slane %v4909_v12, 1  ;;  %v1538_v34 = vsel %vm1471_vm9, %v1536_v30, %v1514_v45  ;;  %v4921_v9 = vrot.slane %v4909_v12, 4  ;;  %v5342_v32 = vpack.c.bf16 %v4756_v26, %v4754_v21  ;;  %v1924_v26 = vld [vmem:[#allocation10 + $0x468] sm:$0xff]  ;;  %v1926_v21 = vld [vmem:[#allocation10 + $0x478] sm:$0xff]  ;;  %v1929_v45 = vld [vmem:[#allocation10 + $0x490] sm:$0xff] }
 0x534   :  { %v1553_v47 = vsel %vm224_vm0, %v4897_v5, %v1552_v50  ;;  %v1627_v60 = vsel %vm1378_vm6, %v1625_v13, %v1626_v52  ;;  %v4930_v57 = vsel %vm1333_vm13, %v1538_v34, %v1518_v4  ;;  %v1622_v46 = vrot.slane %v4909_v12, 5  ;;  %v1932_v4 = vld [vmem:[#allocation10 + $0x4a8] sm:$0xff]  ;;  %v1931_v30 = vld [vmem:[#allocation10 + $0x4a0] sm:$0xff] }
 0x535   :  { %3316 = vmatpush1.bf16.msra.mxu1 %v5341_v38  ;;  %v1558_v36 = vsel %vm1459_vm1, %v4850_v44, %v1553_v47  ;;  %v1615_v55 = vsel %vm1333_vm13, %v1613_v2, %v1614_v43  ;;  %v1549_v48 = vrot.slane %v4930_v57, 4  ;;  %v1632_v27 = vsel %vm1459_vm1, %v1617_v62, %v1627_v60  ;;  %v1936_v47 = vld [vmem:[#allocation10 + $0x4c8] sm:$0xff] }
 0x536   :  { %3318 = vmatprep.subr.bf16.mxu1 %v5342_v32  ;;  %3139 = vmatprep.mubr.msk.f32.mxu1 %vm659_vm5, %v1558_v36  ;;  %v1623_v58 = vrot.slane %v4930_v57, 5  ;;  %v1524_v59 = vrot.slane %v4882_v49, 1  ;;  %v3323_v2 = vpack.c.bf16 %v1921_v10, %v1919_v17  ;;  %v4951_v40 = vsel %vm1459_vm1, %v4808_v39, %v1525_v56  ;;  %v1930_v39 = vld [vmem:[#allocation10 + $0x498] sm:$0xff]  ;;  %v1933_v56 = vld [vmem:[#allocation10 + $0x4b0] sm:$0xff]  ;;  %v1935_v17 = vld [vmem:[#allocation10 + $0x4c0] sm:$0xff] }
 0x537   :  { %1758 = vmatmul.mubr.f32.vlgmr.msra.gmra.mrb[14].mxu0 %v1615_v55  ;;  %v1550_v63 = vsel %vm224_vm0, %v4921_v9, %v1549_v48  ;;  %v3325_v54 = vpack.c.bf16 %v1926_v21, %v1924_v26  ;;  %v1870_v14 = vrot.slane %v4850_v44, 2  ;;  %v2035_v28 = vrot.slane %v4771_v19, 3  ;;  %v1938_v32 = vld [vmem:[#allocation10 + $0x4d8] sm:$0xff]  ;;  %v1937_v10 = vld [vmem:[#allocation10 + $0x4d0] sm:$0xff]  ;;  %v2059_v36 = vld [vmem:[#allocation10 + $0x4e8] sm:$0xff] }
 0x538   :  { %3136 = vmatprep.mubr.msk.f32.mxu0 %vm659_vm5, %v1632_v27  ;;  %v1557_v62 = vsel %vm1459_vm1, %v4909_v12, %v1550_v63  ;;  %v1624_v42 = vsel %vm1378_vm6, %v1622_v46, %v1623_v58  ;;  %v2208_v22 = vrot.slane %v4735_v15, 4  ;;  %v2036_v1 = vrot.slane %v4909_v12, 3  ;;  %v2061_v55 = vld [vmem:[#allocation10 + $0x4f8] sm:$0xff]  ;;  %v2058_v21 = vld [vmem:[#allocation10 + $0x4e0] sm:$0xff]  ;;  %v2060_v27 = vld [vmem:[#allocation10 + $0x4f0] sm:$0xff] }
 0x539   :  { %3320 = vmatpush1.bf16.msra.mxu1 %v3319_v16  ;;  %v1631_v37 = vsel %vm1459_vm1, %v1614_v43, %v1624_v42  ;;  %v1928_v16 = vld [vmem:[#allocation10 + $0x488] sm:$0xff]  ;;  %v2047_v35 = vrot.slane %v4904_v23, 7  ;;  %v2050_v53 = vrot.slane %v4951_v40, 7  ;;  %v1869_v31 = vrot.slane %v4735_v15, 2  ;;  %v2065_v63 = vld [vmem:[#allocation10 + $0x518] sm:$0xff] }
 0x53a   :  { %3322 = vmatprep.subr.bf16.mxu1 %v3321_v51  ;;  %1854 = vmatmul.mubr.f32.gmra.mrb[16].mxu1 %v1557_v62  ;;  %v2046_v51 = vrot.slane %v4930_v57, 7  ;;  %v3327_v3 = vpack.c.bf16 %v1925_v33, %v1923_v7  ;;  %v4972_v41 = vsel %vm1459_vm1, %v4882_v49, %v1524_v59  ;;  %v4976_v61 = vsel %vm224_vm0, %v2208_v22, %v4897_v5  ;;  %v2063_v59 = vld [vmem:[#allocation10 + $0x508] sm:$0xff]  ;;  %v2069_v22 = vld [vmem:[#allocation10 + $0x538] sm:$0xff] }
 0x53b   :  { %3140 = vmatprep.mubr.msk.f32.mxu1 %vm659_vm5, %v1552_v50  ;;  %1764 = vmatmul.mubr.f32.gmra.mrb[16].mxu0 %v1631_v37  ;;  %v3329_v18 = vpack.c.bf16 %v1930_v39, %v1928_v16  ;;  %v4979_v20 = vsel %vm1468_vm7, %v2035_v28, %v2036_v1  ;;  %v4987_v11 = vsel %vm1459_vm1, %v2047_v35, %v2050_v53  ;;  %v2048_v29 = vrot.slane %v4972_v41, 7  ;;  %v2062_v37 = vld [vmem:[#allocation10 + $0x500] sm:$0xff]  ;;  %v2064_v16 = vld [vmem:[#allocation10 + $0x510] sm:$0xff]  ;;  %v2067_v28 = vld [vmem:[#allocation10 + $0x528] sm:$0xff] }
 0x53c   :  { %3137 = vmatprep.mubr.msk.f32.mxu0 %vm659_vm5, %v1626_v52  ;;  %v4982_v25 = vsel %vm1459_vm1, %v2036_v1, %v2046_v51  ;;  %v1871_v49 = vsel %vm1471_vm9, %v1869_v31, %v1870_v14  ;;  %v2206_v13 = vrot.slane %v4771_v19, 4  ;;  %v3331_v24 = vpack.c.bf16 %v1929_v45, %v1927_v0  ;;  %v2068_v53 = vld [vmem:[#allocation10 + $0x530] sm:$0xff] }
 0x53d   :  { %3324 = vmatpush1.bf16.msra.mxu1 %v3323_v2  ;;  %v4996_v50 = vsel %vm1459_vm1, %v2046_v51, %v2048_v29  ;;  %v3333_v52 = vpack.c.bf16 %v1934_v6, %v1932_v4  ;;  %v5005_v43 = vsel %vm1459_vm1, %v4897_v5, %v4904_v23  ;;  %v5010_v34 = vsel %vm1459_vm1, %v4921_v9, %v4930_v57  ;;  %v2066_v51 = vld [vmem:[#allocation10 + $0x520] sm:$0xff]  ;;  %v2072_v6 = vld [vmem:[#allocation10 + $0x550] sm:$0xff]  ;;  %v2075_v29 = vld [vmem:[#allocation10 + $0x568] sm:$0xff] }
 0x53e   :  { %3326 = vmatprep.subr.bf16.mxu1 %v3325_v54  ;;  %1860 = vmatmul.mubr.f32.gmra.mrb[18].mxu1 %v1549_v48  ;;  %v5000_v38 = vsel %vm224_vm0, %v2206_v13, %v4921_v9  ;;  %v3335_v60 = vpack.c.bf16 %v1933_v56, %v1931_v30  ;;  %v3337_v46 = vpack.c.bf16 %v1938_v32, %v1936_v47  ;;  %v1879_v5 = vrot.slane %v4904_v23, 6  ;;  %vm5343_vm0 = vmmov %vm5332_vm3  ;;  %v2070_v4 = vld [vmem:[#allocation10 + $0x540] sm:$0xff]  ;;  %v2077_v13 = vld [vmem:[#allocation10 + $0x578] sm:$0xff] }
 0x53f   :  { %3141 = vmatprep.mubr.msk.f32.mxu1 %vm659_vm5, %v1871_v49  ;;  %1770 = vmatmul.mubr.f32.gmra.mrb[18].mxu0 %v1623_v58  ;;  %v3339_v48 = vpack.c.bf16 %v1937_v10, %v1935_v17  ;;  %v3341_v26 = vpack.c.bf16 %v2061_v55, %v2059_v36  ;;  %v1867_v9 = vrot.slane %v4909_v12, 2  ;;  %v1878_v58 = vrot.slane %v4850_v44, 6  ;;  %vm5344_vm6 = vmmov %vm5343_vm0  ;;  %v2074_v56 = vld [vmem:[#allocation10 + $0x560] sm:$0xff]  ;;  %v2076_v47 = vld [vmem:[#allocation10 + $0x570] sm:$0xff] }
 0x540   :  { %v1875_v2 = vrot.slane %v4909_v12, 6  ;;  %v1876_v62 = vrot.slane %v4930_v57, 6  ;;  %v1866_v42 = vrot.slane %v4771_v19, 2  ;;  %v3343_v7 = vpack.c.bf16 %v2060_v27, %v2058_v21  ;;  %v2079_v32 = vld [vmem:[#allocation10 + $0x588] sm:$0xff]  ;;  %v2078_v17 = vld [vmem:[#allocation10 + $0x580] sm:$0xff]  ;;  %v2080_v10 = vld [vmem:[#allocation10 + $0x590] sm:$0xff] }
 0x541   :  { %3328 = vmatpush1.bf16.msra.mxu1 %v3327_v3  ;;  %v1880_v54 = vsel %vm5343_vm0, %v1878_v58, %v1879_v5  ;;  %v3345_v33 = vpack.c.bf16 %v2065_v63, %v2063_v59  ;;  %v3347_v19 = vpack.c.bf16 %v2064_v16, %v2062_v37  ;;  %v3349_v1 = vpack.c.bf16 %v2069_v22, %v2067_v28  ;;  %v2071_v3 = vld [vmem:[#allocation10 + $0x548] sm:$0xff]  ;;  %v2085_v55 = vld [vmem:[#allocation10 + $0x5b8] sm:$0xff]  ;;  %v2084_v21 = vld [vmem:[#allocation10 + $0x5b0] sm:$0xff] }
 0x542   :  { %3330 = vmatprep.subr.bf16.mxu1 %v3329_v18  ;;  %v1868_v39 = vsel %vm1471_vm9, %v1866_v42, %v1867_v9  ;;  %v1885_v12 = vsel %vm1459_vm1, %v1870_v14, %v1880_v54  ;;  %v1877_v57 = vsel %vm5344_vm6, %v1875_v2, %v1876_v62  ;;  %v2073_v18 = vld [vmem:[#allocation10 + $0x558] sm:$0xff]  ;;  %v2039_v0 = vrot.slane %v4850_v44, 3  ;;  %v2083_v36 = vld [vmem:[#allocation10 + $0x5a8] sm:$0xff]  ;;  %v2086_v63 = vld [vmem:[#allocation10 + $0x5c0] sm:$0xff] }
 0x543   :  { %v1884_v31 = vsel %vm1459_vm1, %v1867_v9, %v1877_v57  ;;  %v3351_v14 = vpack.c.bf16 %v2068_v53, %v2066_v51  ;;  %v2038_v45 = vrot.slane %v4735_v15, 3  ;;  %v3353_v49 = vpack.c.bf16 %v2073_v18, %v2071_v3  ;;  %v2081_v15 = vld [vmem:[#allocation10 + $0x598] sm:$0xff]  ;;  %v2087_v27 = vld [vmem:[#allocation10 + $0x5c8] sm:$0xff]  ;;  %v2088_v2 = vld [vmem:[#allocation10 + $0x5d0] sm:$0xff] }
 0x544   :  { %v3357_v30 = vpack.c.bf16 %v2077_v13, %v2075_v29  ;;  %v2089_v9 = vld [vmem:[#allocation10 + $0x5d8] sm:$0xff]  ;;  %v3371_v54 = vpack.c.bf16 %v2088_v2, %v2086_v63  ;;  %v2092_v37 = vld [vmem:[#allocation10 + $0x5f0] sm:$0xff]  ;;  %v2095_v16 = vld [vmem:[#allocation10 + $0x608] sm:$0xff]  ;;  %vm2378_vm9 = vcmask 123904  }
 0x545   :  { %3332 = vmatpush1.bf16.msra.mxu1 %v3331_v24  ;;  %v2040_v24 = vsel %vm1468_vm7, %v2038_v45, %v2039_v0  ;;  %v3369_v59 = vpack.c.bf16 %v2089_v9, %v2087_v27  ;;  %v2093_v42 = vld [vmem:[#allocation10 + $0x5f8] sm:$0xff]  ;;  %v2096_v57 = vld [vmem:[#allocation10 + $0x610] sm:$0xff]  ;;  %v2103_v18 = vld [vmem:[#allocation10 + $0x648] sm:$0xff]  ;;  %v2056_v9 = vsel %vm1459_vm1, %v2039_v0, %v2047_v35 }
 0x546   :  { %3334 = vmatprep.subr.bf16.mxu1 %v3333_v52  ;;  %v3355_v52 = vpack.c.bf16 %v2072_v6, %v2070_v4  ;;  %v2100_v3 = vld [vmem:[#allocation10 + $0x630] sm:$0xff]  ;;  %v2102_v4 = vld [vmem:[#allocation10 + $0x640] sm:$0xff]  ;;  %v2107_v29 = vld [vmem:[#allocation10 + $0x668] sm:$0xff] }
 0x547   :  { %v2104_v6 = vld [vmem:[#allocation10 + $0x650] sm:$0xff]  ;;  %v2109_v13 = vld [vmem:[#allocation10 + $0x678] sm:$0xff]  ;;  %v2224_v63 = vld [vmem:[#allocation10 + $0x6c0] sm:$0xff] }
 0x548   :  { %v2227_v27 = vld [vmem:[#allocation10 + $0x6d8] sm:$0xff]  ;;  %v2226_v2 = vld [vmem:[#allocation10 + $0x6d0] sm:$0xff]  ;;  %v2228_v35 = vld [vmem:[#allocation10 + $0x6e0] sm:$0xff] }
 0x549   :  { %3336 = vmatpush1.bf16.msra.mxu1 %v3335_v60  ;;  %v3359_v60 = vpack.c.bf16 %v2076_v47, %v2074_v56  ;;  %v2108_v56 = vld [vmem:[#allocation10 + $0x670] sm:$0xff]  ;;  %v2217_v47 = vld [vmem:[#allocation10 + $0x688] sm:$0xff]  ;;  %v3403_v23 = vpack.c.bf16 %v2226_v2, %v2224_v63  ;;  %vm5345_vm7 = vmmov %vm5343_vm0 }
 0x54a   :  { %3338 = vmatprep.subr.bf16.mxu1 %v3337_v46  ;;  %v3361_v46 = vpack.c.bf16 %v2081_v15, %v2079_v32  ;;  %v2219_v32 = vld [vmem:[#allocation10 + $0x698] sm:$0xff]  ;;  %v2233_v0 = vld [vmem:[#allocation10 + $0x708] sm:$0xff]  ;;  %vm5346_vm3 = vmmov %vm5343_vm0 }
 0x54d   :  { %3340 = vmatpush1.bf16.msra.mxu1 %v3339_v48  ;;  %v3363_v48 = vpack.c.bf16 %v2080_v10, %v2078_v17  ;;  %v2218_v17 = vld [vmem:[#allocation10 + $0x690] sm:$0xff]  ;;  %v2221_v10 = vld [vmem:[#allocation10 + $0x6a8] sm:$0xff] }
 0x54e   :  { %3342 = vmatprep.subr.bf16.mxu1 %v3341_v26  ;;  %v2082_v26 = vld [vmem:[#allocation10 + $0x5a0] sm:$0xff] }
 0x54f   :  { %v3367_v58 = vpack.c.bf16 %v2084_v21, %v2082_v26  ;;  %v2222_v26 = vld [vmem:[#allocation10 + $0x6b0] sm:$0xff]  ;;  %v2225_v21 = vld [vmem:[#allocation10 + $0x6c8] sm:$0xff] }
 0x550   :  { %2011 = vmatmul.mubr.f32.vlgmr.msra.gmra.mrb[14].mxu1 %v1868_v39  ;;  %v2097_v39 = vld [vmem:[#allocation10 + $0x618] sm:$0xff] }
 0x551   :  { %3142 = vmatprep.mubr.msk.f32.mxu1 %vm659_vm5, %v1885_v12  ;;  %3344 = vmatpush1.bf16.msra.mxu1 %v3343_v7  ;;  %v3377_v22 = vpack.c.bf16 %v2097_v39, %v2095_v16  ;;  %v2094_v12 = vld [vmem:[#allocation10 + $0x600] sm:$0xff]  ;;  %v2239_v16 = vld [vmem:[#allocation10 + $0x738] sm:$0xff] }
 0x552   :  { %3346 = vmatprep.subr.bf16.mxu1 %v3345_v33  ;;  %v2090_v33 = vld [vmem:[#allocation10 + $0x5e0] sm:$0xff]  ;;  %v3379_v51 = vpack.c.bf16 %v2096_v57, %v2094_v12  ;;  %v2238_v12 = vld [vmem:[#allocation10 + $0x730] sm:$0xff]  ;;  %v2241_v57 = vld [vmem:[#allocation10 + $0x748] sm:$0xff] }
 0x553   :  { %v3375_v28 = vpack.c.bf16 %v2092_v37, %v2090_v33  ;;  %v2232_v33 = vld [vmem:[#allocation10 + $0x700] sm:$0xff]  ;;  %v2234_v37 = vld [vmem:[#allocation10 + $0x710] sm:$0xff] }
 0x554   :  { %2017 = vmatmul.mubr.f32.gmra.mrb[16].mxu1 %v1884_v31  ;;  %v2098_v31 = vld [vmem:[#allocation10 + $0x620] sm:$0xff]  ;;  %v3411_v39 = vpack.c.bf16 %v2234_v37, %v2232_v33 }
 0x555   :  { %3143 = vmatprep.mubr.msk.f32.mxu1 %vm659_vm5, %v1879_v5  ;;  %3348 = vmatpush1.bf16.msra.mxu1 %v3347_v19  ;;  %v3365_v5 = vpack.c.bf16 %v2085_v55, %v2083_v36  ;;  %v2099_v19 = vld [vmem:[#allocation10 + $0x628] sm:$0xff]  ;;  %v3383_v45 = vpack.c.bf16 %v2100_v3, %v2098_v31  ;;  %v2223_v36 = vld [vmem:[#allocation10 + $0x6b8] sm:$0xff] }
 0x556   :  { %3350 = vmatprep.subr.bf16.mxu1 %v3349_v1  ;;  %v2101_v1 = vld [vmem:[#allocation10 + $0x638] sm:$0xff] }
 0x557   :  { %v3381_v53 = vpack.c.bf16 %v2101_v1, %v2099_v19  ;;  %v2243_v19 = vld [vmem:[#allocation10 + $0x758] sm:$0xff] }
 0x558   :  { %2023 = vmatmul.mubr.f32.gmra.mrb[18].mxu1 %v1876_v62  ;;  %v2091_v62 = vld [vmem:[#allocation10 + $0x5e8] sm:$0xff]  ;;  %v3417_v1 = vpack.c.bf16 %v2243_v19, %v2241_v57  ;;  %v2247_v31 = vld [vmem:[#allocation10 + $0x778] sm:$0xff] }
 0x559   :  { %3352 = vmatpush1.bf16.msra.mxu1 %v3351_v14  ;;  %3144 = vmatprep.mubr.msk.f32.mxu1 %vm659_vm5, %v2040_v24  ;;  %v3373_v7 = vpack.c.bf16 %v2093_v42, %v2091_v62  ;;  %v2105_v14 = vld [vmem:[#allocation10 + $0x658] sm:$0xff]  ;;  %v3387_v24 = vpack.c.bf16 %v2104_v6, %v2102_v4  ;;  %v2229_v62 = vld [vmem:[#allocation10 + $0x6e8] sm:$0xff] }
 0x55a   :  { %3354 = vmatprep.subr.bf16.mxu1 %v3353_v49  ;;  %v3385_v49 = vpack.c.bf16 %v2105_v14, %v2103_v18  ;;  %v2231_v42 = vld [vmem:[#allocation10 + $0x6f8] sm:$0xff]  ;;  %v2244_v14 = vld [vmem:[#allocation10 + $0x760] sm:$0xff] }
 0x55b   :  { %v3405_v44 = vpack.c.bf16 %v2231_v42, %v2229_v62  ;;  %v2251_v4 = vld [vmem:[#allocation10 + $0x798] sm:$0xff]  ;;  %v2264_v62 = vld [vmem:[#allocation10 + $0x800] sm:$0xff]  ;;  %v2266_v42 = vld [vmem:[#allocation10 + $0x810] sm:$0xff] }
 0x55d   :  { %3356 = vmatpush1.bf16.msra.mxu1 %v3355_v52  ;;  %v3389_v52 = vpack.c.bf16 %v2109_v13, %v2107_v29  ;;  %v2248_v13 = vld [vmem:[#allocation10 + $0x780] sm:$0xff] }
 0x55e   :  { %3358 = vmatprep.subr.bf16.mxu1 %v3357_v30  ;;  %v2106_v30 = vld [vmem:[#allocation10 + $0x660] sm:$0xff] }
 0x55f   :  { %v3391_v15 = vpack.c.bf16 %v2108_v56, %v2106_v30  ;;  %v2255_v30 = vld [vmem:[#allocation10 + $0x7b8] sm:$0xff] }
 0x561   :  { %3360 = vmatpush1.bf16.msra.mxu1 %v3359_v60  ;;  %v3393_v60 = vpack.c.bf16 %v2219_v32, %v2217_v47  ;;  %v2252_v32 = vld [vmem:[#allocation10 + $0x7a0] sm:$0xff] }
 0x562   :  { %3362 = vmatprep.subr.bf16.mxu1 %v3361_v46  ;;  %v2216_v46 = vld [vmem:[#allocation10 + $0x680] sm:$0xff] }
 0x563   :  { %v3395_v55 = vpack.c.bf16 %v2218_v17, %v2216_v46  ;;  %v2259_v46 = vld [vmem:[#allocation10 + $0x7d8] sm:$0xff] }
 0x565   :  { %3364 = vmatpush1.bf16.msra.mxu1 %v3363_v48  ;;  %v3397_v48 = vpack.c.bf16 %v2223_v36, %v2221_v10  ;;  %v2256_v36 = vld [vmem:[#allocation10 + $0x7c0] sm:$0xff] }
 0x566   :  { %3366 = vmatprep.subr.bf16.mxu1 %v3365_v5  ;;  %v2220_v5 = vld [vmem:[#allocation10 + $0x6a0] sm:$0xff] }
 0x569   :  { %3368 = vmatpush1.bf16.msra.mxu1 %v3367_v58  ;;  %v3399_v58 = vpack.c.bf16 %v2222_v26, %v2220_v5  ;;  %v2263_v5 = vld [vmem:[#allocation10 + $0x7f8] sm:$0xff] }
 0x56a   :  { %3370 = vmatprep.subr.bf16.mxu1 %v3369_v59  ;;  %v3401_v59 = vpack.c.bf16 %v2227_v27, %v2225_v21  ;;  %v2260_v27 = vld [vmem:[#allocation10 + $0x7e0] sm:$0xff] }
 0x56d   :  { %3372 = vmatpush1.bf16.msra.mxu1 %v3371_v54  ;;  %v2235_v54 = vld [vmem:[#allocation10 + $0x718] sm:$0xff] }
 0x56e   :  { %3374 = vmatprep.subr.bf16.mxu1 %v3373_v7 }
 0x571   :  { %3376 = vmatpush1.bf16.msra.mxu1 %v3375_v28 }
 0x572   :  { %3378 = vmatprep.subr.bf16.mxu1 %v3377_v22  ;;  %v2236_v22 = vld [vmem:[#allocation10 + $0x720] sm:$0xff] }
 0x575   :  { %3380 = vmatpush1.bf16.msra.mxu1 %v3379_v51  ;;  %v2242_v51 = vld [vmem:[#allocation10 + $0x750] sm:$0xff] }
 0x576   :  { %3382 = vmatprep.subr.bf16.mxu1 %v3381_v53  ;;  %v2245_v53 = vld [vmem:[#allocation10 + $0x768] sm:$0xff] }
 0x577   :  { %v3421_v18 = vpack.c.bf16 %v2247_v31, %v2245_v53 }
 0x579   :  { %3384 = vmatpush1.bf16.msra.mxu1 %v3383_v45  ;;  %v2246_v45 = vld [vmem:[#allocation10 + $0x770] sm:$0xff] }
 0x57a   :  { %3386 = vmatprep.subr.bf16.mxu1 %v3385_v49  ;;  %v2249_v49 = vld [vmem:[#allocation10 + $0x788] sm:$0xff]  ;;  %v3423_v6 = vpack.c.bf16 %v2246_v45, %v2244_v14 }
 0x57b   :  { %v3425_v29 = vpack.c.bf16 %v2251_v4, %v2249_v49 }
 0x57d   :  { %3388 = vmatpush1.bf16.msra.mxu1 %v3387_v24  ;;  %v2250_v24 = vld [vmem:[#allocation10 + $0x790] sm:$0xff] }
 0x57e   :  { %3390 = vmatprep.subr.bf16.mxu1 %v3389_v52  ;;  %v2253_v52 = vld [vmem:[#allocation10 + $0x7a8] sm:$0xff]  ;;  %v3427_v56 = vpack.c.bf16 %v2250_v24, %v2248_v13 }
 0x57f   :  { %v3429_v47 = vpack.c.bf16 %v2255_v30, %v2253_v52 }
 0x581   :  { %3392 = vmatpush1.bf16.msra.mxu1 %v3391_v15  ;;  %v2254_v15 = vld [vmem:[#allocation10 + $0x7b0] sm:$0xff] }
 0x582   :  { %3394 = vmatprep.subr.bf16.mxu1 %v3393_v60  ;;  %v2257_v60 = vld [vmem:[#allocation10 + $0x7c8] sm:$0xff]  ;;  %v3431_v17 = vpack.c.bf16 %v2254_v15, %v2252_v32 }
 0x583   :  { %v3433_v10 = vpack.c.bf16 %v2259_v46, %v2257_v60 }
 0x584   :  { %2182 = vmatmul.mubr.f32.vlgmr.msra.gmra.mrb[14].mxu1 %v4979_v20  ;;  %v2230_v20 = vld [vmem:[#allocation10 + $0x6f0] sm:$0xff] }
 0x585   :  { %3145 = vmatprep.mubr.msk.f32.mxu1 %vm659_vm5, %v2056_v9  ;;  %3396 = vmatpush1.bf16.msra.mxu1 %v3395_v55  ;;  %v3407_v7 = vpack.c.bf16 %v2230_v20, %v2228_v35  ;;  %v2258_v55 = vld [vmem:[#allocation10 + $0x7d0] sm:$0xff] }
 0x586   :  { %3398 = vmatprep.subr.bf16.mxu1 %v3397_v48  ;;  %v2261_v48 = vld [vmem:[#allocation10 + $0x7e8] sm:$0xff]  ;;  %v3435_v26 = vpack.c.bf16 %v2258_v55, %v2256_v36  ;;  %v2262_v9 = vld [vmem:[#allocation10 + $0x7f0] sm:$0xff] }
 0x587   :  { %v3437_v21 = vpack.c.bf16 %v2263_v5, %v2261_v48  ;;  %v3439_v63 = vpack.c.bf16 %v2262_v9, %v2260_v27 }
 0x588   :  { %2188 = vmatmul.mubr.f32.gmra.mrb[16].mxu1 %v4982_v25  ;;  %v3409_v25 = vpack.c.bf16 %v2235_v54, %v2233_v0 }
 0x589   :  { %3146 = vmatprep.mubr.msk.f32.mxu1 %vm659_vm5, %v4987_v11  ;;  %3400 = vmatpush1.bf16.msra.mxu1 %v3399_v58  ;;  %v2237_v11 = vld [vmem:[#allocation10 + $0x728] sm:$0xff] }
 0x58a   :  { %3402 = vmatprep.subr.bf16.mxu1 %v3401_v59  ;;  %v3413_v28 = vpack.c.bf16 %v2239_v16, %v2237_v11  ;;  %v2265_v58 = vld [vmem:[#allocation10 + $0x808] sm:$0xff]  ;;  %v2267_v59 = vld [vmem:[#allocation10 + $0x818] sm:$0xff] }
 0x58b   :  { %v3441_v2 = vpack.c.bf16 %v2267_v59, %v2265_v58 }
 0x58c   :  { %2194 = vmatmul.mubr.f32.gmra.mrb[18].mxu1 %v4996_v50  ;;  %v3415_v50 = vpack.c.bf16 %v2238_v12, %v2236_v22 }
 0x58d   :  { %3404 = vmatpush1.bf16.msra.mxu1 %v3403_v23  ;;  %3147 = vmatprep.mubr.msk.f32.mxu1 %vm659_vm5, %v4976_v61  ;;  %v2240_v61 = vld [vmem:[#allocation10 + $0x740] sm:$0xff]  ;;  %v3443_v23 = vpack.c.bf16 %v2266_v42, %v2264_v62 }
 0x58e   :  { %3406 = vmatprep.subr.bf16.mxu1 %v3405_v44  ;;  %v3419_v3 = vpack.c.bf16 %v2242_v51, %v2240_v61 }
 0x591   :  { %3408 = vmatpush1.bf16.msra.mxu1 %v3407_v7 }
 0x592   :  { %3410 = vmatprep.subr.bf16.mxu1 %v3409_v25 }
 0x595   :  { %3412 = vmatpush1.bf16.msra.mxu1 %v3411_v39 }
 0x596   :  { %3414 = vmatprep.subr.bf16.mxu1 %v3413_v28 }
 0x599   :  { %3416 = vmatpush1.bf16.msra.mxu1 %v3415_v50 }
 0x59a   :  { %3418 = vmatprep.subr.bf16.mxu1 %v3417_v1 }
 0x59d   :  { %3420 = vmatpush1.bf16.msra.mxu1 %v3419_v3 }
 0x59e   :  { %3422 = vmatprep.subr.bf16.mxu1 %v3421_v18 }
 0x5a1   :  { %3424 = vmatpush1.bf16.msra.mxu1 %v3423_v6 }
 0x5a2   :  { %3426 = vmatprep.subr.bf16.mxu1 %v3425_v29 }
 0x5a5   :  { %3428 = vmatpush1.bf16.msra.mxu1 %v3427_v56 }
 0x5a6   :  { %3430 = vmatprep.subr.bf16.mxu1 %v3429_v47 }
 0x5a9   :  { %3432 = vmatpush1.bf16.msra.mxu1 %v3431_v17 }
 0x5aa   :  { %3434 = vmatprep.subr.bf16.mxu1 %v3433_v10 }
 0x5ad   :  { %3436 = vmatpush1.bf16.msra.mxu1 %v3435_v26 }
 0x5ae   :  { %3438 = vmatprep.subr.bf16.mxu1 %v3437_v21 }
 0x5b1   :  { %3440 = vmatpush1.bf16.msra.mxu1 %v3439_v63 }
 0x5b2   :  { %3442 = vmatprep.subr.bf16.mxu1 %v3441_v2 }
 0x5b5   :  { %3444 = vmatpush1.bf16.msra.mxu1 %v3443_v23 }
 0x5b8   :  { %2340 = vmatmul.mubr.f32.vlgmr.msra.gmra.mrb[14].mxu1 %v5000_v38 }
 0x5b9   :  { %3148 = vmatprep.mubr.msk.f32.mxu1 %vm659_vm5, %v5005_v43 }
 0x5bc   :  { %2346 = vmatmul.mubr.f32.gmra.mrb[16].mxu1 %v5010_v34 }
 0x5bd   :  { %3149 = vmatprep.mubr.msk.f32.mxu1 %vm659_vm5, %v4951_v40 }
 0x5c0   :  { %2352 = vmatmul.mubr.f32.gmra.mrb[18].mxu1 %v4972_v41 }
 0x60a   :  { %v1759_v44 = vpop.f32.mrb[14].mxu0 }
 0x60b   :  { %v1761_v35 = vpop.f32.mrb[15].mxu0 }
 0x60e   :  { %v1765_v20 = vpop.f32.mrb[16].mxu0 }
 0x60f   :  { %v1767_v0 = vpop.f32.mrb[17].mxu0 }
 0x612   :  { %v1771_v54 = vpop.f32.mrb[18].mxu0 }
 0x613   :  { %v1773_v7 = vpop.f32.mrb[19].mxu0 }
 0x68b   :  { %v2341_v25 = vpop.f32.mrb[14].mxu1 }
 0x68c   :  { %v5053_v33 = vadd.f32 %v2341_v25, %v1759_v44  ;;  %v2343_v38 = vpop.f32.mrb[15].mxu1 }
 0x68d   :  { %v5055_v37 = vadd.f32 %v2343_v38, %v1761_v35 }
 0x68f   :  { %v2347_v43 = vpop.f32.mrb[16].mxu1  ;;  %v2375_v3 = vsel %vm828_vm8, %v5055_v37, 0.0 }
 0x690   :  { %v5057_v11 = vadd.f32 %v2347_v43, %v1765_v20  ;;  %v2349_v34 = vpop.f32.mrb[17].mxu1 }
 0x691   :  { %v5059_v16 = vadd.f32 %v2349_v34, %v1767_v0 }
 0x692   :  { %v2366_v28 = vadd.f32 %v5057_v11, %v5053_v33 }
 0x693   :  { %v2353_v40 = vpop.f32.mrb[18].mxu1  ;;  %v2376_v31 = vsel %vm828_vm8, %v5059_v16, 0.0 }
 0x694   :  { %v5061_v41 = vadd.f32 %v2353_v40, %v1771_v54  ;;  %v2355_v39 = vpop.f32.mrb[19].mxu1  ;;  %v2377_v14 = vadd.f32 %v2376_v31, %v2375_v3 }
 0x695   :  { %v5065_v22 = vadd.f32 %v2355_v39, %v1773_v7 }
 0x696   :  { %v2367_v12 = vsel %vm5345_vm7, %v5061_v41, 0.0 }
 0x697   :  { %v2368_v57 = vadd.f32 %v2367_v12, %v2366_v28  ;;  %v2379_v18 = vsel %vm2378_vm9, %v5065_v22, 0.0 }
 0x698   :  { %v2380_v45 = vadd.f32 %v2379_v18, %v2377_v14 }
 0x699   :  { %v2369_v19 = vrot.slane %v2368_v57, 4 }
 0x69a   :  { %v2381_v49 = vrot.slane %v2380_v45, 4 }
 0x69b   :  { %v2370_v50 = vadd.f32 %v2369_v19, %v2368_v57 }
 0x69c   :  { %v2382_v4 = vadd.f32 %v2381_v49, %v2380_v45 }
 0x69d   :  { %v2371_v1 = vrot.slane %v2370_v50, 2 }
 0x69e   :  { %v2383_v13 = vrot.slane %v2382_v4, 2 }
 0x69f   :  { %v2372_v61 = vadd.f32 %v2371_v1, %v2370_v50 }
 0x6a0   :  { %v2384_v32 = vadd.f32 %v2383_v13, %v2382_v4 }
 0x6a1   :  { %v2373_v51 = vrot.slane %v2372_v61, 1 }
 0x6a2   :  { %v2385_v17 = vrot.slane %v2384_v32, 1 }
 0x6a3   :  { %v2374_v53 = vadd.f32 %v2373_v51, %v2372_v61  ;;  %v5120_v61 = vld [vmem:[#allocation13] sm:$0x1] }
 0x6a4   :  { %v2386_v48 = vadd.f32 %v2385_v17, %v2384_v32  ;;  %v5124_v51 = vrot.slane %v5120_v61, %v4263_v8 }
 0x6a5   :  { %2392 = vrot.lane.b32.xlu1 %v2374_v53, %s3913_s1  ;;  %2388 = vrot.lane.b32.xlu0 %v2374_v53, %s3914_s10 }
 0x6a9   :  { %2400 = vrot.lane.b32.xlu1 %v2374_v53, %s3917_s17  ;;  %2396 = vrot.lane.b32.xlu0 %v2374_v53, %s3915_s15 }
 0x6ad   :  { %2408 = vrot.lane.b32.xlu1 %v2374_v53, %s3921_s23  ;;  %2404 = vrot.lane.b32.xlu0 %v2374_v53, %s3919_s21 }
 0x6b1   :  { %2412 = vrot.lane.b32.xlu0 %v2374_v53, %s3898_s20 }
 0x717   :  { %v2393_v6 = vpop.permute.xlu1 %2392  ;;  %v2389_v29 = vpop.permute.xlu0 %2388 }
 0x718   :  { %v2391_v24 = vadd.f32 %v2389_v29, %v2374_v53 }
 0x71a   :  { %v2395_v52 = vadd.f32 %v2393_v6, %v2391_v24 }
 0x71b   :  { %v2401_v30 = vpop.permute.xlu1 %2400  ;;  %v2397_v56 = vpop.permute.xlu0 %2396 }
 0x71c   :  { %v2399_v47 = vadd.f32 %v2397_v56, %v2395_v52 }
 0x71e   :  { %v2403_v15 = vadd.f32 %v2401_v30, %v2399_v47 }
 0x71f   :  { %v2405_v60 = vpop.permute.xlu0 %2404  ;;  %v2409_v10 = vpop.permute.xlu1 %2408 }
 0x720   :  { %v2407_v46 = vadd.f32 %v2405_v60, %v2403_v15 }
 0x722   :  { %v2411_v36 = vadd.f32 %v2409_v10, %v2407_v46 }
 0x723   :  { %v2413_v55 = vpop.permute.xlu0 %2412 }
 0x724   :  { %v2415_v5 = vadd.f32 %v2413_v55, %v2411_v36 }
 0x726   :  { %v2416_v26 = vadd.f32 %v2415_v5, %v2386_v48 }
 0x728   :  { %v2417_v21 = vmul.f32 0.0061728396, %v2416_v26 }
 0x72a   :  { %2422 = vrot.lane.b32.xlu0 %v2417_v21, %s3921_s23  ;;  %2419 = vrot.lane.b32.xlu1 %v2417_v21, %s3898_s20  ;;  %v2454_v53 = vrot.slane %v2417_v21, %v4263_v8 }
 0x72c   :  { %v5136_v31 = vsub.f32 %v5055_v37, %v2454_v53  ;;  %v5139_v3 = vsub.f32 %v5059_v16, %v2454_v53  ;;  %v5146_v45 = vsub.f32 %v5065_v22, %v2454_v53 }
 0x72e   :  { %2428 = vrot.lane.b32.xlu0 %v2417_v21, %s3917_s17  ;;  %2425 = vrot.lane.b32.xlu1 %v2417_v21, %s3919_s21  ;;  %v2462_v18 = vmul.f32 %v5136_v31, %v5136_v31  ;;  %v2464_v14 = vmul.f32 %v5139_v3, %v5139_v3  ;;  %v2466_v37 = vmul.f32 %v5146_v45, %v5146_v45 }
 0x730   :  { %v2476_v49 = vsel %vm828_vm8, %v2462_v18, 0.0  ;;  %v2477_v4 = vsel %vm828_vm8, %v2464_v14, 0.0  ;;  %v2479_v16 = vsel %vm2378_vm9, %v2466_v37, 0.0 }
 0x731   :  { %v2478_v6 = vadd.f32 %v2477_v4, %v2476_v49 }
 0x732   :  { %2434 = vrot.lane.b32.xlu0 %v2417_v21, %s3913_s1  ;;  %2431 = vrot.lane.b32.xlu1 %v2417_v21, %s3915_s15 }
 0x733   :  { %v2480_v29 = vadd.f32 %v2479_v16, %v2478_v6 }
 0x735   :  { %v2481_v13 = vrot.slane %v2480_v29, 4 }
 0x736   :  { %2437 = vrot.lane.b32.xlu1 %v2417_v21, %s3914_s10 }
 0x737   :  { %v2482_v24 = vadd.f32 %v2481_v13, %v2480_v29 }
 0x739   :  { %v2483_v47 = vrot.slane %v2482_v24, 2 }
 0x73b   :  { %v2484_v46 = vadd.f32 %v2483_v47, %v2482_v24 }
 0x73d   :  { %v2485_v55 = vrot.slane %v2484_v46, 1 }
 0x79c   :  { %v2423_v27 = vpop.permute.xlu0 %2422  ;;  %v2420_v9 = vpop.permute.xlu1 %2419 }
 0x79d   :  { %v2440_v58 = vsel %vm828_vm8, %v2417_v21, %v2420_v9  ;;  %v2486_v21 = vadd.f32 %v2485_v55, %v2484_v46 }
 0x79e   :  { %v2441_v63 = vsel %vm832_vm10, %v2440_v58, %v2423_v27 }
 0x7a0   :  { %v2429_v59 = vpop.permute.xlu0 %2428  ;;  %v2426_v2 = vpop.permute.xlu1 %2425 }
 0x7a1   :  { %v2442_v62 = vsel %vm836_vm12, %v2441_v63, %v2426_v2  ;;  %v2364_v63 = vld [vmem:[#allocation11] sm:$0x1] }
 0x7a2   :  { %v2443_v42 = vsel %vm840_vm14, %v2442_v62, %v2429_v59 }
 0x7a4   :  { %v2432_v23 = vpop.permute.xlu1 %2431  ;;  %v2435_v44 = vpop.permute.xlu0 %2434 }
 0x7a5   :  { %v2444_v35 = vsel %vm659_vm5, %v2443_v42, %v2432_v23  ;;  %v2710_v23 = vld [vmem:[#allocation14 + $0x90] sm:$0xff] }
 0x7a6   :  { %v2445_v20 = vsel %vm847_vm2, %v2444_v35, %v2435_v44  ;;  %v2711_v44 = vld [vmem:[#allocation14 + $0x98] sm:$0xff]  ;;  %v2712_v35 = vld [vmem:[#allocation14 + $0xa0] sm:$0xff] }
 0x7a8   :  { %v2438_v0 = vpop.permute.xlu1 %2437 }
 0x7a9   :  { %v2446_v54 = vsel %vm851_vm4, %v2445_v20, %v2438_v0  ;;  %v3924_v20 = vmov 0.0|0.0   ;;  %v3446_v0 = vpack.c.bf16 %v2711_v44, %v2710_v23  ;;  %v2720_v44 = vld [vmem:[#allocation14 + $0xe0] sm:$0xff] }
 0x7aa   :  { %v2450_v7 = vrot.slane %v2446_v54, %v4263_v8  ;;  %3445 = vmatprep.subr.bf16.mxu0 %v3924_v20  ;;  %v2713_v54 = vld [vmem:[#allocation14 + $0xa8] sm:$0xff] }
 0x7ab   :  { %3447 = vmatpush1.bf16.msra.mxu0 %v3446_v0 }
 0x7ac   :  { %v5098_v25 = vsub.f32 %v5053_v33, %v2450_v7  ;;  %v5101_v38 = vsub.f32 %v5057_v11, %v2450_v7  ;;  %v5104_v43 = vsub.f32 %v5061_v41, %v2450_v7  ;;  %v3449_v7 = vpack.c.bf16 %v2713_v54, %v2712_v35  ;;  %3448 = vmatprep.subr.bf16.mxu0 %v3924_v20  ;;  %v2721_v35 = vld [vmem:[#allocation14 + $0xe8] sm:$0xff] }
 0x7ae   :  { %v2461_v34 = vmul.f32 %v5098_v25, %v5098_v25  ;;  %v2463_v40 = vmul.f32 %v5101_v38, %v5101_v38  ;;  %v2465_v39 = vmul.f32 %v5104_v43, %v5104_v43 }
 0x7af   :  { %3450 = vmatpush1.bf16.msra.mxu0 %v3449_v7 }
 0x7b0   :  { %v2467_v28 = vadd.f32 %v2463_v40, %v2461_v34  ;;  %v2468_v12 = vsel %vm5346_vm3, %v2465_v39, 0.0  ;;  %v2714_v34 = vld [vmem:[#allocation14 + $0xb0] sm:$0xff]  ;;  %v2715_v40 = vld [vmem:[#allocation14 + $0xb8] sm:$0xff]  ;;  %3451 = vmatprep.subr.bf16.mxu0 %v3924_v20 }
 0x7b1   :  { %v3452_v39 = vpack.c.bf16 %v2715_v40, %v2714_v34 }
 0x7b2   :  { %v2469_v33 = vadd.f32 %v2468_v12, %v2467_v28  ;;  %v2716_v28 = vld [vmem:[#allocation14 + $0xc0] sm:$0xff]  ;;  %v2717_v12 = vld [vmem:[#allocation14 + $0xc8] sm:$0xff] }
 0x7b3   :  { %3453 = vmatpush1.bf16.msra.mxu0 %v3452_v39 }
 0x7b4   :  { %v2470_v57 = vrot.slane %v2469_v33, 4  ;;  %3454 = vmatprep.subr.bf16.mxu0 %v3924_v20 }
 0x7b6   :  { %v2471_v19 = vadd.f32 %v2470_v57, %v2469_v33  ;;  %v3455_v33 = vpack.c.bf16 %v2717_v12, %v2716_v28  ;;  %v2718_v57 = vld [vmem:[#allocation14 + $0xd0] sm:$0xff]  ;;  %v2723_v28 = vld [vmem:[#allocation14 + $0xf8] sm:$0xff]  ;;  %v2724_v12 = vld [vmem:[#allocation14 + $0x100] sm:$0xff] }
 0x7b8   :  { %v2472_v11 = vrot.slane %v2471_v19, 2  ;;  %3456 = vmatpush1.bf16.msra.mxu0 %v3455_v33 }
 0x7b9   :  { %3457 = vmatprep.subr.bf16.mxu0 %v3924_v20 }
 0x7ba   :  { %v2473_v50 = vadd.f32 %v2472_v11, %v2471_v19  ;;  %v2719_v19 = vld [vmem:[#allocation14 + $0xd8] sm:$0xff] }
 0x7bb   :  { %v3458_v11 = vpack.c.bf16 %v2719_v19, %v2718_v57 }
 0x7bc   :  { %v2474_v1 = vrot.slane %v2473_v50, 1 }
 0x7bd   :  { %3459 = vmatpush1.bf16.msra.mxu0 %v3458_v11  ;;  %v2725_v11 = vld [vmem:[#allocation14 + $0x108] sm:$0xff] }
 0x7be   :  { %v2475_v41 = vadd.f32 %v2474_v1, %v2473_v50  ;;  %3460 = vmatprep.subr.bf16.mxu0 %v3924_v20 }
 0x7c0   :  { %2492 = vrot.lane.b32.xlu1 %v2475_v41, %s3913_s1  ;;  %2488 = vrot.lane.b32.xlu0 %v2475_v41, %s3914_s10 }
 0x7c4   :  { %2500 = vrot.lane.b32.xlu1 %v2475_v41, %s3917_s17  ;;  %2496 = vrot.lane.b32.xlu0 %v2475_v41, %s3915_s15 }
 0x7c8   :  { %2508 = vrot.lane.b32.xlu1 %v2475_v41, %s3921_s23  ;;  %2504 = vrot.lane.b32.xlu0 %v2475_v41, %s3919_s21 }
 0x7cc   :  { %2512 = vrot.lane.b32.xlu0 %v2475_v41, %s3898_s20 }
 0x7d0   :  { %2559 = vrot.lane.b32.xlu0 %v5124_v51, %s3898_s20 }
 0x7d4   :  { %2562 = vrot.lane.b32.xlu0 %v5124_v51, %s3921_s23 }
 0x7d8   :  { %2565 = vrot.lane.b32.xlu0 %v5124_v51, %s3919_s21 }
 0x7dc   :  { %2568 = vrot.lane.b32.xlu0 %v5124_v51, %s3917_s17 }
 0x832   :  { %v2493_v52 = vpop.permute.xlu1 %2492  ;;  %v2489_v30 = vpop.permute.xlu0 %2488 }
 0x833   :  { %v2491_v56 = vadd.f32 %v2489_v30, %v2475_v41 }
 0x835   :  { %v2495_v32 = vadd.f32 %v2493_v52, %v2491_v56 }
 0x836   :  { %v2501_v22 = vpop.permute.xlu1 %2500  ;;  %v2497_v15 = vpop.permute.xlu0 %2496 }
 0x837   :  { %v2499_v60 = vadd.f32 %v2497_v15, %v2495_v32 }
 0x839   :  { %v2503_v17 = vadd.f32 %v2501_v22, %v2499_v60 }
 0x83a   :  { %v2505_v10 = vpop.permute.xlu0 %2504  ;;  %v2509_v48 = vpop.permute.xlu1 %2508 }
 0x83b   :  { %v2507_v36 = vadd.f32 %v2505_v10, %v2503_v17 }
 0x83d   :  { %v2511_v5 = vadd.f32 %v2509_v48, %v2507_v36 }
 0x83e   :  { %v2513_v26 = vpop.permute.xlu0 %2512 }
 0x83f   :  { %v2515_v27 = vadd.f32 %v2513_v26, %v2511_v5 }
 0x841   :  { %v2516_v9 = vadd.f32 %v2515_v27, %v2486_v21 }
 0x842   :  { %v2560_v50 = vpop.permute.xlu0 %2559 }
 0x843   :  { %v2517_v58 = vmul.f32 0.0061728396, %v2516_v9  ;;  %v2580_v4 = vsel %vm828_vm8, %v5120_v61, %v2560_v50 }
 0x845   :  { %v2518_v59 = vadd.f32 1e-05, %v2517_v58 }
 0x846   :  { %v2563_v1 = vpop.permute.xlu0 %2562 }
 0x847   :  { %3662 = vrsqrt.f32 %v2518_v59  ;;  %v2581_v29 = vsel %vm832_vm10, %v2580_v4, %v2563_v1 }
 0x84a   :  { %v2566_v53 = vpop.permute.xlu0 %2565 }
 0x84b   :  { %v2582_v30 = vsel %vm836_vm12, %v2581_v29, %v2566_v53  ;;  %v3467_v53 = vpack.c.bf16 %v2725_v11, %v2724_v12  ;;  %v2682_v12 = vld [vmem:[#allocation14 + $0x28] sm:$0xff] }
 0x84e   :  { %v2569_v14 = vpop.permute.xlu0 %2568 }
 0x84f   :  { %v2583_v15 = vsel %vm840_vm14, %v2582_v30, %v2569_v14  ;;  %v2727_v14 = vld [vmem:[#allocation14 + $0x118] sm:$0xff] }
 0x851   :  { %v3663_v2 = vpop.eup %3662 }
 0x852   :  { %v2520_v62 = vmul.f32 %v3663_v2, %v2364_v63 }
 0x854   :  { %v5154_v42 = vrot.slane %v2520_v62, %v4263_v8 }
 0x856   :  { %2529 = vrot.lane.b32.xlu0 %v5154_v42, %s3921_s23  ;;  %2526 = vrot.lane.b32.xlu1 %v5154_v42, %s3898_s20  ;;  %v2598_v46 = vmul.f32 %v5154_v42, %v5139_v3  ;;  %v2596_v17 = vmul.f32 %v5154_v42, %v5136_v31  ;;  %v2600_v5 = vmul.f32 %v5154_v42, %v5146_v45  ;;  %s3925_s20 = smov [#allocation17]  }
 0x857   :  { %s3095_s18 = sshll.u32 %s3925_s20, 4  ;;  %s3096_s18 = int_to_ptr.vmem [resolvable:$true] %s3095_s18 }
 0x858   :  { %v2612_v27 = vadd.f32 %v2598_v46, %v5124_v51  ;;  %v2610_v3 = vadd.f32 %v2596_v17, %v5124_v51  ;;  %v2614_v63 = vadd.f32 %v2600_v5, %v5124_v51  ;;  %s3862_s4 = scalar_lea.vmem %s3096_s18, 32  ;;  %p3867_p3 = scmp.lt.s32.totalorder %s3096_s18, %s3096_s18 }
 0x859   :  { %p3863_p2 = scmp.ne.s32.totalorder %s3096_s18, %s3862_s4  ;;  %p3868_p4 = scmp.lt.s32.totalorder %s3862_s4, %s3862_s4 }
 0x85a   :  { %2532 = vrot.lane.b32.xlu1 %v5154_v42, %s3919_s21  ;;  %2571 = vrot.lane.b32.xlu0 %v5124_v51, %s3915_s15  ;;  %v2616_v23 = vmax.f32 %v2610_v3, 0.0  ;;  %v2620_v34 = vmax.f32 %v2614_v63, 0.0 }
 0x85b   :  { %p3869_p5 = por %p3868_p4, %p3867_p3 }
 0x85d   :  { %p3870_p6 = pnand %p3869_p5, %p3863_p2 }
 0x85e   :  { %2535 = vrot.lane.b32.xlu1 %v5154_v42, %s3917_s17  ;;  %2577 = vrot.lane.b32.xlu0 %v5124_v51, %s3914_s10 }
 0x862   :  { %2538 = vrot.lane.b32.xlu1 %v5154_v42, %s3915_s15 }
 0x866   :  { %2541 = vrot.lane.b32.xlu1 %v5154_v42, %s3913_s1 }
 0x86a   :  { %2544 = vrot.lane.b32.xlu1 %v5154_v42, %s3914_s10  ;;  %v2618_v42 = vmax.f32 %v2612_v27, 0.0 }
 0x86e   :  { %2574 = vrot.lane.b32.xlu1 %v5124_v51, %s3913_s1  ;;  %v2722_v51 = vld [vmem:[#allocation14 + $0xf0] sm:$0xff] }
 0x86f   :  { %v3464_v19 = vpack.c.bf16 %v2723_v28, %v2722_v51  ;;  %v2681_v28 = vld [vmem:[#allocation14 + $0x20] sm:$0xff] }
 0x8c8   :  { %v2527_v41 = vpop.permute.xlu1 %2526  ;;  %v2530_v6 = vpop.permute.xlu0 %2529 }
 0x8c9   :  { %v2547_v16 = vsel %vm828_vm8, %v2520_v62, %v2527_v41 }
 0x8ca   :  { %v2548_v13 = vsel %vm832_vm10, %v2547_v16, %v2530_v6 }
 0x8cc   :  { %v2533_v18 = vpop.permute.xlu1 %2532  ;;  %v2572_v47 = vpop.permute.xlu0 %2571 }
 0x8cd   :  { %v2549_v52 = vsel %vm836_vm12, %v2548_v13, %v2533_v18  ;;  %v2584_v55 = vsel %vm659_vm5, %v2583_v15, %v2572_v47  ;;  %v2726_v18 = vld [vmem:[#allocation14 + $0x110] sm:$0xff] }
 0x8ce   :  { %v3470_v16 = vpack.c.bf16 %v2727_v14, %v2726_v18  ;;  %v2688_v18 = vld [vmem:[#allocation14 + $0x58] sm:$0xff] }
 0x8d0   :  { %v2536_v49 = vpop.permute.xlu1 %2535  ;;  %v2578_v36 = vpop.permute.xlu0 %2577 }
 0x8d1   :  { %v2550_v56 = vsel %vm840_vm14, %v2549_v52, %v2536_v49 }
 0x8d4   :  { %v2539_v37 = vpop.permute.xlu1 %2538 }
 0x8d5   :  { %v2551_v32 = vsel %vm659_vm5, %v2550_v56, %v2539_v37 }
 0x8d8   :  { %v2542_v24 = vpop.permute.xlu1 %2541 }
 0x8d9   :  { %v2552_v61 = vsel %vm847_vm2, %v2551_v32, %v2542_v24 }
 0x8dc   :  { %v2545_v22 = vpop.permute.xlu1 %2544 }
 0x8dd   :  { %v2553_v60 = vsel %vm851_vm4, %v2552_v61, %v2545_v22 }
 0x8de   :  { %v2590_v10 = vrot.slane %v2553_v60, %v4263_v8 }
 0x8e0   :  { %v2575_v48 = vpop.permute.xlu1 %2574  ;;  %v2595_v9 = vmul.f32 %v2590_v10, %v5098_v25  ;;  %v2597_v31 = vmul.f32 %v2590_v10, %v5101_v38  ;;  %v2599_v58 = vmul.f32 %v2590_v10, %v5104_v43  ;;  %v3461_v25 = vpack.c.bf16 %v2721_v35, %v2720_v44 }
 0x8e1   :  { %v2585_v26 = vsel %vm847_vm2, %v2584_v55, %v2575_v48 }
 0x8e2   :  { %v2586_v21 = vsel %vm851_vm4, %v2585_v26, %v2578_v36  ;;  %3462 = vmatpush1.bf16.msra.mxu0 %v3461_v25 }
 0x8e3   :  { %v2604_v59 = vrot.slane %v2586_v21, %v4263_v8  ;;  %3463 = vmatprep.subr.bf16.mxu0 %v3924_v20 }
 0x8e5   :  { %v2609_v2 = vadd.f32 %v2604_v59, %v2595_v9  ;;  %v2611_v45 = vadd.f32 %v2604_v59, %v2597_v31  ;;  %v2613_v62 = vadd.f32 %v2604_v59, %v2599_v58 }
 0x8e6   :  { %3465 = vmatpush1.bf16.msra.mxu0 %v3464_v19  ;;  %v2684_v19 = vld [vmem:[#allocation14 + $0x38] sm:$0xff] }
 0x8e7   :  { %v2615_v0 = vmax.f32 %v2609_v2, 0.0  ;;  %v2617_v54 = vmax.f32 %v2611_v45, 0.0  ;;  %v5211_v7 = vmax.f32 %v2613_v62, 0.0  ;;  %3466 = vmatprep.subr.bf16.mxu0 %v3924_v20  ;;  %v2677_v45 = vld [vmem:[#allocation14] sm:$0xff]  ;;  %v2678_v62 = vld [vmem:[#allocation14 + $0x8] sm:$0xff] }
 0x8e8   :  { %v3473_v35 = vpack.c.bf16 %v2678_v62, %v2677_v45  ;;  %v2901_v62 = vld [vmem:[#allocation14 + $0x1a0] sm:$0xff] }
 0x8e9   :  { %v3650_v38 = vpack.i.bf16 %v2618_v42, %v2617_v54  ;;  %v2648_v40 = vmax.f32 %v2618_v42, %v2617_v54  ;;  %v3645_v43 = vpack.i.bf16 %v2616_v23, %v2615_v0  ;;  %v2646_v39 = vmax.f32 %v2616_v23, %v2615_v0 }
 0x8ea   :  { %v2650_v8 = vmax.f32 %v2620_v34, %v5211_v7  ;;  %v3655_v41 = vpack.i.bf16 %v2620_v34, %v5211_v7  ;;  %3468 = vmatpush1.bf16.msra.mxu0 %v3467_v53  ;;  %v2687_v53 = vld [vmem:[#allocation14 + $0x50] sm:$0xff] }
 0x8eb   :  { %3651 = vrot.lane.b32.xlu0 %v3650_v38, %s3914_s10  ;;  %v2661_v33 = vrot.slane %v2648_v40, 1  ;;  %3646 = vrot.lane.b32.xlu1 %v3645_v43, %s3914_s10  ;;  %v2660_v57 = vrot.slane %v2646_v39, 1  ;;  %v3488_v14 = vpack.c.bf16 %v2688_v18, %v2687_v53  ;;  %v3003_v53 = vld [vmem:[#allocation14 + $0x228] sm:$0xff] }
 0x8ec   :  { %v2665_v50 = vrot.slane %v2650_v8, 1  ;;  %3469 = vmatprep.subr.bf16.mxu0 %v3924_v20 }
 0x8ed   :  { %v2662_v1 = vsel %vm1333_vm13, %v2660_v57, %v2661_v33  ;;  %v2683_v57 = vld [vmem:[#allocation14 + $0x30] sm:$0xff] }
 0x8ee   :  { %v2672_v49 = vmax.f32 %v2646_v39, %v2662_v1  ;;  %v2666_v4 = vsel %vm1333_vm13, %v2661_v33, %v2665_v50  ;;  %3471 = vmatpush1.bf16.msra.mxu0 %v3470_v16  ;;  %v3479_v33 = vpack.c.bf16 %v2682_v12, %v2681_v28  ;;  %v3482_v11 = vpack.c.bf16 %v2684_v19, %v2683_v57  ;;  %v2685_v50 = vld [vmem:[#allocation14 + $0x40] sm:$0xff]  ;;  %v2686_v1 = vld [vmem:[#allocation14 + $0x48] sm:$0xff]  ;;  %v2692_v16 = vld [vmem:[#allocation14 + $0x78] sm:$0xff] }
 0x8ef   :  { %3656 = vrot.lane.b32.xlu1 %v3655_v41, %s3914_s10  ;;  %v2674_v37 = vmax.f32 %v2648_v40, %v2666_v4  ;;  %3472 = vmatprep.subr.bf16.mxu0 %v3924_v20  ;;  %v2679_v40 = vld [vmem:[#allocation14 + $0x10] sm:$0xff]  ;;  %v3485_v41 = vpack.c.bf16 %v2686_v1, %v2685_v50  ;;  %v2690_v4 = vld [vmem:[#allocation14 + $0x68] sm:$0xff]  ;;  %v2997_v12 = vld [vmem:[#allocation14 + $0x1f8] sm:$0xff] }
 0x8f0   :  { %v2698_v6 = vrot.slane %v2672_v49, 2  ;;  %v2875_v29 = vrot.slane %v2672_v49, 4  ;;  %v2978_v13 = vrot.slane %v2672_v49, 6  ;;  %v2999_v57 = vld [vmem:[#allocation14 + $0x208] sm:$0xff]  ;;  %v3001_v50 = vld [vmem:[#allocation14 + $0x218] sm:$0xff] }
 0x8f1   :  { %v2704_v24 = vrot.slane %v2674_v37, 2  ;;  %v2676_v52 = vsel %vm1459_vm1, %v2672_v49, %v2674_v37  ;;  %v2879_v30 = vrot.slane %v2674_v37, 4  ;;  %v2982_v56 = vrot.slane %v2674_v37, 6  ;;  %v2689_v49 = vld [vmem:[#allocation14 + $0x60] sm:$0xff] }
 0x8f2   :  { %v3491_v37 = vpack.c.bf16 %v2690_v4, %v2689_v49  ;;  %v3005_v49 = vld [vmem:[#allocation14 + $0x238] sm:$0xff] }
 0x8f3   :  { %v2708_v47 = vsel %vm1459_vm1, %v2698_v6, %v2704_v24  ;;  %v5226_v32 = vsel %vm1459_vm1, %v2875_v29, %v2879_v30  ;;  %v5229_v61 = vsel %vm1459_vm1, %v2978_v13, %v2982_v56  ;;  %v2691_v6 = vld [vmem:[#allocation14 + $0x70] sm:$0xff]  ;;  %v2693_v13 = vld [vmem:[#allocation14 + $0x80] sm:$0xff]  ;;  %v2694_v24 = vld [vmem:[#allocation14 + $0x88] sm:$0xff] }
 0x8f4   :  { %3150 = vmatprep.mubr.msk.f32.mxu0 %vm828_vm8, %v2708_v47  ;;  %v3494_v29 = vpack.c.bf16 %v2692_v16, %v2691_v6  ;;  %v2885_v30 = vld [vmem:[#allocation14 + $0x120] sm:$0xff]  ;;  %v2886_v56 = vld [vmem:[#allocation14 + $0x128] sm:$0xff] }
 0x8f5   :  { %v3500_v47 = vpack.c.bf16 %v2886_v56, %v2885_v30 }
 0x95d   :  { %v3652_v22 = vpop.permute.xlu0 %3651  ;;  %v3647_v15 = vpop.permute.xlu1 %3646 }
 0x95e   :  { %v3654_v60 = vunpack.i.h.bf16 %v3652_v22  ;;  %v3653_v46 = vunpack.i.l.bf16 %v3652_v22  ;;  %v3649_v17 = vunpack.i.h.bf16 %v3647_v15  ;;  %v3648_v10 = vunpack.i.l.bf16 %v3647_v15  ;;  %v2887_v22 = vld [vmem:[#allocation14 + $0x130] sm:$0xff]  ;;  %v2888_v15 = vld [vmem:[#allocation14 + $0x138] sm:$0xff] }
 0x960   :  { %v2640_v36 = vsel %vm851_vm4, %v3653_v46, %v3654_v60  ;;  %v2639_v55 = vsel %vm851_vm4, %v3648_v10, %v3649_v17  ;;  %v3503_v46 = vpack.c.bf16 %v2888_v15, %v2887_v22  ;;  %v2889_v17 = vld [vmem:[#allocation14 + $0x140] sm:$0xff]  ;;  %v2890_v10 = vld [vmem:[#allocation14 + $0x148] sm:$0xff] }
 0x961   :  { %v2647_v48 = vmax.f32 %v2617_v54, %v2640_v36  ;;  %v2645_v5 = vmax.f32 %v2615_v0, %v2639_v55  ;;  %v3657_v26 = vpop.permute.xlu1 %3656  ;;  %v3506_v36 = vpack.c.bf16 %v2890_v10, %v2889_v17  ;;  %v2891_v55 = vld [vmem:[#allocation14 + $0x150] sm:$0xff] }
 0x962   :  { %v3659_v21 = vunpack.i.h.bf16 %v3657_v26  ;;  %v3658_v27 = vunpack.i.l.bf16 %v3657_v26  ;;  %v2893_v26 = vld [vmem:[#allocation14 + $0x160] sm:$0xff] }
 0x963   :  { %v2658_v3 = vrot.slane %v2647_v48, 1  ;;  %v2657_v9 = vrot.slane %v2645_v5, 1 }
 0x964   :  { %v2641_v31 = vsel %vm851_vm4, %v3658_v27, %v3659_v21  ;;  %v2894_v21 = vld [vmem:[#allocation14 + $0x168] sm:$0xff] }
 0x965   :  { %v2659_v58 = vsel %vm1333_vm13, %v2657_v9, %v2658_v3  ;;  %v2649_v59 = vmax.f32 %v5211_v7, %v2641_v31  ;;  %v2680_v7 = vld [vmem:[#allocation14 + $0x18] sm:$0xff]  ;;  %v3512_v27 = vpack.c.bf16 %v2894_v21, %v2893_v26  ;;  %v2897_v31 = vld [vmem:[#allocation14 + $0x180] sm:$0xff] }
 0x966   :  { %v5238_v63 = vmax.f32 %v2645_v5, %v2659_v58  ;;  %v3476_v51 = vpack.c.bf16 %v2680_v7, %v2679_v40  ;;  %v2898_v58 = vld [vmem:[#allocation14 + $0x188] sm:$0xff]  ;;  %v2993_v40 = vld [vmem:[#allocation14 + $0x1d8] sm:$0xff] }
 0x967   :  { %v2663_v2 = vrot.slane %v2649_v59, 1  ;;  %v3518_v59 = vpack.c.bf16 %v2898_v58, %v2897_v31 }
 0x968   :  { %v2697_v44 = vrot.slane %v5238_v63, 2  ;;  %v2874_v0 = vrot.slane %v5238_v63, 4  ;;  %v2977_v34 = vrot.slane %v5238_v63, 6 }
 0x969   :  { %v2664_v42 = vsel %vm1333_vm13, %v2658_v3, %v2663_v2  ;;  %v2896_v3 = vld [vmem:[#allocation14 + $0x178] sm:$0xff] }
 0x96a   :  { %v2673_v23 = vmax.f32 %v2647_v48, %v2664_v42  ;;  %v2892_v48 = vld [vmem:[#allocation14 + $0x158] sm:$0xff]  ;;  %v2902_v42 = vld [vmem:[#allocation14 + $0x1a8] sm:$0xff] }
 0x96b   :  { %v3509_v5 = vpack.c.bf16 %v2892_v48, %v2891_v55  ;;  %v2900_v2 = vld [vmem:[#allocation14 + $0x198] sm:$0xff] }
 0x96c   :  { %v2703_v54 = vrot.slane %v2673_v23, 2  ;;  %v2878_v25 = vrot.slane %v2673_v23, 4  ;;  %v2981_v38 = vrot.slane %v2673_v23, 6  ;;  %v2675_v60 = vsel %vm1459_vm1, %v5238_v63, %v2673_v23  ;;  %v2899_v63 = vld [vmem:[#allocation14 + $0x190] sm:$0xff] }
 0x96d   :  { %v3521_v45 = vpack.c.bf16 %v2900_v2, %v2899_v63  ;;  %v3524_v23 = vpack.c.bf16 %v2902_v42, %v2901_v62 }
 0x96e   :  { %v2707_v43 = vsel %vm1459_vm1, %v2697_v44, %v2703_v54  ;;  %v5246_v39 = vsel %vm1459_vm1, %v2874_v0, %v2878_v25  ;;  %v5249_v8 = vsel %vm1459_vm1, %v2977_v34, %v2981_v38  ;;  %v2988_v44 = vld [vmem:[#allocation14 + $0x1b0] sm:$0xff]  ;;  %v2990_v54 = vld [vmem:[#allocation14 + $0x1c0] sm:$0xff]  ;;  %v2991_v25 = vld [vmem:[#allocation14 + $0x1c8] sm:$0xff] }
 0x96f   :  { %2796 = vmatmul.mubr.f32.vlgmr.msra.gmra.mrb[20].mxu0 %v2707_v43  ;;  %v3530_v34 = vpack.c.bf16 %v2991_v25, %v2990_v54  ;;  %v2992_v38 = vld [vmem:[#allocation14 + $0x1d0] sm:$0xff]  ;;  %v2994_v43 = vld [vmem:[#allocation14 + $0x1e0] sm:$0xff] }
 0x970   :  { %3474 = vmatpush1.bf16.msra.mxu0 %v3473_v35  ;;  %3151 = vmatprep.mubr.msk.f32.mxu0 %vm828_vm8, %v2676_v52  ;;  %v3497_v52 = vpack.c.bf16 %v2694_v24, %v2693_v13  ;;  %v2989_v35 = vld [vmem:[#allocation14 + $0x1b8] sm:$0xff]  ;;  %v3533_v7 = vpack.c.bf16 %v2993_v40, %v2992_v38 }
 0x971   :  { %3475 = vmatprep.subr.bf16.mxu0 %v3924_v20  ;;  %v3527_v0 = vpack.c.bf16 %v2989_v35, %v2988_v44 }
 0x974   :  { %3477 = vmatpush1.bf16.msra.mxu0 %v3476_v51  ;;  %v2995_v51 = vld [vmem:[#allocation14 + $0x1e8] sm:$0xff] }
 0x975   :  { %3478 = vmatprep.subr.bf16.mxu0 %v3924_v20  ;;  %v3536_v28 = vpack.c.bf16 %v2995_v51, %v2994_v43 }
 0x978   :  { %3480 = vmatpush1.bf16.msra.mxu0 %v3479_v33 }
 0x979   :  { %3481 = vmatprep.subr.bf16.mxu0 %v3924_v20 }
 0x97c   :  { %3483 = vmatpush1.bf16.msra.mxu0 %v3482_v11  ;;  %v3000_v11 = vld [vmem:[#allocation14 + $0x210] sm:$0xff] }
 0x97d   :  { %3484 = vmatprep.subr.bf16.mxu0 %v3924_v20  ;;  %v3545_v1 = vpack.c.bf16 %v3001_v50, %v3000_v11 }
 0x980   :  { %3486 = vmatpush1.bf16.msra.mxu0 %v3485_v41  ;;  %v3002_v41 = vld [vmem:[#allocation14 + $0x220] sm:$0xff] }
 0x981   :  { %3487 = vmatprep.subr.bf16.mxu0 %v3924_v20  ;;  %v3548_v18 = vpack.c.bf16 %v3003_v53, %v3002_v41 }
 0x984   :  { %3489 = vmatpush1.bf16.msra.mxu0 %v3488_v14  ;;  %v3004_v14 = vld [vmem:[#allocation14 + $0x230] sm:$0xff] }
 0x985   :  { %3490 = vmatprep.subr.bf16.mxu0 %v3924_v20  ;;  %v3551_v4 = vpack.c.bf16 %v3005_v49, %v3004_v14 }
 0x988   :  { %3492 = vmatpush1.bf16.msra.mxu0 %v3491_v37 }
 0x989   :  { %3493 = vmatprep.subr.bf16.mxu0 %v3924_v20 }
 0x98c   :  { %3495 = vmatpush1.bf16.msra.mxu0 %v3494_v29 }
 0x98d   :  { %3496 = vmatprep.subr.bf16.mxu0 %v3924_v20 }
 0x990   :  { %3498 = vmatpush1.bf16.msra.mxu0 %v3497_v52 }
 0x991   :  { %3499 = vmatprep.subr.bf16.mxu0 %v3924_v20 }
 0x993   :  { %2869 = vmatmul.mubr.f32.vlgmr.msra.gmra.mrb[22].mxu0 %v2675_v60 }
 0x994   :  { %3501 = vmatpush1.bf16.msra.mxu0 %v3500_v47  ;;  %3152 = vmatprep.mubr.msk.f32.mxu0 %vm828_vm8, %v5226_v32  ;;  %v2895_v32 = vld [vmem:[#allocation14 + $0x170] sm:$0xff]  ;;  %v3154_v47 = vld [vmem:[#allocation16] ss:$0 sm:$0xff] }
 0x995   :  { %3502 = vmatprep.subr.bf16.mxu0 %v3924_v20  ;;  %v3515_v9 = vpack.c.bf16 %v2896_v3, %v2895_v32 }
 0x998   :  { %3504 = vmatpush1.bf16.msra.mxu0 %v3503_v46 }
 0x999   :  { %3505 = vmatprep.subr.bf16.mxu0 %v3924_v20 }
 0x99c   :  { %3507 = vmatpush1.bf16.msra.mxu0 %v3506_v36 }
 0x99d   :  { %3508 = vmatprep.subr.bf16.mxu0 %v3924_v20 }
 0x9a0   :  { %3510 = vmatpush1.bf16.msra.mxu0 %v3509_v5 }
 0x9a1   :  { %3511 = vmatprep.subr.bf16.mxu0 %v3924_v20 }
 0x9a4   :  { %3513 = vmatpush1.bf16.msra.mxu0 %v3512_v27 }
 0x9a5   :  { %3514 = vmatprep.subr.bf16.mxu0 %v3924_v20 }
 0x9a8   :  { %3516 = vmatpush1.bf16.msra.mxu0 %v3515_v9 }
 0x9a9   :  { %3517 = vmatprep.subr.bf16.mxu0 %v3924_v20 }
 0x9ac   :  { %3519 = vmatpush1.bf16.msra.mxu0 %v3518_v59 }
 0x9ad   :  { %3520 = vmatprep.subr.bf16.mxu0 %v3924_v20 }
 0x9b0   :  { %3522 = vmatpush1.bf16.msra.mxu0 %v3521_v45 }
 0x9b1   :  { %3523 = vmatprep.subr.bf16.mxu0 %v3924_v20 }
 0x9b4   :  { %3525 = vmatpush1.bf16.msra.mxu0 %v3524_v23 }
 0x9b5   :  { %3526 = vmatprep.subr.bf16.mxu0 %v3924_v20 }
 0x9b7   :  { %2971 = vmatmul.mubr.f32.vlgmr.msra.gmra.mrb[24].mxu0 %v5246_v39  ;;  %v2996_v39 = vld [vmem:[#allocation14 + $0x1f0] sm:$0xff] }
 0x9b8   :  { %3528 = vmatpush1.bf16.msra.mxu0 %v3527_v0  ;;  %3153 = vmatprep.mubr.msk.f32.mxu0 %vm828_vm8, %v5229_v61  ;;  %v3539_v33 = vpack.c.bf16 %v2997_v12, %v2996_v39  ;;  %v2998_v61 = vld [vmem:[#allocation14 + $0x200] sm:$0xff] }
 0x9b9   :  { %3529 = vmatprep.subr.bf16.mxu0 %v3924_v20  ;;  %v3542_v19 = vpack.c.bf16 %v2999_v57, %v2998_v61 }
 0x9bc   :  { %3531 = vmatpush1.bf16.msra.mxu0 %v3530_v34 }
 0x9bd   :  { %3532 = vmatprep.subr.bf16.mxu0 %v3924_v20 }
 0x9c0   :  { %3534 = vmatpush1.bf16.msra.mxu0 %v3533_v7 }
 0x9c1   :  { %3535 = vmatprep.subr.bf16.mxu0 %v3924_v20 }
 0x9c4   :  { %3537 = vmatpush1.bf16.msra.mxu0 %v3536_v28 }
 0x9c5   :  { %3538 = vmatprep.subr.bf16.mxu0 %v3924_v20 }
 0x9c8   :  { %3540 = vmatpush1.bf16.msra.mxu0 %v3539_v33 }
 0x9c9   :  { %3541 = vmatprep.subr.bf16.mxu0 %v3924_v20 }
 0x9cc   :  { %3543 = vmatpush1.bf16.msra.mxu0 %v3542_v19 }
 0x9cd   :  { %3544 = vmatprep.subr.bf16.mxu0 %v3924_v20 }
 0x9d0   :  { %3546 = vmatpush1.bf16.msra.mxu0 %v3545_v1 }
 0x9d1   :  { %3547 = vmatprep.subr.bf16.mxu0 %v3924_v20 }
 0x9d4   :  { %3549 = vmatpush1.bf16.msra.mxu0 %v3548_v18 }
 0x9d5   :  { %3550 = vmatprep.subr.bf16.mxu0 %v3924_v20 }
 0x9d8   :  { %3552 = vmatpush1.bf16.msra.mxu0 %v3551_v4 }
 0x9db   :  { %3074 = vmatmul.mubr.f32.vlgmr.msra.gmra.mrb[26].mxu0 %v5249_v8 }
 0xa42   :  { %v2797_v37 = vpop.f32.mrb[20].mxu0 }
 0xa43   :  { %v2799_v6 = vpop.f32.mrb[21].mxu0 }
 0xa66   :  { %v2870_v16 = vpop.f32.mrb[22].mxu0 }
 0xa67   :  { %v2871_v29 = vadd.f32 %v2870_v16, %v2797_v37  ;;  %v2872_v13 = vpop.f32.mrb[23].mxu0 }
 0xa8a   :  { %v2972_v24 = vpop.f32.mrb[24].mxu0 }
 0xa8b   :  { %v2976_v52 = vadd.f32 %v2972_v24, %v2871_v29  ;;  %v2974_v30 = vpop.f32.mrb[25].mxu0 }
 0xaae   :  { %v3075_v56 = vpop.f32.mrb[26].mxu0 }
 0xaaf   :  { %v3079_v22 = vadd.f32 %v3075_v56, %v2976_v52  ;;  %v3077_v15 = vpop.f32.mrb[27].mxu0 }
 0xab1   :  { %v3087_v60 = vadd.f32 %v3154_v47, %v3079_v22 }
 0xab3   :  { %3088 = vst [vmem:[#allocation17] sm:$0x3] %v3087_v60 }
 0xab4   :  { %3873 = shalt.err (!%p3870_p6)
}
 0xab5   :  { %s3874_s26 = scalar_lea.hbm %s5307_s9, 32 }
 0xab6   :  { %p3875_p7 = scmp.ne.s32.totalorder %s5307_s9, %s3874_s26  ;;  %p3878_p8 = scmp.lt.u32.totalorder %s3874_s26, %s5307_s9 }
 0xab8   :  { %p3880_p9 = pnand %p3878_p8, %p3875_p7 }
 0xaba   :  { %3883 = shalt.err (!%p3880_p9)
}
 0xabb   :  { %3098 = dma.vmem_to_hbm [thread:$0]  %s3096_s18, 32, %s5307_s9, [#allocation4]  }
 0xabc   :  { %3894 = dma.done.wait [#allocation4], 32  }
 0xabd   :  { %3895 = vsyncadd [#allocation4], 4294967264 }
 0xabe   :  { %3102 = vsyncpa [#allocation3], 1 }
 0xabf   :  { %3103 = vsyncpa [#allocation6], 1 }
 0xac0   :  { %3104 = vsyncpa [#allocation9], 1 }
 0xac1   :  { %3105 = vsyncpa [#allocation12], 1 }
 0xac2   :  { %3106 = vsyncpa [#allocation15], 1 }
 0xac3   :  { %3107 = vsyncpa [#allocation4], 1 }

</bundles_post_ra>
